<compile_context>
chip_gen: v7x
topology: tpu7x:2x2x1
jax: 0.10.0
libtpu: 0.0.40
codegen_flags: <defaults>
</compile_context>

<pallas_src>
import functools
import math

import jax
import jax.numpy as jnp
from jax.experimental import pallas as pl
from jax.experimental.pallas import tpu as pltpu


def _cdiv(a, b):
  return -(-a // b)


def _round_up(x, m):
  return _cdiv(x, m) * m


# ----------------------------------------------------------------------------
# Pallas kernel: one (TH x Wo) output tile of one image, all Cout channels.
#   g_ref : (P, TH+pext, Wg, Cin) bf16  phase-packed input window (P = sh*sw)
#   w_ref : (kh*kw, Cin, Co_p)    bf16  shared weight, one (Cin, Co_p) slab per tap
#   b_ref : (1, Co_p)             f32   optional bias
#   o_ref : (TH*Wo, Co_p)         bf16  output tile (rows flattened, lane-dense)
# The kh*kw taps are accumulated as separate MXU dots into an f32 value; the
# epilogue fuses bias + optional ReLU and casts once to bf16.
# ----------------------------------------------------------------------------
def _fused_conv_kernel(*refs, taps, th, wo, relu, add_bias):
  if add_bias:
    g_ref, w_ref, b_ref, o_ref = refs
  else:
    g_ref, w_ref, o_ref = refs
    b_ref = None
  cin = g_ref.shape[-1]
  acc = None
  for ti, (plane, p, q) in enumerate(taps):
    slab = g_ref[plane, p:p + th, q:q + wo, :]            # (th, wo, cin) bf16
    lhs = slab.reshape(th * wo, cin)
    contrib = jnp.dot(lhs, w_ref[ti], preferred_element_type=jnp.float32)
    acc = contrib if acc is None else acc + contrib
  if add_bias:
    acc = acc + b_ref[...]                                 # (1, Co_p) broadcast
  if relu:
    acc = jnp.maximum(acc, 0.0)
  o_ref[...] = acc.astype(o_ref.dtype)


def _vmem_bytes(P, thp, Wg, cin, th, wo, co_p, n_taps):
  win = P * thp * Wg * cin * 2            # bf16 input window
  out = th * wo * co_p * 2                # bf16 output tile
  acc = th * wo * co_p * 4                # f32 accumulator value
  slab = th * wo * cin * 4                # per-tap lhs temporaries (generous)
  wgt = n_taps * cin * co_p * 2 * 2       # resident weight (+ buffer slack)
  return 2 * win + 2 * out + acc + slab + wgt + co_p * 8


def _pick_tile_h(Ho, Wo, Wg, cin, co_p, P, pext, n_taps, N):
  """Largest output-row tile within a v7x-safe VMEM budget; >= 2 grid steps."""
  budget = 40 * 1024 * 1024               # v7x has 64 MiB VMEM; stay well under
  th = _round_up(max(1, _cdiv(1024, max(Wo, 1))), 8)      # target ~1024 rows/step
  th = min(th, _round_up(Ho, 8))
  while th > 8 and _vmem_bytes(P, th + pext, Wg, cin, th, Wo, co_p, n_taps) > budget:
    th -= 8
  th = max(th, 8)
  if N == 1 and th >= Ho and Ho > 8:      # keep both v7x TensorCores busy
    th = _round_up(_cdiv(Ho, 2), 8)
  return th


# ----------------------------------------------------------------------------
# One F.conv2d branch: fused im2col + matmul (+bias/ReLU) on the MXU.
# ----------------------------------------------------------------------------
def conv2d_fused(x_nchw, w_taps, b_mat, *, kh, kw, cout, co_p,
                 stride, padding, dilation, relu):
  N, Cin, H, W = x_nchw.shape
  sh, sw = stride
  ph, pw = padding
  dh, dw = dilation
  n_taps = kh * kw

  # --- glue (fused HBM pass): NCHW -> NHWC, bf16 cast, spatial zero pad ------
  x = jnp.transpose(x_nchw, (0, 2, 3, 1)).astype(jnp.bfloat16)
  xp = jnp.pad(x, ((0, 0), (ph, ph), (pw, pw), (0, 0)))
  Hp, Wp = H + 2 * ph, W + 2 * pw
  oi_max, oj_max = dh * (kh - 1), dw * (kw - 1)
  Ho = (Hp - oi_max - 1) // sh + 1
  Wo = (Wp - oj_max - 1) // sw + 1

  # --- phase packing (space-to-batch over the stride): afterwards every tap
  #     access in the kernel is a contiguous slice (no strided gathers) -------
  Hg, Wg = _cdiv(Hp, sh), _cdiv(Wp, sw)
  xp = jnp.pad(xp, ((0, 0), (0, Hg * sh - Hp), (0, Wg * sw - Wp), (0, 0)))
  P = sh * sw
  g = xp.reshape(N, Hg, sh, Wg, sw, Cin)
  g = g.transpose(2, 4, 0, 1, 3, 5).reshape(P, N, Hg, Wg, Cin)

  # per-tap (phase plane, row offset, col offset) in phase coordinates
  taps = []
  for i in range(kh):
    for j in range(kw):
      oi, oj = i * dh, j * dw
      taps.append(((oi % sh) * sw + (oj % sw), oi // sh, oj // sw))
  pext = max(p for _, p, _ in taps)

  # --- output-row tiling (VMEM budgeted) -------------------------------------
  th = _pick_tile_h(Ho, Wo, Wg, Cin, co_p, P, pext, n_taps, N)
  nT = _cdiv(Ho, th)
  Ho_pad = nT * th
  thp = th + pext

  # per-tile H windows (tiny halo duplication keeps every BlockSpec plain)
  h_need = Ho_pad + pext
  if h_need > Hg:
    g = jnp.pad(g, ((0, 0), (0, 0), (0, h_need - Hg), (0, 0), (0, 0)))
  row_idx = jnp.arange(nT)[:, None] * th + jnp.arange(thp)[None, :]
  g2 = g[:, :, row_idx]                   # (P, N, nT, thp, Wg, Cin) bf16

  kernel = functools.partial(_fused_conv_kernel, taps=tuple(taps), th=th,
                             wo=Wo, relu=relu, add_bias=b_mat is not None)
  in_arrays = [g2, w_taps]
  in_specs = [
      pl.BlockSpec((P, None, None, thp, Wg, Cin),
                   lambda n, t: (0, n, t, 0, 0, 0)),
      pl.BlockSpec((n_taps, Cin, co_p), lambda n, t: (0, 0, 0)),
  ]
  if b_mat is not None:                   # drop the bias input entirely if absent
    in_arrays.append(b_mat)
    in_specs.append(pl.BlockSpec((1, co_p), lambda n, t: (0, 0)))

  need = _vmem_bytes(P, thp, Wg, Cin, th, Wo, co_p, n_taps)
  vmem_limit = int(min(56 * 2**20, max(32 * 2**20, int(1.25 * need))))

  out = pl.pallas_call(
      kernel,
      out_shape=jax.ShapeDtypeStruct((N, nT, th * Wo, co_p), jnp.bfloat16),
      grid=(N, nT),
      in_specs=in_specs,
      out_specs=pl.BlockSpec((None, None, th * Wo, co_p),
                             lambda n, t: (n, t, 0, 0)),
      compiler_params=pltpu.CompilerParams(
          dimension_semantics=("parallel", "parallel"),   # megacore sharding
          vmem_limit_bytes=vmem_limit),
  )(*in_arrays)

  # --- epilogue: trim padding, back to NCHW f32 to match the module contract --
  # TODO(synk): a real pipeline should keep this NHWC/bf16 for the next op.
  out = out.reshape(N, Ho_pad * Wo, co_p)[:, :Ho * Wo, :cout]
  out = out.reshape(N, Ho, Wo, cout)
  return jnp.transpose(out, (0, 3, 1, 2)).astype(jnp.float32)


# ----------------------------------------------------------------------------
# MultiScaleTridentConv.forward (shared weights, per-branch stride/padding).
# ----------------------------------------------------------------------------
def multi_scale_trident_conv_forward(weight_hwio, bias, inputs_nchw, *,
                                     strides, paddings, dilation=1, groups=1,
                                     num_branch=None, training=True,
                                     test_branch_idx=-1, activation_relu=False):
  if groups != 1:
    # TODO(synk): grouped convolution not implemented (module default groups=1).
    raise NotImplementedError("groups > 1 not supported")
  # TODO(synk): self.norm and arbitrary activation modules are not implemented;
  # norm=None (default) and a fused-ReLU activation are supported.
  if num_branch is None:
    num_branch = len(strides)
  eff_branches = num_branch if (training or test_branch_idx == -1) else 1
  assert len(inputs_nchw) == eff_branches

  kh, kw, cin_w, cout = weight_hwio.shape
  co_p = _round_up(cout, 128)
  # Shared weight/bias prep hoisted out of the branch loop (reused by all calls).
  w_taps = jnp.pad(weight_hwio.reshape(kh * kw, cin_w, cout),
                   ((0, 0), (0, 0), (0, co_p - cout))).astype(jnp.bfloat16)
  b_mat = None
  if bias is not None:
    b_mat = jnp.pad(jnp.reshape(bias, (1, cout)),
                    ((0, 0), (0, co_p - cout))).astype(jnp.float32)

  if training or test_branch_idx == -1:
    branch_args = list(zip(inputs_nchw, strides, paddings))
  else:
    branch_args = [(inputs_nchw[0], strides[-1], paddings[-1])]

  # TODO(synk): the branches could additionally be fused into a single
  # pallas_call by concatenating their row tiles along the grid; kept as one
  # call per branch here (weight prep is already shared/hoisted).
  outputs = []
  for x_nchw, s, p in branch_args:
    outputs.append(conv2d_fused(
        x_nchw, w_taps, b_mat, kh=kh, kw=kw, cout=cout, co_p=co_p,
        stride=(s, s), padding=(p, p), dilation=(dilation, dilation),
        relu=activation_relu))
  return outputs


# ----------------------------------------------------------------------------
# Deterministic parameter init (mirrors kaiming_uniform_(nonlinearity='relu')).
# ----------------------------------------------------------------------------
def init_trident_conv_params(key, in_channels, out_channels, kernel_size, *,
                             groups=1, bias=False):
  kh = kw = kernel_size
  fan_in = (in_channels // groups) * kh * kw
  gain = math.sqrt(2.0)                       # nonlinearity='relu'
  bound = math.sqrt(3.0) * gain / math.sqrt(fan_in)
  w_oihw = jax.random.uniform(key, (out_channels, in_channels // groups, kh, kw),
                              jnp.float32, minval=-bound, maxval=bound)
  b = jnp.zeros((out_channels,), jnp.float32) if bias else None
  return w_oihw, b


# ----------------------------------------------------------------------------
if __name__ == "__main__":
  key = jax.random.PRNGKey(0)
  wkey, bkey, x0key, x1key = jax.random.split(key, 4)

  # Small config consistent with GMFSS usage (shared 3x3, branches stride 1 & 2).
  in_ch, out_ch, ksize = 32, 64, 3
  num_branch = 2
  strides = (1, 2)
  paddings = (1, 1)

  weight_oihw, _ = init_trident_conv_params(wkey, in_ch, out_ch, ksize, bias=False)
  weight_hwio = jnp.transpose(weight_oihw, (2, 3, 1, 0))   # OIHW -> HWIO

  x0 = jax.random.normal(x0key, (2, in_ch, 16, 16), jnp.float32)
  x1 = jax.random.normal(x1key, (2, in_ch, 16, 16), jnp.float32)
  inputs = [x0, x1]

  # --- default module config: no bias, no activation -------------------------
  fwd = jax.jit(functools.partial(
      multi_scale_trident_conv_forward,
      strides=strides, paddings=paddings, dilation=1, groups=1,
      num_branch=num_branch, training=True, test_branch_idx=-1,
      activation_relu=False))
  outs = fwd(weight_hwio, None, inputs)
  outs = [jax.block_until_ready(o) for o in outs]

  assert len(outs) == num_branch
  assert outs[0].shape == (2, out_ch, 16, 16), outs[0].shape
  assert outs[1].shape == (2, out_ch, 8, 8), outs[1].shape
  assert all(o.dtype == jnp.float32 for o in outs)
  assert all(bool(jnp.all(jnp.isfinite(o))) for o in outs)

  # Correctness vs XLA conv (bf16 matmul tolerance).
  for x, o, s, p in zip(inputs, outs, strides, paddings):
    ref = jax.lax.conv_general_dilated(
        jnp.transpose(x, (0, 2, 3, 1)), weight_hwio,
        window_strides=(s, s), padding=[(p, p), (p, p)],
        dimension_numbers=("NHWC", "HWIO", "NHWC"))
    ref = jnp.transpose(ref, (0, 3, 1, 2))
    err = float(jnp.max(jnp.abs(o - ref)))
    assert err < 1e-1, f"max abs error {err}"

  # --- bias + fused-ReLU epilogue path ---------------------------------------
  bias = 0.1 * jax.random.normal(bkey, (out_ch,), jnp.float32)
  fwd_b = jax.jit(functools.partial(
      multi_scale_trident_conv_forward,
      strides=strides, paddings=paddings, dilation=1, groups=1,
      num_branch=num_branch, training=True, test_branch_idx=-1,
      activation_relu=True))
  outs_b = fwd_b(weight_hwio, bias, inputs)
  outs_b = [jax.block_until_ready(o) for o in outs_b]
  for x, o, s, p in zip(inputs, outs_b, strides, paddings):
    ref = jax.lax.conv_general_dilated(
        jnp.transpose(x, (0, 2, 3, 1)), weight_hwio,
        window_strides=(s, s), padding=[(p, p), (p, p)],
        dimension_numbers=("NHWC", "HWIO", "NHWC"))
    ref = jnp.maximum(ref + bias[None, None, None, :], 0.0)
    ref = jnp.transpose(ref, (0, 3, 1, 2))
    err = float(jnp.max(jnp.abs(o - ref)))
    assert err < 1e-1, f"max abs error {err}"

  print("KERNEL_OK")
</pallas_src>

<mosaic_0001>
module attributes {stable_mosaic.version = 11 : i64} {
  func.func @_fused_conv_kernel(%arg0: i32, %arg1: i32, %arg2: memref<4x1x1x9x9x32xbf16, #tpu.memory_space<vmem>>, %arg3: memref<9x32x128xbf16, #tpu.memory_space<vmem>>, %arg4: memref<1x1x64x128xbf16, #tpu.memory_space<vmem>>) attributes {dimension_semantics = [#tpu.dimension_semantics<parallel>, #tpu.dimension_semantics<parallel>], iteration_bounds = array<i64: 2, 1>, scalar_prefetch = 0 : i64, scratch_operands = 0 : i64, tpu.core_type = #tpu.core_type<tc>, window_params = [{transform_indices = @transform_0, window_bounds = array<i64: 4, 1, 1, 9, 9, 32>}, {pipeline_mode = #tpu.pipeline_mode<synchronous>, transform_indices = @transform_1, window_bounds = array<i64: 9, 32, 128>}, {transform_indices = @transform_2, window_bounds = array<i64: 1, 1, 64, 128>}]} {
    %c0 = arith.constant 0 : index
    %c0_0 = arith.constant 0 : index
    %c0_1 = arith.constant 0 : index
    %c0_2 = arith.constant 0 : index
    %c0_3 = arith.constant 0 : index
    %c0_4 = arith.constant 0 : index
    %0 = vector.load %arg2[%c0, %c0_0, %c0_1, %c0_2, %c0_3, %c0_4] : memref<4x1x1x9x9x32xbf16, #tpu.memory_space<vmem>>, vector<1x1x1x8x8x32xbf16>
    %1 = vector.shape_cast %0 : vector<1x1x1x8x8x32xbf16> to vector<8x8x32xbf16>
    %2 = vector.shape_cast %1 : vector<8x8x32xbf16> to vector<64x32xbf16>
    %c0_5 = arith.constant 0 : index
    %c0_6 = arith.constant 0 : index
    %c0_7 = arith.constant 0 : index
    %3 = vector.load %arg3[%c0_5, %c0_6, %c0_7] : memref<9x32x128xbf16, #tpu.memory_space<vmem>>, vector<1x32x128xbf16>
    %4 = vector.shape_cast %3 : vector<1x32x128xbf16> to vector<32x128xbf16>
    %cst = arith.constant dense<0.000000e+00> : vector<64x128xf32>
    %5 = tpu.matmul %2, %4, %cst {dimension_numbers = #tpu.dot_dimension_numbers<[1], [0], [0], [1], [0, 0, 1, 1], [], []>} : vector<64x32xbf16>, vector<32x128xbf16>, vector<64x128xf32> -> vector<64x128xf32>
    %c1 = arith.constant 1 : index
    %c0_8 = arith.constant 0 : index
    %c0_9 = arith.constant 0 : index
    %c0_10 = arith.constant 0 : index
    %c0_11 = arith.constant 0 : index
    %c0_12 = arith.constant 0 : index
    %6 = vector.load %arg2[%c1, %c0_8, %c0_9, %c0_10, %c0_11, %c0_12] : memref<4x1x1x9x9x32xbf16, #tpu.memory_space<vmem>>, vector<1x1x1x8x8x32xbf16>
    %7 = vector.shape_cast %6 : vector<1x1x1x8x8x32xbf16> to vector<8x8x32xbf16>
    %8 = vector.shape_cast %7 : vector<8x8x32xbf16> to vector<64x32xbf16>
    %c1_13 = arith.constant 1 : index
    %c0_14 = arith.constant 0 : index
    %c0_15 = arith.constant 0 : index
    %9 = vector.load %arg3[%c1_13, %c0_14, %c0_15] : memref<9x32x128xbf16, #tpu.memory_space<vmem>>, vector<1x32x128xbf16>
    %10 = vector.shape_cast %9 : vector<1x32x128xbf16> to vector<32x128xbf16>
    %cst_16 = arith.constant dense<0.000000e+00> : vector<64x128xf32>
    %11 = tpu.matmul %8, %10, %cst_16 {dimension_numbers = #tpu.dot_dimension_numbers<[1], [0], [0], [1], [0, 0, 1, 1], [], []>} : vector<64x32xbf16>, vector<32x128xbf16>, vector<64x128xf32> -> vector<64x128xf32>
    %12 = arith.addf %5, %11 : vector<64x128xf32>
    %c0_17 = arith.constant 0 : index
    %c0_18 = arith.constant 0 : index
    %c0_19 = arith.constant 0 : index
    %c0_20 = arith.constant 0 : index
    %c1_21 = arith.constant 1 : index
    %c0_22 = arith.constant 0 : index
    %13 = vector.load %arg2[%c0_17, %c0_18, %c0_19, %c0_20, %c1_21, %c0_22] : memref<4x1x1x9x9x32xbf16, #tpu.memory_space<vmem>>, vector<1x1x1x8x8x32xbf16>
    %14 = vector.shape_cast %13 : vector<1x1x1x8x8x32xbf16> to vector<8x8x32xbf16>
    %15 = vector.shape_cast %14 : vector<8x8x32xbf16> to vector<64x32xbf16>
    %c2 = arith.constant 2 : index
    %c0_23 = arith.constant 0 : index
    %c0_24 = arith.constant 0 : index
    %16 = vector.load %arg3[%c2, %c0_23, %c0_24] : memref<9x32x128xbf16, #tpu.memory_space<vmem>>, vector<1x32x128xbf16>
    %17 = vector.shape_cast %16 : vector<1x32x128xbf16> to vector<32x128xbf16>
    %cst_25 = arith.constant dense<0.000000e+00> : vector<64x128xf32>
    %18 = tpu.matmul %15, %17, %cst_25 {dimension_numbers = #tpu.dot_dimension_numbers<[1], [0], [0], [1], [0, 0, 1, 1], [], []>} : vector<64x32xbf16>, vector<32x128xbf16>, vector<64x128xf32> -> vector<64x128xf32>
    %19 = arith.addf %12, %18 : vector<64x128xf32>
    %c2_26 = arith.constant 2 : index
    %c0_27 = arith.constant 0 : index
    %c0_28 = arith.constant 0 : index
    %c0_29 = arith.constant 0 : index
    %c0_30 = arith.constant 0 : index
    %c0_31 = arith.constant 0 : index
    %20 = vector.load %arg2[%c2_26, %c0_27, %c0_28, %c0_29, %c0_30, %c0_31] : memref<4x1x1x9x9x32xbf16, #tpu.memory_space<vmem>>, vector<1x1x1x8x8x32xbf16>
    %21 = vector.shape_cast %20 : vector<1x1x1x8x8x32xbf16> to vector<8x8x32xbf16>
    %22 = vector.shape_cast %21 : vector<8x8x32xbf16> to vector<64x32xbf16>
    %c3 = arith.constant 3 : index
    %c0_32 = arith.constant 0 : index
    %c0_33 = arith.constant 0 : index
    %23 = vector.load %arg3[%c3, %c0_32, %c0_33] : memref<9x32x128xbf16, #tpu.memory_space<vmem>>, vector<1x32x128xbf16>
    %24 = vector.shape_cast %23 : vector<1x32x128xbf16> to vector<32x128xbf16>
    %cst_34 = arith.constant dense<0.000000e+00> : vector<64x128xf32>
    %25 = tpu.matmul %22, %24, %cst_34 {dimension_numbers = #tpu.dot_dimension_numbers<[1], [0], [0], [1], [0, 0, 1, 1], [], []>} : vector<64x32xbf16>, vector<32x128xbf16>, vector<64x128xf32> -> vector<64x128xf32>
    %26 = arith.addf %19, %25 : vector<64x128xf32>
    %c3_35 = arith.constant 3 : index
    %c0_36 = arith.constant 0 : index
    %c0_37 = arith.constant 0 : index
    %c0_38 = arith.constant 0 : index
    %c0_39 = arith.constant 0 : index
    %c0_40 = arith.constant 0 : index
    %27 = vector.load %arg2[%c3_35, %c0_36, %c0_37, %c0_38, %c0_39, %c0_40] : memref<4x1x1x9x9x32xbf16, #tpu.memory_space<vmem>>, vector<1x1x1x8x8x32xbf16>
    %28 = vector.shape_cast %27 : vector<1x1x1x8x8x32xbf16> to vector<8x8x32xbf16>
    %29 = vector.shape_cast %28 : vector<8x8x32xbf16> to vector<64x32xbf16>
    %c4 = arith.constant 4 : index
    %c0_41 = arith.constant 0 : index
    %c0_42 = arith.constant 0 : index
    %30 = vector.load %arg3[%c4, %c0_41, %c0_42] : memref<9x32x128xbf16, #tpu.memory_space<vmem>>, vector<1x32x128xbf16>
    %31 = vector.shape_cast %30 : vector<1x32x128xbf16> to vector<32x128xbf16>
    %cst_43 = arith.constant dense<0.000000e+00> : vector<64x128xf32>
    %32 = tpu.matmul %29, %31, %cst_43 {dimension_numbers = #tpu.dot_dimension_numbers<[1], [0], [0], [1], [0, 0, 1, 1], [], []>} : vector<64x32xbf16>, vector<32x128xbf16>, vector<64x128xf32> -> vector<64x128xf32>
    %33 = arith.addf %26, %32 : vector<64x128xf32>
    %c2_44 = arith.constant 2 : index
    %c0_45 = arith.constant 0 : index
    %c0_46 = arith.constant 0 : index
    %c0_47 = arith.constant 0 : index
    %c1_48 = arith.constant 1 : index
    %c0_49 = arith.constant 0 : index
    %34 = vector.load %arg2[%c2_44, %c0_45, %c0_46, %c0_47, %c1_48, %c0_49] : memref<4x1x1x9x9x32xbf16, #tpu.memory_space<vmem>>, vector<1x1x1x8x8x32xbf16>
    %35 = vector.shape_cast %34 : vector<1x1x1x8x8x32xbf16> to vector<8x8x32xbf16>
    %36 = vector.shape_cast %35 : vector<8x8x32xbf16> to vector<64x32xbf16>
    %c5 = arith.constant 5 : index
    %c0_50 = arith.constant 0 : index
    %c0_51 = arith.constant 0 : index
    %37 = vector.load %arg3[%c5, %c0_50, %c0_51] : memref<9x32x128xbf16, #tpu.memory_space<vmem>>, vector<1x32x128xbf16>
    %38 = vector.shape_cast %37 : vector<1x32x128xbf16> to vector<32x128xbf16>
    %cst_52 = arith.constant dense<0.000000e+00> : vector<64x128xf32>
    %39 = tpu.matmul %36, %38, %cst_52 {dimension_numbers = #tpu.dot_dimension_numbers<[1], [0], [0], [1], [0, 0, 1, 1], [], []>} : vector<64x32xbf16>, vector<32x128xbf16>, vector<64x128xf32> -> vector<64x128xf32>
    %40 = arith.addf %33, %39 : vector<64x128xf32>
    %c0_53 = arith.constant 0 : index
    %c0_54 = arith.constant 0 : index
    %c0_55 = arith.constant 0 : index
    %c1_56 = arith.constant 1 : index
    %c0_57 = arith.constant 0 : index
    %c0_58 = arith.constant 0 : index
    %41 = vector.load %arg2[%c0_53, %c0_54, %c0_55, %c1_56, %c0_57, %c0_58] : memref<4x1x1x9x9x32xbf16, #tpu.memory_space<vmem>>, vector<1x1x1x8x8x32xbf16>
    %42 = vector.shape_cast %41 : vector<1x1x1x8x8x32xbf16> to vector<8x8x32xbf16>
    %43 = vector.shape_cast %42 : vector<8x8x32xbf16> to vector<64x32xbf16>
    %c6 = arith.constant 6 : index
    %c0_59 = arith.constant 0 : index
    %c0_60 = arith.constant 0 : index
    %44 = vector.load %arg3[%c6, %c0_59, %c0_60] : memref<9x32x128xbf16, #tpu.memory_space<vmem>>, vector<1x32x128xbf16>
    %45 = vector.shape_cast %44 : vector<1x32x128xbf16> to vector<32x128xbf16>
    %cst_61 = arith.constant dense<0.000000e+00> : vector<64x128xf32>
    %46 = tpu.matmul %43, %45, %cst_61 {dimension_numbers = #tpu.dot_dimension_numbers<[1], [0], [0], [1], [0, 0, 1, 1], [], []>} : vector<64x32xbf16>, vector<32x128xbf16>, vector<64x128xf32> -> vector<64x128xf32>
    %47 = arith.addf %40, %46 : vector<64x128xf32>
    %c1_62 = arith.constant 1 : index
    %c0_63 = arith.constant 0 : index
    %c0_64 = arith.constant 0 : index
    %c1_65 = arith.constant 1 : index
    %c0_66 = arith.constant 0 : index
    %c0_67 = arith.constant 0 : index
    %48 = vector.load %arg2[%c1_62, %c0_63, %c0_64, %c1_65, %c0_66, %c0_67] : memref<4x1x1x9x9x32xbf16, #tpu.memory_space<vmem>>, vector<1x1x1x8x8x32xbf16>
    %49 = vector.shape_cast %48 : vector<1x1x1x8x8x32xbf16> to vector<8x8x32xbf16>
    %50 = vector.shape_cast %49 : vector<8x8x32xbf16> to vector<64x32xbf16>
    %c7 = arith.constant 7 : index
    %c0_68 = arith.constant 0 : index
    %c0_69 = arith.constant 0 : index
    %51 = vector.load %arg3[%c7, %c0_68, %c0_69] : memref<9x32x128xbf16, #tpu.memory_space<vmem>>, vector<1x32x128xbf16>
    %52 = vector.shape_cast %51 : vector<1x32x128xbf16> to vector<32x128xbf16>
    %cst_70 = arith.constant dense<0.000000e+00> : vector<64x128xf32>
    %53 = tpu.matmul %50, %52, %cst_70 {dimension_numbers = #tpu.dot_dimension_numbers<[1], [0], [0], [1], [0, 0, 1, 1], [], []>} : vector<64x32xbf16>, vector<32x128xbf16>, vector<64x128xf32> -> vector<64x128xf32>
    %54 = arith.addf %47, %53 : vector<64x128xf32>
    %c0_71 = arith.constant 0 : index
    %c0_72 = arith.constant 0 : index
    %c0_73 = arith.constant 0 : index
    %c1_74 = arith.constant 1 : index
    %c1_75 = arith.constant 1 : index
    %c0_76 = arith.constant 0 : index
    %55 = vector.load %arg2[%c0_71, %c0_72, %c0_73, %c1_74, %c1_75, %c0_76] : memref<4x1x1x9x9x32xbf16, #tpu.memory_space<vmem>>, vector<1x1x1x8x8x32xbf16>
    %56 = vector.shape_cast %55 : vector<1x1x1x8x8x32xbf16> to vector<8x8x32xbf16>
    %57 = vector.shape_cast %56 : vector<8x8x32xbf16> to vector<64x32xbf16>
    %c8 = arith.constant 8 : index
    %c0_77 = arith.constant 0 : index
    %c0_78 = arith.constant 0 : index
    %58 = vector.load %arg3[%c8, %c0_77, %c0_78] : memref<9x32x128xbf16, #tpu.memory_space<vmem>>, vector<1x32x128xbf16>
    %59 = vector.shape_cast %58 : vector<1x32x128xbf16> to vector<32x128xbf16>
    %cst_79 = arith.constant dense<0.000000e+00> : vector<64x128xf32>
    %60 = tpu.matmul %57, %59, %cst_79 {dimension_numbers = #tpu.dot_dimension_numbers<[1], [0], [0], [1], [0, 0, 1, 1], [], []>} : vector<64x32xbf16>, vector<32x128xbf16>, vector<64x128xf32> -> vector<64x128xf32>
    %61 = arith.addf %54, %60 : vector<64x128xf32>
    %62 = arith.truncf %61 : vector<64x128xf32> to vector<64x128xbf16>
    %c0_80 = arith.constant 0 : index
    %c0_81 = arith.constant 0 : index
    %c0_82 = arith.constant 0 : index
    %c0_83 = arith.constant 0 : index
    %63 = vector.load %arg4[%c0_80, %c0_81, %c0_82, %c0_83] : memref<1x1x64x128xbf16, #tpu.memory_space<vmem>>, vector<1x1x64x128xbf16>
    %64 = vector.shape_cast %63 : vector<1x1x64x128xbf16> to vector<64x128xbf16>
    %65 = vector.shape_cast %62 : vector<64x128xbf16> to vector<1x1x64x128xbf16>
    tpu.vector_store %arg4[%c0_80, %c0_81, %c0_82, %c0_83], %65 {strides = array<i32>} : memref<1x1x64x128xbf16, #tpu.memory_space<vmem>>, vector<1x1x64x128xbf16>,
    return
  }
  func.func @transform_0(%arg0: i32, %arg1: i32) -> (i32, i32, i32, i32, i32, i32) {
    %c0_i32 = arith.constant 0 : i32
    %c0_i32_0 = arith.constant 0 : i32
    %c0_i32_1 = arith.constant 0 : i32
    %c0_i32_2 = arith.constant 0 : i32
    %c0_i32_3 = arith.constant 0 : i32
    return %c0_i32, %arg0, %arg1, %c0_i32_0, %c0_i32_1, %c0_i32_2 : i32, i32, i32, i32, i32, i32
  }
  func.func @transform_1(%arg0: i32, %arg1: i32) -> (i32, i32, i32) {
    %c0_i32 = arith.constant 0 : i32
    %c0_i32_0 = arith.constant 0 : i32
    %c0_i32_1 = arith.constant 0 : i32
    %c0_i32_2 = arith.constant 0 : i32
    return %c0_i32, %c0_i32_0, %c0_i32_1 : i32, i32, i32
  }
  func.func @transform_2(%arg0: i32, %arg1: i32) -> (i32, i32, i32, i32) {
    %c0_i32 = arith.constant 0 : i32
    %c0_i32_0 = arith.constant 0 : i32
    %c0_i32_1 = arith.constant 0 : i32
    return %arg0, %arg1, %c0_i32, %c0_i32_0 : i32, i32, i32, i32
  }
}

module attributes {stable_mosaic.version = 11 : i64} {
  func.func @_fused_conv_kernel(%arg0: i32, %arg1: i32, %arg2: memref<1x1x1x18x18x32xbf16, #tpu.memory_space<vmem>>, %arg3: memref<9x32x128xbf16, #tpu.memory_space<vmem>>, %arg4: memref<1x1x256x128xbf16, #tpu.memory_space<vmem>>) attributes {dimension_semantics = [#tpu.dimension_semantics<parallel>, #tpu.dimension_semantics<parallel>], iteration_bounds = array<i64: 2, 1>, scalar_prefetch = 0 : i64, scratch_operands = 0 : i64, tpu.core_type = #tpu.core_type<tc>, window_params = [{transform_indices = @transform_0, window_bounds = array<i64: 1, 1, 1, 18, 18, 32>}, {pipeline_mode = #tpu.pipeline_mode<synchronous>, transform_indices = @transform_1, window_bounds = array<i64: 9, 32, 128>}, {transform_indices = @transform_2, window_bounds = array<i64: 1, 1, 256, 128>}]} {
    %c0 = arith.constant 0 : index
    %c0_0 = arith.constant 0 : index
    %c0_1 = arith.constant 0 : index
    %c0_2 = arith.constant 0 : index
    %c0_3 = arith.constant 0 : index
    %c0_4 = arith.constant 0 : index
    %0 = vector.load %arg2[%c0, %c0_0, %c0_1, %c0_2, %c0_3, %c0_4] : memref<1x1x1x18x18x32xbf16, #tpu.memory_space<vmem>>, vector<1x1x1x16x16x32xbf16>
    %1 = vector.shape_cast %0 : vector<1x1x1x16x16x32xbf16> to vector<16x16x32xbf16>
    %2 = vector.shape_cast %1 : vector<16x16x32xbf16> to vector<256x32xbf16>
    %c0_5 = arith.constant 0 : index
    %c0_6 = arith.constant 0 : index
    %c0_7 = arith.constant 0 : index
    %3 = vector.load %arg3[%c0_5, %c0_6, %c0_7] : memref<9x32x128xbf16, #tpu.memory_space<vmem>>, vector<1x32x128xbf16>
    %4 = vector.shape_cast %3 : vector<1x32x128xbf16> to vector<32x128xbf16>
    %cst = arith.constant dense<0.000000e+00> : vector<256x128xf32>
    %5 = tpu.matmul %2, %4, %cst {dimension_numbers = #tpu.dot_dimension_numbers<[1], [0], [0], [1], [0, 0, 1, 1], [], []>} : vector<256x32xbf16>, vector<32x128xbf16>, vector<256x128xf32> -> vector<256x128xf32>
    %c0_8 = arith.constant 0 : index
    %c0_9 = arith.constant 0 : index
    %c0_10 = arith.constant 0 : index
    %c0_11 = arith.constant 0 : index
    %c1 = arith.constant 1 : index
    %c0_12 = arith.constant 0 : index
    %6 = vector.load %arg2[%c0_8, %c0_9, %c0_10, %c0_11, %c1, %c0_12] : memref<1x1x1x18x18x32xbf16, #tpu.memory_space<vmem>>, vector<1x1x1x16x16x32xbf16>
    %7 = vector.shape_cast %6 : vector<1x1x1x16x16x32xbf16> to vector<16x16x32xbf16>
    %8 = vector.shape_cast %7 : vector<16x16x32xbf16> to vector<256x32xbf16>
    %c1_13 = arith.constant 1 : index
    %c0_14 = arith.constant 0 : index
    %c0_15 = arith.constant 0 : index
    %9 = vector.load %arg3[%c1_13, %c0_14, %c0_15] : memref<9x32x128xbf16, #tpu.memory_space<vmem>>, vector<1x32x128xbf16>
    %10 = vector.shape_cast %9 : vector<1x32x128xbf16> to vector<32x128xbf16>
    %cst_16 = arith.constant dense<0.000000e+00> : vector<256x128xf32>
    %11 = tpu.matmul %8, %10, %cst_16 {dimension_numbers = #tpu.dot_dimension_numbers<[1], [0], [0], [1], [0, 0, 1, 1], [], []>} : vector<256x32xbf16>, vector<32x128xbf16>, vector<256x128xf32> -> vector<256x128xf32>
    %12 = arith.addf %5, %11 : vector<256x128xf32>
    %c0_17 = arith.constant 0 : index
    %c0_18 = arith.constant 0 : index
    %c0_19 = arith.constant 0 : index
    %c0_20 = arith.constant 0 : index
    %c2 = arith.constant 2 : index
    %c0_21 = arith.constant 0 : index
    %13 = vector.load %arg2[%c0_17, %c0_18, %c0_19, %c0_20, %c2, %c0_21] : memref<1x1x1x18x18x32xbf16, #tpu.memory_space<vmem>>, vector<1x1x1x16x16x32xbf16>
    %14 = vector.shape_cast %13 : vector<1x1x1x16x16x32xbf16> to vector<16x16x32xbf16>
    %15 = vector.shape_cast %14 : vector<16x16x32xbf16> to vector<256x32xbf16>
    %c2_22 = arith.constant 2 : index
    %c0_23 = arith.constant 0 : index
    %c0_24 = arith.constant 0 : index
    %16 = vector.load %arg3[%c2_22, %c0_23, %c0_24] : memref<9x32x128xbf16, #tpu.memory_space<vmem>>, vector<1x32x128xbf16>
    %17 = vector.shape_cast %16 : vector<1x32x128xbf16> to vector<32x128xbf16>
    %cst_25 = arith.constant dense<0.000000e+00> : vector<256x128xf32>
    %18 = tpu.matmul %15, %17, %cst_25 {dimension_numbers = #tpu.dot_dimension_numbers<[1], [0], [0], [1], [0, 0, 1, 1], [], []>} : vector<256x32xbf16>, vector<32x128xbf16>, vector<256x128xf32> -> vector<256x128xf32>
    %19 = arith.addf %12, %18 : vector<256x128xf32>
    %c0_26 = arith.constant 0 : index
    %c0_27 = arith.constant 0 : index
    %c0_28 = arith.constant 0 : index
    %c1_29 = arith.constant 1 : index
    %c0_30 = arith.constant 0 : index
    %c0_31 = arith.constant 0 : index
    %20 = vector.load %arg2[%c0_26, %c0_27, %c0_28, %c1_29, %c0_30, %c0_31] : memref<1x1x1x18x18x32xbf16, #tpu.memory_space<vmem>>, vector<1x1x1x16x16x32xbf16>
    %21 = vector.shape_cast %20 : vector<1x1x1x16x16x32xbf16> to vector<16x16x32xbf16>
    %22 = vector.shape_cast %21 : vector<16x16x32xbf16> to vector<256x32xbf16>
    %c3 = arith.constant 3 : index
    %c0_32 = arith.constant 0 : index
    %c0_33 = arith.constant 0 : index
    %23 = vector.load %arg3[%c3, %c0_32, %c0_33] : memref<9x32x128xbf16, #tpu.memory_space<vmem>>, vector<1x32x128xbf16>
    %24 = vector.shape_cast %23 : vector<1x32x128xbf16> to vector<32x128xbf16>
    %cst_34 = arith.constant dense<0.000000e+00> : vector<256x128xf32>
    %25 = tpu.matmul %22, %24, %cst_34 {dimension_numbers = #tpu.dot_dimension_numbers<[1], [0], [0], [1], [0, 0, 1, 1], [], []>} : vector<256x32xbf16>, vector<32x128xbf16>, vector<256x128xf32> -> vector<256x128xf32>
    %26 = arith.addf %19, %25 : vector<256x128xf32>
    %c0_35 = arith.constant 0 : index
    %c0_36 = arith.constant 0 : index
    %c0_37 = arith.constant 0 : index
    %c1_38 = arith.constant 1 : index
    %c1_39 = arith.constant 1 : index
    %c0_40 = arith.constant 0 : index
    %27 = vector.load %arg2[%c0_35, %c0_36, %c0_37, %c1_38, %c1_39, %c0_40] : memref<1x1x1x18x18x32xbf16, #tpu.memory_space<vmem>>, vector<1x1x1x16x16x32xbf16>
    %28 = vector.shape_cast %27 : vector<1x1x1x16x16x32xbf16> to vector<16x16x32xbf16>
    %29 = vector.shape_cast %28 : vector<16x16x32xbf16> to vector<256x32xbf16>
    %c4 = arith.constant 4 : index
    %c0_41 = arith.constant 0 : index
    %c0_42 = arith.constant 0 : index
    %30 = vector.load %arg3[%c4, %c0_41, %c0_42] : memref<9x32x128xbf16, #tpu.memory_space<vmem>>, vector<1x32x128xbf16>
    %31 = vector.shape_cast %30 : vector<1x32x128xbf16> to vector<32x128xbf16>
    %cst_43 = arith.constant dense<0.000000e+00> : vector<256x128xf32>
    %32 = tpu.matmul %29, %31, %cst_43 {dimension_numbers = #tpu.dot_dimension_numbers<[1], [0], [0], [1], [0, 0, 1, 1], [], []>} : vector<256x32xbf16>, vector<32x128xbf16>, vector<256x128xf32> -> vector<256x128xf32>
    %33 = arith.addf %26, %32 : vector<256x128xf32>
    %c0_44 = arith.constant 0 : index
    %c0_45 = arith.constant 0 : index
    %c0_46 = arith.constant 0 : index
    %c1_47 = arith.constant 1 : index
    %c2_48 = arith.constant 2 : index
    %c0_49 = arith.constant 0 : index
    %34 = vector.load %arg2[%c0_44, %c0_45, %c0_46, %c1_47, %c2_48, %c0_49] : memref<1x1x1x18x18x32xbf16, #tpu.memory_space<vmem>>, vector<1x1x1x16x16x32xbf16>
    %35 = vector.shape_cast %34 : vector<1x1x1x16x16x32xbf16> to vector<16x16x32xbf16>
    %36 = vector.shape_cast %35 : vector<16x16x32xbf16> to vector<256x32xbf16>
    %c5 = arith.constant 5 : index
    %c0_50 = arith.constant 0 : index
    %c0_51 = arith.constant 0 : index
    %37 = vector.load %arg3[%c5, %c0_50, %c0_51] : memref<9x32x128xbf16, #tpu.memory_space<vmem>>, vector<1x32x128xbf16>
    %38 = vector.shape_cast %37 : vector<1x32x128xbf16> to vector<32x128xbf16>
    %cst_52 = arith.constant dense<0.000000e+00> : vector<256x128xf32>
    %39 = tpu.matmul %36, %38, %cst_52 {dimension_numbers = #tpu.dot_dimension_numbers<[1], [0], [0], [1], [0, 0, 1, 1], [], []>} : vector<256x32xbf16>, vector<32x128xbf16>, vector<256x128xf32> -> vector<256x128xf32>
    %40 = arith.addf %33, %39 : vector<256x128xf32>
    %c0_53 = arith.constant 0 : index
    %c0_54 = arith.constant 0 : index
    %c0_55 = arith.constant 0 : index
    %c2_56 = arith.constant 2 : index
    %c0_57 = arith.constant 0 : index
    %c0_58 = arith.constant 0 : index
    %41 = vector.load %arg2[%c0_53, %c0_54, %c0_55, %c2_56, %c0_57, %c0_58] : memref<1x1x1x18x18x32xbf16, #tpu.memory_space<vmem>>, vector<1x1x1x16x16x32xbf16>
    %42 = vector.shape_cast %41 : vector<1x1x1x16x16x32xbf16> to vector<16x16x32xbf16>
    %43 = vector.shape_cast %42 : vector<16x16x32xbf16> to vector<256x32xbf16>
    %c6 = arith.constant 6 : index
    %c0_59 = arith.constant 0 : index
    %c0_60 = arith.constant 0 : index
    %44 = vector.load %arg3[%c6, %c0_59, %c0_60] : memref<9x32x128xbf16, #tpu.memory_space<vmem>>, vector<1x32x128xbf16>
    %45 = vector.shape_cast %44 : vector<1x32x128xbf16> to vector<32x128xbf16>
    %cst_61 = arith.constant dense<0.000000e+00> : vector<256x128xf32>
    %46 = tpu.matmul %43, %45, %cst_61 {dimension_numbers = #tpu.dot_dimension_numbers<[1], [0], [0], [1], [0, 0, 1, 1], [], []>} : vector<256x32xbf16>, vector<32x128xbf16>, vector<256x128xf32> -> vector<256x128xf32>
    %47 = arith.addf %40, %46 : vector<256x128xf32>
    %c0_62 = arith.constant 0 : index
    %c0_63 = arith.constant 0 : index
    %c0_64 = arith.constant 0 : index
    %c2_65 = arith.constant 2 : index
    %c1_66 = arith.constant 1 : index
    %c0_67 = arith.constant 0 : index
    %48 = vector.load %arg2[%c0_62, %c0_63, %c0_64, %c2_65, %c1_66, %c0_67] : memref<1x1x1x18x18x32xbf16, #tpu.memory_space<vmem>>, vector<1x1x1x16x16x32xbf16>
    %49 = vector.shape_cast %48 : vector<1x1x1x16x16x32xbf16> to vector<16x16x32xbf16>
    %50 = vector.shape_cast %49 : vector<16x16x32xbf16> to vector<256x32xbf16>
    %c7 = arith.constant 7 : index
    %c0_68 = arith.constant 0 : index
    %c0_69 = arith.constant 0 : index
    %51 = vector.load %arg3[%c7, %c0_68, %c0_69] : memref<9x32x128xbf16, #tpu.memory_space<vmem>>, vector<1x32x128xbf16>
    %52 = vector.shape_cast %51 : vector<1x32x128xbf16> to vector<32x128xbf16>
    %cst_70 = arith.constant dense<0.000000e+00> : vector<256x128xf32>
    %53 = tpu.matmul %50, %52, %cst_70 {dimension_numbers = #tpu.dot_dimension_numbers<[1], [0], [0], [1], [0, 0, 1, 1], [], []>} : vector<256x32xbf16>, vector<32x128xbf16>, vector<256x128xf32> -> vector<256x128xf32>
    %54 = arith.addf %47, %53 : vector<256x128xf32>
    %c0_71 = arith.constant 0 : index
    %c0_72 = arith.constant 0 : index
    %c0_73 = arith.constant 0 : index
    %c2_74 = arith.constant 2 : index
    %c2_75 = arith.constant 2 : index
    %c0_76 = arith.constant 0 : index
    %55 = vector.load %arg2[%c0_71, %c0_72, %c0_73, %c2_74, %c2_75, %c0_76] : memref<1x1x1x18x18x32xbf16, #tpu.memory_space<vmem>>, vector<1x1x1x16x16x32xbf16>
    %56 = vector.shape_cast %55 : vector<1x1x1x16x16x32xbf16> to vector<16x16x32xbf16>
    %57 = vector.shape_cast %56 : vector<16x16x32xbf16> to vector<256x32xbf16>
    %c8 = arith.constant 8 : index
    %c0_77 = arith.constant 0 : index
    %c0_78 = arith.constant 0 : index
    %58 = vector.load %arg3[%c8, %c0_77, %c0_78] : memref<9x32x128xbf16, #tpu.memory_space<vmem>>, vector<1x32x128xbf16>
    %59 = vector.shape_cast %58 : vector<1x32x128xbf16> to vector<32x128xbf16>
    %cst_79 = arith.constant dense<0.000000e+00> : vector<256x128xf32>
    %60 = tpu.matmul %57, %59, %cst_79 {dimension_numbers = #tpu.dot_dimension_numbers<[1], [0], [0], [1], [0, 0, 1, 1], [], []>} : vector<256x32xbf16>, vector<32x128xbf16>, vector<256x128xf32> -> vector<256x128xf32>
    %61 = arith.addf %54, %60 : vector<256x128xf32>
    %62 = arith.truncf %61 : vector<256x128xf32> to vector<256x128xbf16>
    %c0_80 = arith.constant 0 : index
    %c0_81 = arith.constant 0 : index
    %c0_82 = arith.constant 0 : index
    %c0_83 = arith.constant 0 : index
    %63 = vector.load %arg4[%c0_80, %c0_81, %c0_82, %c0_83] : memref<1x1x256x128xbf16, #tpu.memory_space<vmem>>, vector<1x1x256x128xbf16>
    %64 = vector.shape_cast %63 : vector<1x1x256x128xbf16> to vector<256x128xbf16>
    %65 = vector.shape_cast %62 : vector<256x128xbf16> to vector<1x1x256x128xbf16>
    tpu.vector_store %arg4[%c0_80, %c0_81, %c0_82, %c0_83], %65 {strides = array<i32>} : memref<1x1x256x128xbf16, #tpu.memory_space<vmem>>, vector<1x1x256x128xbf16>,
    return
  }
  func.func @transform_0(%arg0: i32, %arg1: i32) -> (i32, i32, i32, i32, i32, i32) {
    %c0_i32 = arith.constant 0 : i32
    %c0_i32_0 = arith.constant 0 : i32
    %c0_i32_1 = arith.constant 0 : i32
    %c0_i32_2 = arith.constant 0 : i32
    %c0_i32_3 = arith.constant 0 : i32
    return %c0_i32, %arg0, %arg1, %c0_i32_0, %c0_i32_1, %c0_i32_2 : i32, i32, i32, i32, i32, i32
  }
  func.func @transform_1(%arg0: i32, %arg1: i32) -> (i32, i32, i32) {
    %c0_i32 = arith.constant 0 : i32
    %c0_i32_0 = arith.constant 0 : i32
    %c0_i32_1 = arith.constant 0 : i32
    %c0_i32_2 = arith.constant 0 : i32
    return %c0_i32, %c0_i32_0, %c0_i32_1 : i32, i32, i32
  }
  func.func @transform_2(%arg0: i32, %arg1: i32) -> (i32, i32, i32, i32) {
    %c0_i32 = arith.constant 0 : i32
    %c0_i32_0 = arith.constant 0 : i32
    %c0_i32_1 = arith.constant 0 : i32
    return %arg0, %arg1, %c0_i32, %c0_i32_0 : i32, i32, i32, i32
  }
}

</mosaic_0001>

<bundles_post_ra>
// kernel: multi_scale_trident_conv_forward.3
= control target key start
LH: loop header
LB: loop body
LE: loop exit
PB: predicated region body
PF: predicated region fallthrough
CT: control target
= control target key end

     0   :  { %s2741_s9 = smov 0   ;;  %s2743_s10 = smov 0   ;;  %s3125_s0 = inlined_call_operand.vmem [shape: bf16[4,2,1,9,9,32], index: 0, kind: input, shape index: {}]   ;;  %s3126_s1 = inlined_call_operand.vmem [shape: bf16[9,32,128], index: 1, kind: input, shape index: {}]   ;;  %s3127_s2 = inlined_call_operand.vmem [shape: bf16[2,1,64,128], index: 2, kind: output, shape index: {}]  }
   0x1   :  { %s2745_s11 = smov 0   ;;  %s2747_s12 = smov 0  }
   0x2   :  { %s2749_s13 = smov 0  }
   0x3 LB: > { %s24_s14 = sadd.s32 1, %s2720_s12  ;;  %p40_p1 = scmp.ne.s32.totalorder %s2712_s10, %s2708_s9  ;;  %s2724_s13 = sphi %s2749_s13, %s12_s13   ;;  %s2720_s12 = sphi %s2747_s12, %s3133_s12   ;;  %s2716_s11 = sphi %s2745_s11, %s3132_s11   ;;  %s2712_s10 = sphi %s2743_s10, %s3131_s10   ;;  %s2708_s9 = sphi %s2741_s9, %s3130_s9  }
   0x4   : > { %p26_p0 = scmp.ge.s32.totalorder %s24_s14, 2  ;;  %p41_p2 = scmp.eq.s32.totalorder %s2724_s13, 0 }
   0x5   : > { %s33_s16 = sadd.s32 1, %s2712_s10  ;;  %p2130_p5 = scmp.ge.s32.totalorder %s2724_s13, 2 }
   0x6   : > { %s3135_s14 = smov (%p26_p0, %s24_s14), 0  ;;  %p42_p3 = por %p41_p2, %p40_p1 }
   0x7   : > { %s28_s15 = ssub.s32 %s2720_s12, %s3135_s14  ;;  %118 = sbr.rel (%p2130_p5) target bundleno = 37 (0x25), region = 20 }
   0x8   : > { %p31_p4 = scmp.eq.s32.totalorder %s28_s15, 0 }
   0xa   : > { %s2776_s17 = scalar_select %p31_p4, %s2712_s10, %s33_s16  }
   0xe   : > { %121 = sbr.rel (!%p42_p3) target bundleno = 37 (0x25), region = 24  ;;  %s123_s18 = sand.u32 (%p42_p3), 1, %s2712_s10  }
   0xf   : > { %s2602_s19 = smul.u32 (%p42_p3), 72, %s2720_s12 }
  0x10   : > { %s2601_s20 = smul.u32 (%p42_p3), 288, %s123_s18 }
  0x11   : > { %s2784_s23 = scalar_lea.vmem (%p42_p3), %s3125_s0, %s2602_s19 }
  0x12   : > { %v146_v0 = vld [vmem:[%s2784_s23] sm:$0xff] (%p42_p3)   ;;  %v150_v1 = vld [vmem:[%s2784_s23 + $0x8] sm:$0xff] (%p42_p3)   ;;  %v154_v2 = vld [vmem:[%s2784_s23 + $0x10] sm:$0xff] (%p42_p3)   ;;  %s2789_s24 = scalar_lea.vmem (%p42_p3), [#allocation2], %s2601_s20 }
  0x13   : > { %147 = vst [vmem:[%s2789_s24] sm:$0xff] (%p42_p3), %v146_v0   ;;  %151 = vst [vmem:[%s2789_s24 + $0x8] sm:$0xff] (%p42_p3), %v150_v1   ;;  %v158_v3 = vld [vmem:[%s2784_s23 + $0x18] sm:$0xff] (%p42_p3)   ;;  %v162_v4 = vld [vmem:[%s2784_s23 + $0x20] sm:$0xff] (%p42_p3)  }
  0x14   : > { %155 = vst [vmem:[%s2789_s24 + $0x10] sm:$0xff] (%p42_p3), %v154_v2   ;;  %v166_v5 = vld [vmem:[%s2784_s23 + $0x28] sm:$0xff] (%p42_p3)   ;;  %159 = vst [vmem:[%s2789_s24 + $0x18] sm:$0xff] (%p42_p3), %v158_v3   ;;  %v170_v6 = vld [vmem:[%s2784_s23 + $0x30] sm:$0xff] (%p42_p3)  }
  0x15   : > { %163 = vst [vmem:[%s2789_s24 + $0x20] sm:$0xff] %v162_v4   ;;  %167 = vst [vmem:[%s2789_s24 + $0x28] sm:$0xff] %v166_v5   ;;  %v174_v7 = vld [vmem:[%s2784_s23 + $0x38] sm:$0xff]   ;;  %v178_v8 = vld [vmem:[%s2784_s23 + $0x40] sm:$0xff]  }
  0x16   : > { %171 = vst [vmem:[%s2789_s24 + $0x30] sm:$0xff] %v170_v6   ;;  %175 = vst [vmem:[%s2789_s24 + $0x38] sm:$0xff] %v174_v7   ;;  %v182_v9 = vld [vmem:[%s2784_s23 + $0x90] sm:$0xff]   ;;  %v186_v10 = vld [vmem:[%s2784_s23 + $0x98] sm:$0xff]  }
  0x17   : > { %179 = vst [vmem:[%s2789_s24 + $0x40] sm:$0xff] %v178_v8   ;;  %v190_v11 = vld [vmem:[%s2784_s23 + $0xa0] sm:$0xff]   ;;  %183 = vst [vmem:[%s2789_s24 + $0x48] sm:$0xff] %v182_v9   ;;  %v194_v12 = vld [vmem:[%s2784_s23 + $0xa8] sm:$0xff]  }
  0x18   : > { %187 = vst [vmem:[%s2789_s24 + $0x50] sm:$0xff] %v186_v10   ;;  %191 = vst [vmem:[%s2789_s24 + $0x58] sm:$0xff] %v190_v11   ;;  %v198_v13 = vld [vmem:[%s2784_s23 + $0xb0] sm:$0xff]   ;;  %v202_v14 = vld [vmem:[%s2784_s23 + $0xb8] sm:$0xff]  }
  0x19   : > { %195 = vst [vmem:[%s2789_s24 + $0x60] sm:$0xff] %v194_v12   ;;  %199 = vst [vmem:[%s2789_s24 + $0x68] sm:$0xff] %v198_v13   ;;  %v206_v15 = vld [vmem:[%s2784_s23 + $0xc0] sm:$0xff]   ;;  %v210_v16 = vld [vmem:[%s2784_s23 + $0xc8] sm:$0xff]  }
  0x1a   : > { %203 = vst [vmem:[%s2789_s24 + $0x70] sm:$0xff] %v202_v14   ;;  %v214_v17 = vld [vmem:[%s2784_s23 + $0xd0] sm:$0xff]   ;;  %207 = vst [vmem:[%s2789_s24 + $0x78] sm:$0xff] %v206_v15   ;;  %v218_v18 = vld [vmem:[%s2784_s23 + $0x120] sm:$0xff]  }
  0x1b   : > { %211 = vst [vmem:[%s2789_s24 + $0x80] sm:$0xff] %v210_v16   ;;  %215 = vst [vmem:[%s2789_s24 + $0x88] sm:$0xff] %v214_v17   ;;  %v222_v19 = vld [vmem:[%s2784_s23 + $0x128] sm:$0xff]   ;;  %v226_v20 = vld [vmem:[%s2784_s23 + $0x130] sm:$0xff]  }
  0x1c   : > { %219 = vst [vmem:[%s2789_s24 + $0x90] sm:$0xff] %v218_v18   ;;  %223 = vst [vmem:[%s2789_s24 + $0x98] sm:$0xff] %v222_v19   ;;  %v230_v21 = vld [vmem:[%s2784_s23 + $0x138] sm:$0xff]   ;;  %v234_v22 = vld [vmem:[%s2784_s23 + $0x140] sm:$0xff]  }
  0x1d   : > { %227 = vst [vmem:[%s2789_s24 + $0xa0] sm:$0xff] %v226_v20   ;;  %v238_v23 = vld [vmem:[%s2784_s23 + $0x148] sm:$0xff]   ;;  %231 = vst [vmem:[%s2789_s24 + $0xa8] sm:$0xff] %v230_v21   ;;  %v242_v24 = vld [vmem:[%s2784_s23 + $0x150] sm:$0xff]  }
  0x1e   : > { %235 = vst [vmem:[%s2789_s24 + $0xb0] sm:$0xff] %v234_v22   ;;  %239 = vst [vmem:[%s2789_s24 + $0xb8] sm:$0xff] %v238_v23   ;;  %v246_v25 = vld [vmem:[%s2784_s23 + $0x158] sm:$0xff]   ;;  %v250_v26 = vld [vmem:[%s2784_s23 + $0x160] sm:$0xff]  }
  0x1f   : > { %243 = vst [vmem:[%s2789_s24 + $0xc0] sm:$0xff] %v242_v24   ;;  %247 = vst [vmem:[%s2789_s24 + $0xc8] sm:$0xff] %v246_v25   ;;  %v254_v27 = vld [vmem:[%s2784_s23 + $0x1b0] sm:$0xff]   ;;  %v258_v28 = vld [vmem:[%s2784_s23 + $0x1b8] sm:$0xff]  }
  0x20   : > { %251 = vst [vmem:[%s2789_s24 + $0xd0] sm:$0xff] %v250_v26   ;;  %v262_v29 = vld [vmem:[%s2784_s23 + $0x1c0] sm:$0xff]   ;;  %255 = vst [vmem:[%s2789_s24 + $0xd8] sm:$0xff] %v254_v27   ;;  %v266_v30 = vld [vmem:[%s2784_s23 + $0x1c8] sm:$0xff]  }
  0x21   : > { %259 = vst [vmem:[%s2789_s24 + $0xe0] sm:$0xff] %v258_v28   ;;  %263 = vst [vmem:[%s2789_s24 + $0xe8] sm:$0xff] %v262_v29   ;;  %v270_v31 = vld [vmem:[%s2784_s23 + $0x1d0] sm:$0xff]   ;;  %v274_v32 = vld [vmem:[%s2784_s23 + $0x1d8] sm:$0xff]  }
  0x22   : > { %267 = vst [vmem:[%s2789_s24 + $0xf0] sm:$0xff] %v266_v30   ;;  %271 = vst [vmem:[%s2789_s24 + $0xf8] sm:$0xff] %v270_v31   ;;  %v278_v33 = vld [vmem:[%s2784_s23 + $0x1e0] sm:$0xff]   ;;  %v282_v34 = vld [vmem:[%s2784_s23 + $0x1e8] sm:$0xff]  }
  0x23   : > { %275 = vst [vmem:[%s2789_s24 + $0x100] sm:$0xff] %v274_v32   ;;  %v286_v35 = vld [vmem:[%s2784_s23 + $0x1f0] sm:$0xff]   ;;  %279 = vst [vmem:[%s2789_s24 + $0x108] sm:$0xff] %v278_v33  }
  0x24   : > { %283 = vst [vmem:[%s2789_s24 + $0x110] sm:$0xff] %v282_v34   ;;  %287 = vst [vmem:[%s2789_s24 + $0x118] sm:$0xff] %v286_v35  }
  0x25 PF: > { %p2132_p6 = scmp.ge.s32.totalorder %s2724_s13, 1  ;;  %p455_p7 = scmp.lt.s32.totalorder %s2724_s13, 3 }
  0x27   : > { %p456_p8 = pnand %p2132_p6, %p455_p7 }
  0x28   : > { %v2644_v36 = vld [vmem:[%s3126_s1 + $0x10] sm:$0xff] (!%p456_p8)   ;;  %s462_s27 = sand.u32 (!%p456_p8), 1, %s2708_s9   ;;  %v2869_v37 = vld [vmem:[%s3126_s1 + $0x40] sm:$0xff] (!%p456_p8)   ;;  %v2646_v38 = vld [vmem:[%s3126_s1 + $0x18] sm:$0xff] (!%p456_p8)   ;;  %vm555_vm0 = vcmask (!%p456_p8), 261120   ;;  %p487_p9 = scmp.lt.s32.totalorder (!%p456_p8), %s2716_s11, 1 }
  0x29   : > { %459 = sbr.rel (%p456_p8) target bundleno = 345 (0x159), region = 65  ;;  %2425 = vmatprep.subr.bf16.mxu1 (!%p456_p8), %v2644_v36  ;;  %2473 = vmatprep.subr.bf16.mxu0 (!%p456_p8), %v2869_v37  ;;  %v2878_v39 = vld [vmem:[%s3126_s1 + $0x48] sm:$0xff] (!%p456_p8)   ;;  %v2651_v43 = vld [vmem:[%s3126_s1] sm:$0xff] (!%p456_p8)   ;;  %v2653_v45 = vld [vmem:[%s3126_s1 + $0x50] sm:$0xff] (!%p456_p8)   ;;  %vm758_vm1 = vsmask.f32 (!%p456_p8), 3328 }
  0x2a   : > { %s2603_s30 = smul.u32 (!%p456_p8), 288, %s462_s27  ;;  %2426 = vmatpush3.bf16.msra.mxu1 (!%p456_p8), %v2644_v36  ;;  %2474 = vmatpush3.bf16.msra.mxu0 (!%p456_p8), %v2869_v37  ;;  %v2654_v46 = vld [vmem:[%s3126_s1 + $0x58] sm:$0xff] (!%p456_p8)   ;;  %v2657_v49 = vld [vmem:[%s3126_s1 + $0x8] sm:$0xff] (!%p456_p8)   ;;  %vm759_vm2 = vsmask.f32 (!%p456_p8), 7440  ;;  %v2915_v59 = vld [vmem:[%s3126_s1 + $0x60] sm:$0xff] (!%p456_p8)  }
  0x2b   : > { %2427 = vmatprep.subr.bf16.mxu1 (!%p456_p8), %v2646_v38  ;;  %2475 = vmatprep.subr.bf16.mxu0 (!%p456_p8), %v2878_v39  ;;  %v2661_v0 = vld [vmem:[%s3126_s1 + $0x20] sm:$0xff] (!%p456_p8)   ;;  %vm2928_vm3 = vmor (!%p456_p8), %vm758_vm1, %vm759_vm2  ;;  %v2665_v27 = vld [vmem:[%s3126_s1 + $0x28] sm:$0xff] (!%p456_p8)  }
  0x2c   : > { %s2881_s7 = scalar_lea.vmem (!%p456_p8), [#allocation2], %s2603_s30 }
  0x2d   : > { %v2648_v40 = vld [vmem:[%s2881_s7 + $0x48] ss:$8 sps:$4 sm:$0xff] (!%p456_p8)   ;;  %v2649_v41 = vld [vmem:[%s2881_s7 + $0xd8] ss:$8 sps:$4 sm:$0xff] (!%p456_p8)   ;;  %v2226_v51 = vld [vmem:[%s2881_s7 + $0x94] sm:$0x1] (!%p456_p8) }
  0x2e   : > { %2429 = vmatprep.mubr.msk.bf16.mxu1 (!%p456_p8), %vm555_vm0, %v2648_v40  ;;  %v2650_v42 = vld [vmem:[%s2881_s7 + $0x58] ss:$8 sps:$4 sm:$0xff] (!%p456_p8)   ;;  %2428 = vmatpush3.bf16.msra.mxu1 (!%p456_p8), %v2646_v38  ;;  %v2652_v44 = vld [vmem:[%s2881_s7 + $0xe8] ss:$8 sps:$4 sm:$0xff] (!%p456_p8)   ;;  %v2228_v55 = vld [vmem:[%s2881_s7 + $0x9c] sm:$0x1] (!%p456_p8) }
  0x2f   : > { %2477 = vmatprep.mubr.msk.bf16.mxu0 (!%p456_p8), %vm555_vm0, %v2649_v41  ;;  %2476 = vmatpush3.bf16.msra.mxu0 (!%p456_p8), %v2878_v39  ;;  %v2655_v47 = vld [vmem:[%s2881_s7 + $0x68] ss:$8 sps:$4 sm:$0xff] (!%p456_p8)   ;;  %v2656_v48 = vld [vmem:[%s2881_s7 + $0x78] ss:$8 sps:$4 sm:$0xff] (!%p456_p8)   ;;  %v1275_v56 = vshll.u32 (!%p456_p8), %v2226_v51, 16  ;;  %v1289_v62 = vshll.u32 (!%p456_p8), %v2228_v55, 16 }
  0x30   : > { %2437 = vmatprep.subr.bf16.mxu1 %v2651_v43  ;;  %2485 = vmatprep.subr.bf16.mxu0 %v2653_v45  ;;  %v2225_v50 = vld [vmem:[%s2881_s7 + $0x90] sm:$0xf]  ;;  %v2227_v52 = vld [vmem:[%s2881_s7 + $0x98] sm:$0xf]  ;;  %v2229_v63 = vld [vmem:[%s2881_s7 + $0xa0] sm:$0xf] }
  0x31   : > { %2430 = vmatmul.mubr.msk.bf16.vlgmr.msra.gmra.mrb[0].mxu1 %vm555_vm0, %v2650_v42  ;;  %v1266_v53 = vshrl.u32 %v2225_v50, 16  ;;  %v1269_v54 = vshll.u32 %v2225_v50, 16  ;;  %v1280_v57 = vshrl.u32 %v2227_v52, 16  ;;  %v1283_v58 = vshll.u32 %v2227_v52, 16  ;;  %v2230_v4 = vld [vmem:[%s2881_s7 + $0xa4] sm:$0x1] }
  0x32   : > { %2478 = vmatmul.mubr.msk.bf16.vlgmr.msra.gmra.mrb[0].mxu0 %vm555_vm0, %v2652_v44  ;;  %2438 = vmatpush3.bf16.msra.mxu1 %v2651_v43  ;;  %v1277_v1 = vrot.slane %v1275_v56, 5  ;;  %v1294_v5 = vshrl.u32 %v2229_v63, 16  ;;  %v1291_v7 = vrot.slane %v1289_v62, 5  ;;  %v2231_v8 = vld [vmem:[%s2881_s7 + $0xa8] sm:$0xf]  ;;  %v1297_v10 = vshll.u32 %v2229_v63, 16 }
  0x33   : > { %2486 = vmatpush3.bf16.msra.mxu0 %v2653_v45  ;;  %2433 = vmatprep.mubr.msk.bf16.mxu1 %vm555_vm0, %v2655_v47  ;;  %v1268_v60 = vrot.slane %v1266_v53, 4  ;;  %v1271_v61 = vrot.slane %v1269_v54, 5  ;;  %v1282_v2 = vrot.slane %v1280_v57, 4  ;;  %v1285_v3 = vrot.slane %v1283_v58, 5  ;;  %v2232_v9 = vld [vmem:[%s2881_s7 + $0xac] sm:$0x1] }
  0x34   : > { %2487 = vmatprep.subr.bf16.mxu0 %v2654_v46  ;;  %2439 = vmatprep.subr.bf16.mxu1 %v2657_v49  ;;  %v1296_v13 = vrot.slane %v1294_v5, 4  ;;  %v1303_v14 = vshll.u32 %v2230_v4, 16  ;;  %v1308_v15 = vshrl.u32 %v2231_v8, 16  ;;  %v1299_v17 = vrot.slane %v1297_v10, 5  ;;  %v2659_v26 = vld [vmem:[%s2881_s7] ss:$8 sps:$4 sm:$0xff]  }
  0x35   : > { %v1272_v6 = vor.u32 %v1271_v61, %v1268_v60  ;;  %v1286_v12 = vor.u32 %v1285_v3, %v1282_v2  ;;  %v1311_v18 = vshll.u32 %v2231_v8, 16  ;;  %v1317_v19 = vshll.u32 %v2232_v9, 16  ;;  %v2660_v29 = vld [vmem:[%s2881_s7 + $0x10] ss:$8 sps:$4 sm:$0xff]   ;;  %v2234_v35 = vld [vmem:[%s2881_s7 + $0xb4] sm:$0x1] }
  0x36   : > { %2440 = vmatpush3.bf16.msra.mxu1 %v2657_v49  ;;  %v1305_v21 = vrot.slane %v1303_v14, 5  ;;  %v1310_v22 = vrot.slane %v1308_v15, 4  ;;  %v1300_v24 = vor.u32 %v1299_v17, %v1296_v13  ;;  %v2233_v34 = vld [vmem:[%s2881_s7 + $0xb0] sm:$0xf]  ;;  %v2235_v36 = vld [vmem:[%s2881_s7 + $0xb8] sm:$0xf] }
  0x37   : > { %2488 = vmatpush3.bf16.msra.mxu0 %v2654_v46  ;;  %2449 = vmatprep.subr.bf16.mxu1 %v2661_v0  ;;  %v1273_v16 = vrot.slane %v1272_v6, 4  ;;  %v1287_v20 = vrot.slane %v1286_v12, 4  ;;  %v1313_v25 = vrot.slane %v1311_v18, 5  ;;  %v1319_v33 = vrot.slane %v1317_v19, 5  ;;  %v2236_v41 = vld [vmem:[%s2881_s7 + $0xbc] sm:$0x1] }
  0x38   : > { %2497 = vmatprep.subr.bf16.mxu0 %v2915_v59  ;;  %v1301_v31 = vrot.slane %v1300_v24, 4  ;;  %v1322_v42 = vshrl.u32 %v2233_v34, 16  ;;  %v1325_v43 = vshll.u32 %v2233_v34, 16  ;;  %v2953_v44 = vld [vmem:[%s3126_s1 + $0x30] sm:$0xff]   ;;  %v1331_v45 = vshll.u32 %v2234_v35, 16  ;;  %v2662_v61 = vld [vmem:[%s3126_s1 + $0x68] sm:$0xff]  }
  0x39   : > { %2434 = vmatmul.mubr.msk.bf16.gmra.mrb[4].mxu1 %vm555_vm0, %v2656_v48  ;;  %v1278_v23 = vsel %vm2928_vm3, %v1273_v16, %v1277_v1  ;;  %v1292_v28 = vsel %vm2928_vm3, %v1287_v20, %v1291_v7  ;;  %v1314_v32 = vor.u32 %v1313_v25, %v1310_v22  ;;  %v1336_v46 = vshrl.u32 %v2235_v36, 16  ;;  %v2237_v49 = vld [vmem:[%s2881_s7 + $0xc0] sm:$0xf]  ;;  %v2238_v53 = vld [vmem:[%s2881_s7 + $0xc4] sm:$0x1]  ;;  %v2970_v14 = vld [vmem:[%s3126_s1 + $0x70] sm:$0xff]  }
  0x3a   : > { %v2245_v30 = vcombine.low %v1278_v23, %v1292_v28  ;;  %2441 = vmatprep.mubr.msk.bf16.mxu1 %vm555_vm0, %v2659_v26  ;;  %v1306_v38 = vsel %vm2928_vm3, %v1301_v31, %v1305_v21  ;;  %v1339_v47 = vshll.u32 %v2235_v36, 16  ;;  %v1345_v48 = vshll.u32 %v2236_v41, 16  ;;  %v2239_v54 = vld [vmem:[%s2881_s7 + $0xc8] sm:$0xf]  ;;  %v2240_v60 = vld [vmem:[%s2881_s7 + $0xcc] sm:$0x1] }
  0x3b   : > { %v1315_v40 = vrot.slane %v1314_v32, 4  ;;  %v1324_v51 = vrot.slane %v1322_v42, 4  ;;  %v1327_v52 = vrot.slane %v1325_v43, 5  ;;  %v1333_v56 = vrot.slane %v1331_v45, 5  ;;  %v2663_v18 = vld [vmem:[%s2881_s7 + $0x20] ss:$8 sps:$4 sm:$0xff]  }
  0x3c   : > { %2489 = vmatprep.mubr.msk.bf16.mxu0 %vm555_vm0, %v2245_v30  ;;  %v1338_v57 = vrot.slane %v1336_v46, 4  ;;  %v1341_v58 = vrot.slane %v1339_v47, 5  ;;  %v1347_v63 = vrot.slane %v1345_v48, 5  ;;  %v1353_v1 = vshll.u32 %v2237_v49, 16  ;;  %v2664_v21 = vld [vmem:[%s2881_s7 + $0x30] ss:$8 sps:$4 sm:$0xff]  }
  0x3d   : > { %v1320_v50 = vsel %vm2928_vm3, %v1315_v40, %v1319_v33  ;;  %v1328_v62 = vor.u32 %v1327_v52, %v1324_v51  ;;  %v1359_v3 = vshll.u32 %v2238_v53, 16  ;;  %v1364_v4 = vshrl.u32 %v2239_v54, 16  ;;  %v2666_v26 = vld [vmem:[%s2881_s7 + $0x8] ss:$8 sps:$4 sm:$0xff]   ;;  %v742_v28 = vld [vmem:[%s2881_s7] sm:$0xf] }
  0x3e   : > { %v2246_v55 = vcombine.low %v1306_v38, %v1320_v50  ;;  %v1342_v2 = vor.u32 %v1341_v58, %v1338_v57  ;;  %v1367_v5 = vshll.u32 %v2239_v54, 16  ;;  %v1355_v8 = vrot.slane %v1353_v1, 5  ;;  %v743_v30 = vld [vmem:[%s2881_s7 + $0x4] sm:$0x1]  ;;  %v744_v31 = vld [vmem:[%s2881_s7 + $0x8] sm:$0xf] }
  0x3f   : > { %v1329_v6 = vrot.slane %v1328_v62, 4  ;;  %v1373_v9 = vshll.u32 %v2240_v60, 16  ;;  %v1366_v12 = vrot.slane %v1364_v4, 4  ;;  %v745_v32 = vld [vmem:[%s2881_s7 + $0xc] sm:$0x1]  ;;  %v762_v33 = vshrl.u32 %v742_v28, 16 }
  0x40   : > { %2490 = vmatmul.mubr.msk.bf16.vlgmr.msra.gmra.mrb[0].mxu0 %vm555_vm0, %v2246_v55  ;;  %v1343_v10 = vrot.slane %v1342_v2, 4  ;;  %v1369_v13 = vrot.slane %v1367_v5, 5  ;;  %v765_v34 = vshll.u32 %v742_v28, 16  ;;  %v771_v35 = vshll.u32 %v743_v30, 16  ;;  %v746_v38 = vld [vmem:[%s2881_s7 + $0x10] sm:$0xf] }
  0x41   : > { %2442 = vmatmul.mubr.msk.bf16.vlgmr.msra.gmra.mrb[0].mxu1 %vm555_vm0, %v2660_v29  ;;  %2498 = vmatpush3.bf16.msra.mxu0 %v2915_v59  ;;  %v1334_v15 = vsel %vm2928_vm3, %v1329_v6, %v1333_v56  ;;  %v1361_v59 = vrot.slane %v1359_v3, 5  ;;  %v1375_v17 = vrot.slane %v1373_v9, 5  ;;  %v776_v36 = vshrl.u32 %v744_v31, 16  ;;  %v747_v42 = vld [vmem:[%s2881_s7 + $0x14] sm:$0x1]  ;;  %v2672_v3 = vld [vmem:[%s3126_s1 + $0x78] sm:$0xff]  }
  0x42   : > { %2450 = vmatpush3.bf16.msra.mxu1 %v2661_v0  ;;  %v1350_v0 = vshrl.u32 %v2237_v49, 16  ;;  %2499 = vmatprep.subr.bf16.mxu0 %v2662_v61  ;;  %v1348_v19 = vsel %vm2928_vm3, %v1343_v10, %v1347_v63  ;;  %v1370_v20 = vor.u32 %v1369_v13, %v1366_v12  ;;  %v779_v40 = vshll.u32 %v744_v31, 16  ;;  %v748_v43 = vld [vmem:[%s2881_s7 + $0x18] sm:$0xf]  ;;  %v749_v49 = vld [vmem:[%s2881_s7 + $0x1c] sm:$0x1] }
  0x43   : > { %2451 = vmatprep.subr.bf16.mxu1 %v2665_v27  ;;  %v2247_v22 = vcombine.low %v1334_v15, %v1348_v19  ;;  %2445 = vmatprep.mubr.msk.bf16.mxu1 %vm555_vm0, %v2663_v18  ;;  %v785_v41 = vshll.u32 %v745_v32, 16  ;;  %v764_v45 = vrot.slane %v762_v33, 4  ;;  %v767_v46 = vrot.slane %v765_v34, 5  ;;  %v2667_v50 = vld [vmem:[%s2881_s7 + $0x18] ss:$8 sps:$4 sm:$0xff]   ;;  %s3137_s11 = smov (!%p487_p9, %s2716_s11), 1 }
  0x44   : > { %v1352_v7 = vrot.slane %v1350_v0, 4  ;;  %v1371_v24 = vrot.slane %v1370_v20, 4  ;;  %v773_v47 = vrot.slane %v771_v35, 5  ;;  %v778_v48 = vrot.slane %v776_v36, 4  ;;  %v750_v15 = vld [vmem:[%s2881_s7 + $0x20] sm:$0xf] }
  0x45   : > { %2500 = vmatpush3.bf16.msra.mxu0 %v2662_v61  ;;  %2493 = vmatprep.mubr.msk.bf16.mxu0 %vm555_vm0, %v2247_v22  ;;  %v781_v51 = vrot.slane %v779_v40, 5  ;;  %v787_v52 = vrot.slane %v785_v41, 5  ;;  %v790_v53 = vshrl.u32 %v746_v38, 16  ;;  %v793_v54 = vshll.u32 %v746_v38, 16  ;;  %v752_v18 = vld [vmem:[%s2881_s7 + $0x28] sm:$0xf] }
  0x46   : > { %2452 = vmatpush3.bf16.msra.mxu1 %v2665_v27  ;;  %v1356_v16 = vor.u32 %v1355_v8, %v1352_v7  ;;  %2509 = vmatprep.subr.bf16.mxu0 %v2970_v14  ;;  %v1376_v27 = vsel %vm2928_vm3, %v1371_v24, %v1375_v17  ;;  %v768_v55 = vor.u32 %v767_v46, %v764_v45  ;;  %v799_v56 = vshll.u32 %v747_v42, 16  ;;  %v2670_v7 = vld [vmem:[%s2881_s7 + $0x28] ss:$8 sps:$4 sm:$0xff]   ;;  %v751_v17 = vld [vmem:[%s2881_s7 + $0x24] sm:$0x1]  ;;  %v2673_v36 = vld [vmem:[%s3126_s1 + $0x38] sm:$0xff]  }
  0x47   : > { %2461 = vmatprep.subr.bf16.mxu1 %v2953_v44  ;;  %v804_v57 = vshrl.u32 %v748_v43, 16  ;;  %v807_v58 = vshll.u32 %v748_v43, 16  ;;  %v782_v60 = vor.u32 %v781_v51, %v778_v48  ;;  %v792_v61 = vrot.slane %v790_v53, 4  ;;  %v753_v22 = vld [vmem:[%s2881_s7 + $0x2c] sm:$0x1] }
  0x48   : > { %v1357_v23 = vrot.slane %v1356_v16, 4  ;;  %v795_v62 = vrot.slane %v793_v54, 5  ;;  %v813_v63 = vshll.u32 %v749_v49, 16  ;;  %v769_v0 = vrot.slane %v768_v55, 4  ;;  %v754_v30 = vld [vmem:[%s2881_s7 + $0x30] sm:$0xf] }
  0x49   : > { %2446 = vmatmul.mubr.msk.bf16.gmra.mrb[4].mxu1 %vm555_vm0, %v2664_v21  ;;  %v806_v1 = vrot.slane %v804_v57, 4  ;;  %v809_v2 = vrot.slane %v807_v58, 5  ;;  %v783_v4 = vrot.slane %v782_v60, 4  ;;  %v801_v6 = vrot.slane %v799_v56, 5  ;;  %v2671_v21 = vld [vmem:[%s2881_s7 + $0x38] ss:$8 sps:$4 sm:$0xff]  }
  0x4a   : > { %v1362_v25 = vsel %vm2928_vm3, %v1357_v23, %v1361_v59  ;;  %v796_v5 = vor.u32 %v795_v62, %v792_v61  ;;  %v774_v8 = vsel %vm2928_vm3, %v769_v0, %v773_v47  ;;  %v815_v10 = vrot.slane %v813_v63, 5  ;;  %v755_v35 = vld [vmem:[%s2881_s7 + $0x34] sm:$0x1]  ;;  %v756_v41 = vld [vmem:[%s2881_s7 + $0x38] sm:$0xf] }
  0x4b   : > { %v2248_v29 = vcombine.low %v1362_v25, %v1376_v27  ;;  %v810_v9 = vor.u32 %v809_v2, %v806_v1  ;;  %v788_v12 = vsel %vm2928_vm3, %v783_v4, %v787_v52  ;;  %v818_v19 = vshrl.u32 %v750_v15, 16  ;;  %v757_v42 = vld [vmem:[%s2881_s7 + $0x3c] sm:$0x1]  ;;  %v2674_v62 = vld [vmem:[%s2881_s7 + $0x50] ss:$8 sps:$4 sm:$0xff]  }
  0x4c   : > { %v797_v13 = vrot.slane %v796_v5, 4  ;;  %v2171_v16 = vcombine.low %v774_v8, %v788_v12  ;;  %v821_v23 = vshll.u32 %v750_v15, 16  ;;  %v827_v24 = vshll.u32 %v751_v17, 16  ;;  %v2675_v1 = vld [vmem:[%s2881_s7 + $0x60] ss:$8 sps:$4 sm:$0xff]  }
  0x4d   : > { %2494 = vmatmul.mubr.msk.bf16.gmra.mrb[4].mxu0 %vm555_vm0, %v2248_v29  ;;  %v811_v59 = vrot.slane %v810_v9, 4  ;;  %v832_v25 = vshrl.u32 %v752_v18, 16  ;;  %v820_v27 = vrot.slane %v818_v19, 4  ;;  %v835_v28 = vshll.u32 %v752_v18, 16  ;;  %v2681_v5 = vld [vmem:[%s3126_s1 + $0x88] sm:$0xff]  }
  0x4e   : > { %2501 = vmatprep.mubr.msk.bf16.mxu0 %vm555_vm0, %v2666_v26  ;;  %v802_v20 = vsel %vm2928_vm3, %v797_v13, %v801_v6  ;;  %2453 = vmatprep.mubr.msk.bf16.mxu1 %vm555_vm0, %v2171_v16  ;;  %v841_v29 = vshll.u32 %v753_v22, 16  ;;  %v823_v32 = vrot.slane %v821_v23, 5  ;;  %v829_v33 = vrot.slane %v827_v24, 5  ;;  %v2679_v9 = vld [vmem:[%s2881_s7 + $0x70] ss:$8 sps:$4 sm:$0xff]  }
  0x4f   : > { %v816_v26 = vsel %vm2928_vm3, %v811_v59, %v815_v10  ;;  %v834_v34 = vrot.slane %v832_v25, 4  ;;  %v837_v38 = vrot.slane %v835_v28, 5  ;;  %v846_v45 = vshrl.u32 %v754_v30, 16  ;;  %v2680_v12 = vld [vmem:[%s2881_s7 + $0x80] ss:$8 sps:$4 sm:$0xff]  }
  0x50   : > { %v2172_v31 = vcombine.low %v802_v20, %v816_v26  ;;  %v843_v40 = vrot.slane %v841_v29, 5  ;;  %v824_v43 = vor.u32 %v823_v32, %v820_v27  ;;  %v849_v46 = vshll.u32 %v754_v30, 16  ;;  %v2299_v13 = vld [vmem:[%s2881_s7 + $0x8] sm:$0xf]  ;;  %v2300_v15 = vld [vmem:[%s2881_s7 + $0xc] sm:$0x1] }
  0x51   : > { %v855_v47 = vshll.u32 %v755_v35, 16  ;;  %v838_v48 = vor.u32 %v837_v38, %v834_v34  ;;  %v860_v49 = vshrl.u32 %v756_v41, 16  ;;  %v869_v51 = vshll.u32 %v757_v42, 16  ;;  %v2678_v16 = vld [vmem:[%s2881_s7 + $0xa0] ss:$8 sps:$4 sm:$0xff]  }
  0x52   : > { %2454 = vmatmul.mubr.msk.bf16.vlgmr.msra.gmra.mrb[0].mxu1 %vm555_vm0, %v2172_v31  ;;  %v825_v52 = vrot.slane %v824_v43, 4  ;;  %v848_v53 = vrot.slane %v846_v45, 4  ;;  %v851_v54 = vrot.slane %v849_v46, 5  ;;  %v2301_v59 = vld [vmem:[%s2881_s7 + $0x10] sm:$0xf]  ;;  %v1770_v18 = vshrl.u32 %v2299_v13, 16 }
  0x53   : > { %2462 = vmatpush3.bf16.msra.mxu1 %v2953_v44  ;;  %v857_v55 = vrot.slane %v855_v47, 5  ;;  %v839_v56 = vrot.slane %v838_v48, 4  ;;  %v862_v57 = vrot.slane %v860_v49, 4  ;;  %v871_v60 = vrot.slane %v869_v51, 5  ;;  %v2302_v17 = vld [vmem:[%s2881_s7 + $0x14] sm:$0x1] }
  0x54   : > { %2463 = vmatprep.subr.bf16.mxu1 %v2673_v36  ;;  %v830_v44 = vsel %vm2928_vm3, %v825_v52, %v829_v33  ;;  %v852_v61 = vor.u32 %v851_v54, %v848_v53  ;;  %v1773_v19 = vshll.u32 %v2299_v13, 16  ;;  %v2682_v20 = vld [vmem:[%s2881_s7 + $0xb0] ss:$8 sps:$4 sm:$0xff]   ;;  %v1784_v22 = vshrl.u32 %v2301_v59, 16  ;;  %v2304_v27 = vld [vmem:[%s2881_s7 + $0x1c] sm:$0x1] }
  0x55   : > { %2502 = vmatmul.mubr.msk.bf16.vlgmr.msra.gmra.mrb[0].mxu0 %vm555_vm0, %v2667_v50  ;;  %v863_v50 = vshll.u32 %v756_v41, 16  ;;  %v844_v63 = vsel %vm2928_vm3, %v839_v56, %v843_v40  ;;  %v1787_v23 = vshll.u32 %v2301_v59, 16  ;;  %v1793_v24 = vshll.u32 %v2302_v17, 16  ;;  %v2303_v25 = vld [vmem:[%s2881_s7 + $0x18] sm:$0xf] }
  0x56   : > { %2510 = vmatpush3.bf16.msra.mxu0 %v2970_v14  ;;  %2505 = vmatprep.mubr.msk.bf16.mxu0 %vm555_vm0, %v2670_v7  ;;  %v2676_v14 = vld [vmem:[%s3126_s1 + $0x80] sm:$0xff]   ;;  %v2173_v2 = vcombine.low %v830_v44, %v844_v63  ;;  %v2677_v7 = vld [vmem:[%s2881_s7 + $0x90] ss:$8 sps:$4 sm:$0xff]   ;;  %v1775_v26 = vrot.slane %v1773_v19, 5  ;;  %v1786_v30 = vrot.slane %v1784_v22, 4  ;;  %v1798_v35 = vshrl.u32 %v2303_v25, 16 }
  0x57   : > { %2511 = vmatprep.subr.bf16.mxu0 %v2672_v3  ;;  %v865_v58 = vrot.slane %v863_v50, 5  ;;  %2464 = vmatpush3.bf16.msra.mxu1 %v2673_v36  ;;  %v2305_v28 = vld [vmem:[%s2881_s7 + $0x20] sm:$0xf]  ;;  %v1789_v31 = vrot.slane %v1787_v23, 5  ;;  %v1795_v32 = vrot.slane %v1793_v24, 5  ;;  %v1801_v36 = vshll.u32 %v2303_v25, 16 }
  0x58   : > { %2533 = vmatprep.subr.bf16.mxu1 %v2869_v37  ;;  %2457 = vmatprep.mubr.msk.bf16.mxu1 %vm555_vm0, %v2173_v2  ;;  %v2306_v33 = vld [vmem:[%s2881_s7 + $0x24] sm:$0x1]  ;;  %v1807_v38 = vshll.u32 %v2304_v27, 16  ;;  %v1812_v41 = vshrl.u32 %v2305_v28, 16  ;;  %v1815_v42 = vshll.u32 %v2305_v28, 16  ;;  %v1800_v46 = vrot.slane %v1798_v35, 4 }
  0x59   : > { %v866_v0 = vor.u32 %v865_v58, %v862_v57  ;;  %v1790_v40 = vor.u32 %v1789_v31, %v1786_v30  ;;  %v1821_v43 = vshll.u32 %v2306_v33, 16  ;;  %v1803_v47 = vrot.slane %v1801_v36, 5  ;;  %v2307_v53 = vld [vmem:[%s2881_s7 + $0x28] sm:$0xf]  ;;  %v2308_v57 = vld [vmem:[%s2881_s7 + $0x2c] sm:$0x1] }
  0x5a   : > { %2512 = vmatpush3.bf16.msra.mxu0 %v2672_v3  ;;  %v853_v3 = vrot.slane %v852_v61, 4  ;;  %v1809_v48 = vrot.slane %v1807_v38, 5  ;;  %v1814_v50 = vrot.slane %v1812_v41, 4  ;;  %v1817_v51 = vrot.slane %v1815_v42, 5  ;;  %v2683_v54 = vld [vmem:[%s2881_s7 + $0xc0] ss:$8 sps:$4 sm:$0xff]  }
  0x5b   : > { %2521 = vmatprep.subr.bf16.mxu0 %v2676_v14  ;;  %v867_v4 = vrot.slane %v866_v0, 4  ;;  %v1791_v49 = vrot.slane %v1790_v40, 4  ;;  %v1823_v52 = vrot.slane %v1821_v43, 5  ;;  %v1804_v56 = vor.u32 %v1803_v47, %v1800_v46  ;;  %v2309_v58 = vld [vmem:[%s2881_s7 + $0x30] sm:$0xf] }
  0x5c   : > { %v858_v6 = vsel %vm2928_vm3, %v853_v3, %v857_v55  ;;  %v1818_v44 = vor.u32 %v1817_v51, %v1814_v50  ;;  %v1826_v61 = vshrl.u32 %v2307_v53, 16  ;;  %v1835_v2 = vshll.u32 %v2308_v57, 16  ;;  %v2313_v17 = vld [vmem:[%s2881_s7 + $0x40] sm:$0xf]  ;;  %v2685_v43 = vld [vmem:[%s2881_s7 + $0x108] ss:$8 sps:$4 sm:$0xff]  }
  0x5d   : > { %2506 = vmatmul.mubr.msk.bf16.gmra.mrb[4].mxu0 %vm555_vm0, %v2671_v21  ;;  %v872_v8 = vsel %vm2928_vm3, %v867_v4, %v871_v60  ;;  %v1779_v21 = vshll.u32 %v2300_v15, 16  ;;  %v2310_v60 = vld [vmem:[%s2881_s7 + $0x34] sm:$0x1]  ;;  %v1805_v0 = vrot.slane %v1804_v56, 4  ;;  %v1840_v3 = vshrl.u32 %v2309_v58, 16 }
  0x5e   : > { %2513 = vmatprep.mubr.msk.bf16.mxu0 %vm555_vm0, %v2674_v62  ;;  %v2174_v10 = vcombine.low %v858_v6, %v872_v8  ;;  %v1829_v62 = vshll.u32 %v2307_v53, 16  ;;  %v1819_v4 = vrot.slane %v1818_v44, 4  ;;  %v2311_v8 = vld [vmem:[%s2881_s7 + $0x38] sm:$0xf]  ;;  %v1849_v13 = vshll.u32 %v2310_v60, 16 }
  0x5f   : > { %v1781_v29 = vrot.slane %v1779_v21, 5  ;;  %v2312_v15 = vld [vmem:[%s2881_s7 + $0x3c] sm:$0x1]  ;;  %v1854_v19 = vshrl.u32 %v2311_v8, 16  ;;  %v1857_v22 = vshll.u32 %v2311_v8, 16  ;;  %v1871_v28 = vshll.u32 %v2313_v17, 16 }
  0x60   : > { %2458 = vmatmul.mubr.msk.bf16.gmra.mrb[4].mxu1 %vm555_vm0, %v2174_v10  ;;  %v1831_v6 = vrot.slane %v1829_v62, 5  ;;  %v1837_v10 = vrot.slane %v1835_v2, 5  ;;  %v1851_v21 = vrot.slane %v1849_v13, 5  ;;  %v1863_v23 = vshll.u32 %v2312_v15, 16 }
  0x61   : > { %2465 = vmatprep.mubr.msk.bf16.mxu1 %vm555_vm0, %v2677_v7  ;;  %v1843_v7 = vshll.u32 %v2309_v58, 16  ;;  %v1859_v27 = vrot.slane %v1857_v22, 5  ;;  %v1873_v35 = vrot.slane %v1871_v28, 5 }
  0x65   : > { %2514 = vmatmul.mubr.msk.bf16.vlgmr.msra.gmra.mrb[0].mxu0 %vm555_vm0, %v2675_v1  ;;  %v2684_v1 = vld [vmem:[%s2881_s7 + $0xf8] ss:$8 sps:$4 sm:$0xff]  }
  0x66   : > { %2522 = vmatpush3.bf16.msra.mxu0 %v2676_v14  ;;  %2517 = vmatprep.mubr.msk.bf16.mxu0 %vm555_vm0, %v2679_v9  ;;  %v1772_v14 = vrot.slane %v1770_v18, 4  ;;  %v1810_v9 = vsel %vm2928_vm3, %v1805_v0, %v1809_v48  ;;  %v2314_v18 = vld [vmem:[%s2881_s7 + $0x44] sm:$0x1]  ;;  %s2339_s7 = sshll.u32 %s3137_s11, 5 }
  0x67   : > { %2523 = vmatprep.subr.bf16.mxu0 %v2681_v5  ;;  %s495_s23 = scalar_lea.vmem %s3127_s2, %s2339_s7 }
  0x68   : > { %v1776_v34 = vor.u32 %v1775_v26, %v1772_v14  ;;  %2466 = vmatmul.mubr.msk.bf16.vlgmr.msra.gmra.mrb[0].mxu1 %vm555_vm0, %v2678_v16  ;;  %v1824_v16 = vsel %vm2928_vm3, %v1819_v4, %v1823_v52  ;;  %v1856_v14 = vrot.slane %v1854_v19, 4  ;;  %v1868_v26 = vshrl.u32 %v2313_v17, 16 }
  0x69   : > { %2535 = vmatpush3.bf16.msra.mxu1 %v2869_v37  ;;  %2469 = vmatprep.mubr.msk.bf16.mxu1 %vm555_vm0, %v2682_v20  ;;  %v1796_v37 = vsel %vm2928_vm3, %v1791_v49, %v1795_v32  ;;  %v2320_v20 = vcombine.low %v1810_v9, %v1824_v16 }
  0x6a   : > { %2524 = vmatpush3.bf16.msra.mxu0 %v2681_v5  ;;  %v1777_v45 = vrot.slane %v1776_v34, 4  ;;  %2534 = vmatprep.subr.bf16.mxu1 %v2878_v39  ;;  %v1828_v5 = vrot.slane %v1826_v61, 4  ;;  %v1870_v32 = vrot.slane %v1868_v26, 4  ;;  %v1860_v33 = vor.u32 %v1859_v27, %v1856_v14 }
  0x6b   : > { %v1865_v34 = vrot.slane %v1863_v23, 5 }
  0x6c   : > { %v1782_v55 = vsel %vm2928_vm3, %v1777_v45, %v1781_v29  ;;  %v1832_v59 = vor.u32 %v1831_v6, %v1828_v5  ;;  %v1877_v29 = vshll.u32 %v2314_v18, 16  ;;  %v1861_v40 = vrot.slane %v1860_v33, 4 }
  0x6d   : > { %2518 = vmatmul.mubr.msk.bf16.gmra.mrb[4].mxu0 %vm555_vm0, %v2680_v12  ;;  %v2319_v63 = vcombine.low %v1782_v55, %v1796_v37  ;;  %2536 = vmatpush3.bf16.msra.mxu1 %v2878_v39  ;;  %v1842_v12 = vrot.slane %v1840_v3, 4  ;;  %v1845_v39 = vrot.slane %v1843_v7, 5  ;;  %v1874_v41 = vor.u32 %v1873_v35, %v1870_v32 }
  0x6e   : > { %v1833_v24 = vrot.slane %v1832_v59, 4  ;;  %v1879_v42 = vrot.slane %v1877_v29, 5  ;;  %v1866_v45 = vsel %vm2928_vm3, %v1861_v40, %v1865_v34 }
  0x6f   : > { %2525 = vmatprep.mubr.msk.bf16.mxu0 %vm555_vm0, %v2319_v63  ;;  %v1846_v25 = vor.u32 %v1845_v39, %v1842_v12  ;;  %v1875_v46 = vrot.slane %v1874_v41, 4 }
  0x70   : > { %2470 = vmatmul.mubr.msk.bf16.gmra.mrb[4].mxu1 %vm555_vm0, %v2683_v54  ;;  %v1838_v30 = vsel %vm2928_vm3, %v1833_v24, %v1837_v10 }
  0x71   : > { %2481 = vmatprep.mubr.msk.bf16.mxu1 %vm555_vm0, %v2684_v1  ;;  %v1847_v31 = vrot.slane %v1846_v25, 4  ;;  %v1880_v47 = vsel %vm2928_vm3, %v1875_v46, %v1879_v42 }
  0x72   : > { %v2322_v48 = vcombine.low %v1866_v45, %v1880_v47 }
  0x73   : > { %v1852_v36 = vsel %vm2928_vm3, %v1847_v31, %v1851_v21 }
  0x74   : > { %v2321_v38 = vcombine.low %v1838_v30, %v1852_v36 }
  0x75   : > { %2526 = vmatmul.mubr.msk.bf16.vlgmr.msra.gmra.mrb[0].mxu0 %vm555_vm0, %v2320_v20 }
  0x76   : > { %2529 = vmatprep.mubr.msk.bf16.mxu0 %vm555_vm0, %v2321_v38 }
  0x7c   : > { %2482 = vmatmul.mubr.msk.bf16.vlgmr.msra.gmra.mrb[4].mxu1 %vm555_vm0, %v2685_v43 }
  0x7d   : > { %2530 = vmatmul.mubr.msk.bf16.gmra.mrb[4].mxu0 %vm555_vm0, %v2322_v48 }
 0x13b   : > { %v2467_v49 = vpop.f32.mrb[0].mxu1 }
 0x13c   : > { %v1079_v50 = vpop.f32.mrb[1].mxu1 }
 0x13d   : > { %v2468_v51 = vpop.f32.mrb[2].mxu1 }
 0x13e   : > { %v1082_v52 = vpop.f32.mrb[3].mxu1 }
 0x148   : > { %v2527_v53 = vpop.f32.mrb[0].mxu0 }
 0x149   : > { %v2537_v54 = vadd.f32 %v2527_v53, %v2467_v49  ;;  %v1956_v55 = vpop.f32.mrb[1].mxu0 }
 0x14a   : > { %v2538_v56 = vadd.f32 %v1956_v55, %v1079_v50  ;;  %v2528_v57 = vpop.f32.mrb[2].mxu0 }
 0x14b   : > { %v2539_v58 = vadd.f32 %v2528_v57, %v2468_v51  ;;  %v1959_v11 = vpop.f32.mrb[3].mxu0 }
 0x14c   : > { %v2540_v60 = vadd.f32 %v1959_v11, %v1082_v52 }
 0x14d   : > { %v2356_v37 = vpack.c.bf16 %v2539_v58, %v2537_v54 }
 0x14e   : > { %v2351_v44 = vpack.c.bf16 %v2540_v60, %v2538_v56 }
 0x14f   : > { %2368 = vst [vmem:[%s495_s23 + $0x8] sm:$0xff] %v2356_v37   ;;  %v2483_v61 = vpop.f32.mrb[4].mxu1 }
 0x150   : > { %2352 = vst [vmem:[%s495_s23] sm:$0xff] %v2351_v44   ;;  %v2531_v62 = vpop.f32.mrb[4].mxu0  ;;  %v1226_v63 = vpop.f32.mrb[5].mxu1 }
 0x151   : > { %v2541_v0 = vadd.f32 %v2531_v62, %v2483_v61  ;;  %v1972_v1 = vpop.f32.mrb[5].mxu0  ;;  %v2484_v2 = vpop.f32.mrb[6].mxu1 }
 0x152   : > { %v2542_v3 = vadd.f32 %v1972_v1, %v1226_v63  ;;  %v2532_v4 = vpop.f32.mrb[6].mxu0  ;;  %v1229_v5 = vpop.f32.mrb[7].mxu1 }
 0x153   : > { %v2543_v6 = vadd.f32 %v2532_v4, %v2484_v2  ;;  %v1975_v7 = vpop.f32.mrb[7].mxu0 }
 0x154   : > { %v2544_v8 = vadd.f32 %v1975_v7, %v1229_v5 }
 0x155   : > { %v2366_v9 = vpack.c.bf16 %v2543_v6, %v2541_v0 }
 0x156   : > { %v2361_v10 = vpack.c.bf16 %v2544_v8, %v2542_v3 }
 0x157   : > { %2370 = vst [vmem:[%s495_s23 + $0x18] sm:$0xff] %v2366_v9  }
 0x158   : > { %2369 = vst [vmem:[%s495_s23 + $0x10] sm:$0xff] %v2361_v10  }
 0x159 PF: > { %s12_s13 = sadd.s32 1, %s2724_s13   ;;  %s3130_s9 = smov %s2712_s10 }
 0x15a   : > { %p9_p10 = scmp.ge.s32.totalorder %s12_s13, 4   ;;  %s3131_s10 = smov %s2776_s17 }
 0x15b   : > { %s3132_s11 = smov %s2720_s12  ;;  %s3133_s12 = smov %s3135_s14 }
 0x15c   :  { %11 = sbr.rel (!%p9_p10) target bundleno = 3 (0x3), region = 117 }

// kernel: multi_scale_trident_conv_forward.2
= control target key start
LH: loop header
LB: loop body
LE: loop exit
PB: predicated region body
PF: predicated region fallthrough
CT: control target
= control target key end

     0   :  { %s6784_s9 = smov 0   ;;  %s6786_s10 = smov 0   ;;  %s8556_s0 = inlined_call_operand.vmem [shape: bf16[1,2,1,18,18,32], index: 0, kind: input, shape index: {}]   ;;  %s8557_s1 = inlined_call_operand.vmem [shape: bf16[9,32,128], index: 1, kind: input, shape index: {}]   ;;  %s8558_s2 = inlined_call_operand.vmem [shape: bf16[2,1,256,128], index: 2, kind: output, shape index: {}]  }
   0x1   :  { %s6788_s11 = smov 0  }
   0x2 LB: > { %s24_s12 = sadd.s32 1, %s6763_s10  ;;  %p5103_p0 = scmp.ge.s32.totalorder %s6767_s11, 1  ;;  %s6767_s11 = sphi %s6788_s11, %s12_s11   ;;  %s6763_s10 = sphi %s6786_s10, %s8627_s10   ;;  %s6759_s9 = sphi %s6784_s9, %s8626_s9  }
   0x3   : > { %p26_p1 = scmp.ge.s32.totalorder %s24_s12, 2  ;;  %p132_p2 = scmp.lt.s32.totalorder %s6767_s11, 3 }
   0x5   : > { %s8629_s12 = smov (%p26_p1, %s24_s12), 0  ;;  %p133_p3 = pnand %p5103_p0, %p132_p2 }
   0x7   : > { %136 = sbr.rel (%p133_p3) target bundleno = 586 (0x24a), region = 28 }
   0xe   : > { %v6618_v0 = vld [vmem:[%s8557_s1 + $0x10] sm:$0xff]   ;;  %p162_p4 = scmp.lt.s32.totalorder %s6759_s9, 1  ;;  %v6619_v1 = vld [vmem:[%s8557_s1 + $0x40] sm:$0xff]   ;;  %v6620_v2 = vld [vmem:[%s8557_s1 + $0x18] sm:$0xff]   ;;  %vm233_vm0 = vsmask.f32 3328 }
   0xf   : > { %6009 = vmatprep.subr.bf16.mxu1 %v6618_v0  ;;  %6153 = vmatprep.subr.bf16.mxu0 %v6619_v1  ;;  %v6621_v3 = vld [vmem:[%s8557_s1 + $0x48] sm:$0xff]   ;;  %v6820_v4 = vld [vmem:[%s8557_s1] sm:$0xff]   ;;  %vm234_vm1 = vsmask.f32 7440  ;;  %v6830_v5 = vld [vmem:[%s8557_s1 + $0x50] sm:$0xff]   ;;  %vm685_vm3 = vcmask 261120  }
  0x10   : > { %s8631_s9 = smov (!%p162_p4, %s6759_s9), 1  ;;  %6010 = vmatpush3.bf16.msra.mxu1 %v6618_v0  ;;  %6154 = vmatpush3.bf16.msra.mxu0 %v6619_v1  ;;  %vm6850_vm2 = vmor %vm233_vm0, %vm234_vm1  ;;  %vm1244_vm4 = vcmask 1042432   ;;  %vm1245_vm5 = vcmask 1046532  }
  0x11   : > { %6011 = vmatprep.subr.bf16.mxu1 %v6620_v2  ;;  %s6593_s21 = smul.u32 216, %s8631_s9  ;;  %6155 = vmatprep.subr.bf16.mxu0 %v6621_v3  ;;  %vm7078_vm6 = vmor %vm1244_vm4, %vm1245_vm5 }
  0x13   : > { %s6825_s26 = scalar_lea.vmem %s8556_s0, %s6593_s21 }
  0x14   : > { %6012 = vmatpush3.bf16.msra.mxu1 %v6620_v2  ;;  %v181_v6 = vld [vmem:[%s6825_s26] sm:$0xf]  ;;  %v182_v7 = vld [vmem:[%s6825_s26 + $0x4] sm:$0xf]  ;;  %v217_v8 = vld [vmem:[%s6825_s26 + $0x8] sm:$0x1]  ;;  %6156 = vmatpush3.bf16.msra.mxu0 %v6621_v3 }
  0x15   : > { %v237_v9 = vshrl.u32 %v181_v6, 16  ;;  %v240_v10 = vshll.u32 %v181_v6, 16  ;;  %v246_v11 = vshll.u32 %v182_v7, 16  ;;  %v250_v12 = vshrl.u32 %v182_v7, 16  ;;  %6045 = vmatprep.subr.bf16.mxu1 %v6820_v4  ;;  %v5303_v13 = vld [vmem:[%s6825_s26 + $0xc] sm:$0xf]  ;;  %6189 = vmatprep.subr.bf16.mxu0 %v6830_v5 }
  0x16   : > { %v256_v14 = vshll.u32 %v217_v8, 16  ;;  %v6838_v15 = vld [vmem:[%s6825_s26 + $0x10] sm:$0xf]  ;;  %v6841_v16 = vld [vmem:[%s6825_s26 + $0x14] sm:$0x1]  ;;  %v2085_v22 = vshrl.u32 %v5303_v13, 16 }
  0x17   : > { %v239_v17 = vrot.slane %v237_v9, 4  ;;  %v242_v18 = vrot.slane %v240_v10, 5  ;;  %v248_v19 = vrot.slane %v246_v11, 5  ;;  %v252_v20 = vrot.slane %v250_v12, 4  ;;  %v183_v29 = vld [vmem:[%s6825_s26 + $0xc] sm:$0xf] }
  0x18   : > { %v258_v21 = vrot.slane %v256_v14, 5  ;;  %v2088_v23 = vshll.u32 %v5303_v13, 16  ;;  %v2094_v24 = vshll.u32 %v6838_v15, 16  ;;  %v2098_v27 = vshrl.u32 %v6838_v15, 16  ;;  %v184_v34 = vld [vmem:[%s6825_s26 + $0x10] sm:$0xf] }
  0x19   : > { %v243_v25 = vor.u32 %v242_v18, %v239_v17  ;;  %v253_v26 = vor.u32 %v252_v20, %v248_v19  ;;  %v2104_v28 = vshll.u32 %v6841_v16, 16  ;;  %v2087_v31 = vrot.slane %v2085_v22, 4  ;;  %v218_v40 = vld [vmem:[%s6825_s26 + $0x14] sm:$0x1]  ;;  %v5306_v51 = vld [vmem:[%s6825_s26 + $0x18] sm:$0xf] }
  0x1a   : > { %v2090_v32 = vrot.slane %v2088_v23, 5  ;;  %v2096_v33 = vrot.slane %v2094_v24, 5  ;;  %v2100_v37 = vrot.slane %v2098_v27, 4  ;;  %v261_v41 = vshrl.u32 %v183_v29, 16  ;;  %v6862_v56 = vld [vmem:[%s6825_s26 + $0x1c] sm:$0xf] }
  0x1b   : > { %v244_v35 = vrot.slane %v243_v25, 4  ;;  %v254_v36 = vrot.slane %v253_v26, 4  ;;  %v2106_v39 = vrot.slane %v2104_v28, 5  ;;  %v264_v42 = vshll.u32 %v183_v29, 16  ;;  %v6870_v61 = vld [vmem:[%s6825_s26 + $0x20] sm:$0x1] }
  0x1c   : > { %v2091_v38 = vor.u32 %v2090_v32, %v2087_v31  ;;  %v2101_v45 = vor.u32 %v2100_v37, %v2096_v33  ;;  %v270_v46 = vshll.u32 %v184_v34, 16  ;;  %v263_v49 = vrot.slane %v261_v41, 4  ;;  %v185_v12 = vld [vmem:[%s6825_s26 + $0x18] sm:$0xf]  ;;  %v219_v26 = vld [vmem:[%s6825_s26 + $0x20] sm:$0x1] }
  0x1d   : > { %v249_v43 = vsel %vm6850_vm2, %v244_v35, %v248_v19  ;;  %v259_v44 = vsel %vm6850_vm2, %v254_v36, %v258_v21  ;;  %v266_v50 = vrot.slane %v264_v42, 5  ;;  %v274_v54 = vshrl.u32 %v184_v34, 16  ;;  %v186_v19 = vld [vmem:[%s6825_s26 + $0x1c] sm:$0xf]  ;;  %v5309_v34 = vld [vmem:[%s6825_s26 + $0x24] sm:$0xf] }
  0x1e   : > { %v5111_v47 = vcombine.low %v249_v43, %v259_v44  ;;  %v2092_v48 = vrot.slane %v2091_v38, 4  ;;  %v2102_v52 = vrot.slane %v2101_v45, 4  ;;  %v272_v53 = vrot.slane %v270_v46, 5 }
  0x1f   : > { %v280_v55 = vshll.u32 %v218_v40, 16  ;;  %v2840_v58 = vrot.slane %v6838_v15, 5  ;;  %v2843_v59 = vrot.slane %v6841_v16, 5  ;;  %v267_v60 = vor.u32 %v266_v50, %v263_v49  ;;  %v6625_v40 = vld [vmem:[%s8557_s1 + $0x8] sm:$0xff]   ;;  %v6624_v50 = vld [vmem:[%s8557_s1 + $0x58] sm:$0xff]  }
  0x20   : > { %6013 = vmatprep.mubr.msk.bf16.mxu1 %vm685_vm3, %v5111_v47  ;;  %v2097_v57 = vsel %vm6850_vm2, %v2092_v48, %v2096_v33  ;;  %v2107_v62 = vsel %vm6850_vm2, %v2102_v52, %v2106_v39  ;;  %v276_v63 = vrot.slane %v274_v54, 4  ;;  %v2109_v1 = vshrl.u32 %v5306_v51, 16  ;;  %v6893_v39 = vld [vmem:[%s6825_s26 + $0x28] sm:$0xf]  ;;  %v6902_v47 = vld [vmem:[%s6825_s26 + $0x2c] sm:$0x1] }
  0x21   : > { %v282_v0 = vrot.slane %v280_v55, 5  ;;  %v5355_v2 = vcombine.low %v2097_v57, %v2107_v62  ;;  %v268_v3 = vrot.slane %v267_v60, 4  ;;  %v2112_v6 = vshll.u32 %v5306_v51, 16  ;;  %v187_v55 = vld [vmem:[%s6825_s26 + $0x24] sm:$0xf] }
  0x22   : > { %v2118_v7 = vshll.u32 %v6862_v56, 16  ;;  %v277_v8 = vor.u32 %v276_v63, %v272_v53  ;;  %v2111_v9 = vrot.slane %v2109_v1, 4  ;;  %v2122_v10 = vshrl.u32 %v6862_v56, 16  ;;  %v6628_v1 = vld [vmem:[%s8557_s1 + $0x20] sm:$0xff]  }
  0x23   : > { %v2128_v11 = vshll.u32 %v6870_v61, 16  ;;  %6157 = vmatprep.mubr.msk.bf16.mxu0 %vm685_vm3, %v5355_v2  ;;  %v273_v13 = vsel %vm6850_vm2, %v268_v3, %v272_v53  ;;  %v2114_v14 = vrot.slane %v2112_v6, 5  ;;  %v2847_v18 = vrot.slane %v6862_v56, 5 }
  0x24   : > { %v2120_v17 = vrot.slane %v2118_v7, 5  ;;  %v278_v20 = vrot.slane %v277_v8, 4  ;;  %v2124_v21 = vrot.slane %v2122_v10, 4  ;;  %v2850_v23 = vrot.slane %v6870_v61, 5 }
  0x25   : > { %v2130_v22 = vrot.slane %v2128_v11, 5  ;;  %v2115_v24 = vor.u32 %v2114_v14, %v2111_v9  ;;  %v6886_v25 = vrot.slane %v2847_v18, 4  ;;  %v285_v27 = vshrl.u32 %v185_v12, 16  ;;  %v220_v9 = vld [vmem:[%s6825_s26 + $0x2c] sm:$0x1] }
  0x26   : > { %v288_v28 = vshll.u32 %v185_v12, 16  ;;  %v283_v29 = vsel %vm6850_vm2, %v278_v20, %v282_v0  ;;  %v2125_v31 = vor.u32 %v2124_v21, %v2120_v17  ;;  %v294_v32 = vshll.u32 %v186_v19, 16  ;;  %v188_v0 = vld [vmem:[%s6825_s26 + $0x28] sm:$0xf] }
  0x27   : > { %v298_v33 = vshrl.u32 %v186_v19, 16  ;;  %v5112_v35 = vcombine.low %v273_v13, %v283_v29  ;;  %v2116_v36 = vrot.slane %v2115_v24, 4  ;;  %v287_v37 = vrot.slane %v285_v27, 4  ;;  %v5312_v19 = vld [vmem:[%s6825_s26 + $0x30] sm:$0xf] }
  0x28   : > { %v290_v38 = vrot.slane %v288_v28, 5  ;;  %v2126_v41 = vrot.slane %v2125_v31, 4  ;;  %v296_v42 = vrot.slane %v294_v32, 5  ;;  %v304_v44 = vshll.u32 %v219_v26, 16  ;;  %v6927_v26 = vld [vmem:[%s6825_s26 + $0x34] sm:$0xf] }
  0x29   : > { %v300_v43 = vrot.slane %v298_v33, 4  ;;  %6014 = vmatmul.mubr.msk.bf16.vlgmr.msra.gmra.mrb[0].mxu1 %vm685_vm3, %v5112_v35  ;;  %v2121_v45 = vsel %vm6850_vm2, %v2116_v36, %v2120_v17  ;;  %v2133_v48 = vshrl.u32 %v5309_v34, 16  ;;  %v2136_v49 = vshll.u32 %v5309_v34, 16  ;;  %v6938_v34 = vld [vmem:[%s6825_s26 + $0x38] sm:$0x1] }
  0x2a   : > { %v291_v46 = vor.u32 %v290_v38, %v287_v37  ;;  %6046 = vmatpush3.bf16.msra.mxu1 %v6820_v4  ;;  %v2131_v51 = vsel %vm6850_vm2, %v2126_v41, %v2130_v22  ;;  %v306_v53 = vrot.slane %v304_v44, 5  ;;  %v2142_v54 = vshll.u32 %v6893_v39, 16 }
  0x2b   : > { %v301_v52 = vor.u32 %v300_v43, %v296_v42  ;;  %v5356_v57 = vcombine.low %v2121_v45, %v2131_v51  ;;  %v2135_v62 = vrot.slane %v2133_v48, 4  ;;  %v2138_v63 = vrot.slane %v2136_v49, 5  ;;  %6047 = vmatprep.subr.bf16.mxu1 %v6625_v40 }
  0x2c   : > { %v292_v60 = vrot.slane %v291_v46, 4  ;;  %v2144_v2 = vrot.slane %v2142_v54, 5  ;;  %v2146_v3 = vshrl.u32 %v6893_v39, 16  ;;  %v2152_v6 = vshll.u32 %v6902_v47, 16  ;;  %v189_v46 = vld [vmem:[%s6825_s26 + $0x30] sm:$0xf] }
  0x2d   : > { %v302_v4 = vrot.slane %v301_v52, 4  ;;  %6158 = vmatmul.mubr.msk.bf16.vlgmr.msra.gmra.mrb[0].mxu0 %vm685_vm3, %v5356_v57  ;;  %v2139_v8 = vor.u32 %v2138_v63, %v2135_v62  ;;  %v309_v10 = vshrl.u32 %v187_v55, 16  ;;  %v312_v11 = vshll.u32 %v187_v55, 16 }
  0x2e   : > { %v297_v7 = vsel %vm6850_vm2, %v292_v60, %v296_v42  ;;  %6190 = vmatpush3.bf16.msra.mxu0 %v6830_v5  ;;  %v2148_v13 = vrot.slane %v2146_v3, 4  ;;  %v2154_v14 = vrot.slane %v2152_v6, 5  ;;  %v318_v17 = vshll.u32 %v188_v0, 16  ;;  %6048 = vmatpush3.bf16.msra.mxu1 %v6625_v40  ;;  %v6932_v5 = vld [vmem:[%s8557_s1 + $0x60] sm:$0xff]   ;;  %v221_v60 = vld [vmem:[%s6825_s26 + $0x38] sm:$0x1] }
  0x2f   : > { %v307_v12 = vsel %vm6850_vm2, %v302_v4, %v306_v53  ;;  %v2140_v21 = vrot.slane %v2139_v8, 4  ;;  %v311_v22 = vrot.slane %v309_v10, 4  ;;  %v314_v24 = vrot.slane %v312_v11, 5  ;;  %6191 = vmatprep.subr.bf16.mxu0 %v6624_v50  ;;  %6081 = vmatprep.subr.bf16.mxu1 %v6628_v1  ;;  %v190_v53 = vld [vmem:[%s6825_s26 + $0x34] sm:$0xf] }
  0x30   : > { %v5113_v20 = vcombine.low %v297_v7, %v307_v12  ;;  %v2149_v27 = vor.u32 %v2148_v13, %v2144_v2  ;;  %v320_v28 = vrot.slane %v318_v17, 5  ;;  %v322_v29 = vshrl.u32 %v188_v0, 16  ;;  %v5315_v7 = vld [vmem:[%s6825_s26 + $0x3c] sm:$0xf]  ;;  %v6956_v12 = vld [vmem:[%s6825_s26 + $0x40] sm:$0xf] }
  0x31   : > { %v328_v31 = vshll.u32 %v220_v9, 16  ;;  %v2145_v32 = vsel %vm6850_vm2, %v2140_v21, %v2144_v2  ;;  %v315_v33 = vor.u32 %v314_v24, %v311_v22  ;;  %v2157_v35 = vshrl.u32 %v5312_v19, 16  ;;  %v191_v21 = vld [vmem:[%s6825_s26 + $0x3c] sm:$0xf] }
  0x32   : > { %6017 = vmatprep.mubr.msk.bf16.mxu1 %vm685_vm3, %v5113_v20  ;;  %v2160_v36 = vshll.u32 %v5312_v19, 16  ;;  %v2150_v37 = vrot.slane %v2149_v27, 4  ;;  %v324_v38 = vrot.slane %v322_v29, 4  ;;  %v2166_v41 = vshll.u32 %v6927_v26, 16  ;;  %6192 = vmatpush3.bf16.msra.mxu0 %v6624_v50  ;;  %v6961_v20 = vld [vmem:[%s6825_s26 + $0x44] sm:$0x1] }
  0x33   : > { %v330_v40 = vrot.slane %v328_v31, 5  ;;  %v316_v42 = vrot.slane %v315_v33, 4  ;;  %v2159_v43 = vrot.slane %v2157_v35, 4  ;;  %v2170_v45 = vshrl.u32 %v6927_v26, 16  ;;  %6225 = vmatprep.subr.bf16.mxu0 %v6932_v5 }
  0x34   : > { %v2162_v44 = vrot.slane %v2160_v36, 5  ;;  %v2155_v48 = vsel %vm6850_vm2, %v2150_v37, %v2154_v14  ;;  %v325_v49 = vor.u32 %v324_v38, %v320_v28  ;;  %v2168_v51 = vrot.slane %v2166_v41, 5 }
  0x35   : > { %v2176_v52 = vshll.u32 %v6938_v34, 16  ;;  %v5357_v54 = vcombine.low %v2145_v32, %v2155_v48  ;;  %v321_v50 = vsel %vm6850_vm2, %v316_v42, %v320_v28  ;;  %v2172_v57 = vrot.slane %v2170_v45, 4 }
  0x36   : > { %v2163_v55 = vor.u32 %v2162_v44, %v2159_v43  ;;  %v326_v62 = vrot.slane %v325_v49, 4  ;;  %v333_v0 = vshrl.u32 %v189_v46, 16  ;;  %v336_v1 = vshll.u32 %v189_v46, 16 }
  0x37   : > { %v2178_v63 = vrot.slane %v2176_v52, 5  ;;  %6161 = vmatprep.mubr.msk.bf16.mxu0 %vm685_vm3, %v5357_v54  ;;  %v2173_v2 = vor.u32 %v2172_v57, %v2168_v51  ;;  %v342_v3 = vshll.u32 %v190_v53, 16  ;;  %v346_v6 = vshrl.u32 %v190_v53, 16  ;;  %v222_v54 = vld [vmem:[%s6825_s26 + $0x44] sm:$0x1] }
  0x38   : > { %v2164_v4 = vrot.slane %v2163_v55, 4  ;;  %v331_v8 = vsel %vm6850_vm2, %v326_v62, %v330_v40  ;;  %v335_v9 = vrot.slane %v333_v0, 4  ;;  %v338_v10 = vrot.slane %v336_v1, 5  ;;  %v192_v40 = vld [vmem:[%s6825_s26 + $0x40] sm:$0xf] }
  0x39   : > { %v352_v11 = vshll.u32 %v221_v60, 16  ;;  %v5114_v13 = vcombine.low %v321_v50, %v331_v8  ;;  %v2174_v17 = vrot.slane %v2173_v2, 4  ;;  %v344_v19 = vrot.slane %v342_v3, 5  ;;  %v5318_v55 = vld [vmem:[%s6825_s26 + $0x48] sm:$0xf] }
  0x3a   : > { %v2169_v14 = vsel %vm6850_vm2, %v2164_v4, %v2168_v51  ;;  %v339_v22 = vor.u32 %v338_v10, %v335_v9  ;;  %v348_v24 = vrot.slane %v346_v6, 4  ;;  %v2181_v28 = vshrl.u32 %v5315_v7, 16  ;;  %v6979_v0 = vld [vmem:[%s6825_s26 + $0x4c] sm:$0xf] }
  0x3b   : > { %v354_v27 = vrot.slane %v352_v11, 5  ;;  %6018 = vmatmul.mubr.msk.bf16.gmra.mrb[4].mxu1 %vm685_vm3, %v5114_v13  ;;  %v2179_v29 = vsel %vm6850_vm2, %v2174_v17, %v2178_v63  ;;  %v2184_v31 = vshll.u32 %v5315_v7, 16  ;;  %v2190_v32 = vshll.u32 %v6956_v12, 16  ;;  %v6987_v13 = vld [vmem:[%s6825_s26 + $0x50] sm:$0x1] }
  0x3c   : > { %v2194_v33 = vshrl.u32 %v6956_v12, 16  ;;  %v5358_v35 = vcombine.low %v2169_v14, %v2179_v29  ;;  %v340_v36 = vrot.slane %v339_v22, 4  ;;  %v349_v37 = vor.u32 %v348_v24, %v344_v19 }
  0x3d   : > { %v2183_v38 = vrot.slane %v2181_v28, 4  ;;  %v2186_v41 = vrot.slane %v2184_v31, 5  ;;  %v2192_v42 = vrot.slane %v2190_v32, 5  ;;  %v2200_v44 = vshll.u32 %v6961_v20, 16  ;;  %v6994_v28 = vld [vmem:[%s6825_s26 + $0x4c] sm:$0xf] }
  0x3e   : > { %v2196_v43 = vrot.slane %v2194_v33, 4  ;;  %6162 = vmatmul.mubr.msk.bf16.gmra.mrb[4].mxu0 %vm685_vm3, %v5358_v35  ;;  %v345_v45 = vsel %vm6850_vm2, %v340_v36, %v344_v19  ;;  %v350_v46 = vrot.slane %v349_v37, 4  ;;  %v357_v48 = vshrl.u32 %v191_v21, 16  ;;  %v6991_v19 = vld [vmem:[%s6825_s26 + $0x48] sm:$0xf] }
  0x3f   : > { %v360_v49 = vshll.u32 %v191_v21, 16  ;;  %v2187_v51 = vor.u32 %v2186_v41, %v2183_v38  ;;  %v2202_v53 = vrot.slane %v2200_v44, 5  ;;  %v366_v50 = vshll.u32 %v192_v40, 16  ;;  %v223_v38 = vld [vmem:[%s6825_s26 + $0x50] sm:$0x1] }
  0x40   : > { %v2197_v52 = vor.u32 %v2196_v43, %v2192_v42  ;;  %v355_v57 = vsel %vm6850_vm2, %v350_v46, %v354_v27  ;;  %v359_v60 = vrot.slane %v357_v48, 4  ;;  %v370_v63 = vshrl.u32 %v192_v40, 16 }
  0x41   : > { %v362_v62 = vrot.slane %v360_v49, 5  ;;  %v5115_v1 = vcombine.low %v345_v45, %v355_v57  ;;  %v2188_v4 = vrot.slane %v2187_v51, 4  ;;  %v368_v3 = vrot.slane %v366_v50, 5  ;;  %v5321_v45 = vld [vmem:[%s6825_s26 + $0x54] sm:$0xf] }
  0x42   : > { %v2198_v2 = vrot.slane %v2197_v52, 4  ;;  %v372_v7 = vrot.slane %v370_v63, 4  ;;  %v376_v8 = vshll.u32 %v222_v54, 16  ;;  %v2205_v9 = vshrl.u32 %v5318_v55, 16 }
  0x43   : > { %v363_v6 = vor.u32 %v362_v62, %v359_v60  ;;  %6021 = vmatprep.mubr.msk.bf16.mxu1 %vm685_vm3, %v5115_v1  ;;  %v2193_v10 = vsel %vm6850_vm2, %v2188_v4, %v2192_v42  ;;  %v2208_v14 = vshll.u32 %v5318_v55, 16  ;;  %v2214_v17 = vshll.u32 %v6979_v0, 16  ;;  %v7010_v55 = vld [vmem:[%s6825_s26 + $0x58] sm:$0xf] }
  0x44   : > { %v2203_v11 = vsel %vm6850_vm2, %v2198_v2, %v2202_v53  ;;  %v373_v24 = vor.u32 %v372_v7, %v368_v3  ;;  %v378_v27 = vrot.slane %v376_v8, 5  ;;  %v2207_v29 = vrot.slane %v2205_v9, 4 }
  0x45   : > { %v5359_v21 = vcombine.low %v2193_v10, %v2203_v11  ;;  %v364_v22 = vrot.slane %v363_v6, 4  ;;  %v2210_v31 = vrot.slane %v2208_v14, 5  ;;  %v2216_v32 = vrot.slane %v2214_v17, 5  ;;  %v7020_v11 = vld [vmem:[%s6825_s26 + $0x54] sm:$0xf] }
  0x46   : > { %v2218_v33 = vshrl.u32 %v6979_v0, 16  ;;  %v374_v36 = vrot.slane %v373_v24, 4  ;;  %v2224_v37 = vshll.u32 %v6987_v13, 16  ;;  %v381_v40 = vshrl.u32 %v6991_v19, 16  ;;  %v7026_v24 = vld [vmem:[%s6825_s26 + $0x58] sm:$0xf] }
  0x47   : > { %6165 = vmatprep.mubr.msk.bf16.mxu0 %vm685_vm3, %v5359_v21  ;;  %v369_v35 = vsel %vm6850_vm2, %v364_v22, %v368_v3  ;;  %v2211_v41 = vor.u32 %v2210_v31, %v2207_v29  ;;  %v384_v43 = vshll.u32 %v6991_v19, 16  ;;  %v390_v44 = vshll.u32 %v6994_v28, 16  ;;  %v7016_v3 = vld [vmem:[%s6825_s26 + $0x5c] sm:$0x1] }
  0x48   : > { %v2220_v42 = vrot.slane %v2218_v33, 4  ;;  %v379_v46 = vsel %vm6850_vm2, %v374_v36, %v378_v27  ;;  %v2226_v48 = vrot.slane %v2224_v37, 5  ;;  %v383_v49 = vrot.slane %v381_v40, 4  ;;  %v224_v37 = vld [vmem:[%s6825_s26 + $0x5c] sm:$0x1] }
  0x49   : > { %v394_v51 = vshrl.u32 %v6994_v28, 16  ;;  %v5116_v52 = vcombine.low %v369_v35, %v379_v46  ;;  %v2212_v53 = vrot.slane %v2211_v41, 4  ;;  %v386_v50 = vrot.slane %v384_v43, 5 }
  0x4a   : > { %v2221_v54 = vor.u32 %v2220_v42, %v2216_v32  ;;  %v392_v57 = vrot.slane %v390_v44, 5  ;;  %v400_v62 = vshll.u32 %v223_v38, 16  ;;  %v2229_v63 = vshrl.u32 %v5321_v45, 16  ;;  %v5324_v44 = vld [vmem:[%s6825_s26 + $0x60] sm:$0xf] }
  0x4b   : > { %v396_v60 = vrot.slane %v394_v51, 4  ;;  %6022 = vmatmul.mubr.msk.bf16.gmra.mrb[8].mxu1 %vm685_vm3, %v5116_v52  ;;  %v2217_v1 = vsel %vm6850_vm2, %v2212_v53, %v2216_v32  ;;  %v387_v2 = vor.u32 %v386_v50, %v383_v49  ;;  %v2232_v6 = vshll.u32 %v5321_v45, 16  ;;  %v7040_v51 = vld [vmem:[%s6825_s26 + $0x64] sm:$0xf] }
  0x4c   : > { %v2222_v4 = vrot.slane %v2221_v54, 4  ;;  %v402_v8 = vrot.slane %v400_v62, 5  ;;  %v2231_v9 = vrot.slane %v2229_v63, 4  ;;  %v2238_v10 = vshll.u32 %v7010_v55, 16 }
  0x4d   : > { %v397_v7 = vor.u32 %v396_v60, %v392_v57  ;;  %v388_v17 = vrot.slane %v387_v2, 4  ;;  %v2234_v21 = vrot.slane %v2232_v6, 5  ;;  %v2242_v22 = vshrl.u32 %v7010_v55, 16  ;;  %v7047_v60 = vld [vmem:[%s6825_s26 + $0x60] sm:$0xf] }
  0x4e   : > { %v2227_v14 = vsel %vm6850_vm2, %v2222_v4, %v2226_v48  ;;  %v2240_v31 = vrot.slane %v2238_v10, 5  ;;  %v2248_v32 = vshll.u32 %v7016_v3, 16  ;;  %v405_v38 = vshrl.u32 %v7020_v11, 16 }
  0x4f   : > { %v5360_v27 = vcombine.low %v2217_v1, %v2227_v14  ;;  %v398_v29 = vrot.slane %v397_v7, 4  ;;  %v393_v33 = vsel %vm6850_vm2, %v388_v17, %v392_v57  ;;  %v2235_v35 = vor.u32 %v2234_v21, %v2231_v9  ;;  %v7044_v57 = vld [vmem:[%s6825_s26 + $0x68] sm:$0x1]  ;;  %v7057_v21 = vld [vmem:[%s6825_s26 + $0x64] sm:$0xf] }
  0x50   : > { %v2244_v36 = vrot.slane %v2242_v22, 4  ;;  %v2250_v41 = vrot.slane %v2248_v32, 5  ;;  %v408_v42 = vshll.u32 %v7020_v11, 16  ;;  %v414_v43 = vshll.u32 %v7026_v24, 16  ;;  %v225_v32 = vld [vmem:[%s6825_s26 + $0x68] sm:$0x1] }
  0x51   : > { %6166 = vmatmul.mubr.msk.bf16.gmra.mrb[8].mxu0 %vm685_vm3, %v5360_v27  ;;  %v403_v40 = vsel %vm6850_vm2, %v398_v29, %v402_v8  ;;  %v2236_v46 = vrot.slane %v2235_v35, 4  ;;  %v407_v49 = vrot.slane %v405_v38, 4  ;;  %v418_v54 = vshrl.u32 %v7026_v24, 16 }
  0x52   : > { %v5117_v45 = vcombine.low %v393_v33, %v403_v40  ;;  %v2245_v48 = vor.u32 %v2244_v36, %v2240_v31  ;;  %v410_v52 = vrot.slane %v408_v42, 5  ;;  %v416_v53 = vrot.slane %v414_v43, 5 }
  0x53   : > { %v424_v50 = vshll.u32 %v224_v37, 16  ;;  %v2241_v62 = vsel %vm6850_vm2, %v2236_v46, %v2240_v31  ;;  %v2253_v1 = vshrl.u32 %v5324_v44, 16  ;;  %v2256_v4 = vshll.u32 %v5324_v44, 16 }
  0x54   : > { %6025 = vmatprep.mubr.msk.bf16.mxu1 %vm685_vm3, %v5117_v45  ;;  %v2246_v63 = vrot.slane %v2245_v48, 4  ;;  %v411_v2 = vor.u32 %v410_v52, %v407_v49  ;;  %v420_v6 = vrot.slane %v418_v54, 4  ;;  %v2262_v8 = vshll.u32 %v7040_v51, 16  ;;  %v5389_v48 = vld [vmem:[%s6825_s26 + $0xc] sm:$0xe] }
  0x55   : > { %v426_v7 = vrot.slane %v424_v50, 5  ;;  %v2255_v10 = vrot.slane %v2253_v1, 4  ;;  %v2258_v14 = vrot.slane %v2256_v4, 5  ;;  %v2266_v17 = vshrl.u32 %v7040_v51, 16 }
  0x56   : > { %v2251_v9 = vsel %vm6850_vm2, %v2246_v63, %v2250_v41  ;;  %v412_v27 = vrot.slane %v411_v2, 4  ;;  %v421_v29 = vor.u32 %v420_v6, %v416_v53  ;;  %v2264_v31 = vrot.slane %v2262_v8, 5 }
  0x57   : > { %v5361_v22 = vcombine.low %v2241_v62, %v2251_v9  ;;  %v2259_v33 = vor.u32 %v2258_v14, %v2255_v10  ;;  %v2268_v35 = vrot.slane %v2266_v17, 4  ;;  %v2272_v36 = vshll.u32 %v7044_v57, 16  ;;  %v7072_v62 = vld [vmem:[%s6825_s26 + $0x6c] sm:$0xf]  ;;  %v7085_v10 = vld [vmem:[%s6825_s26 + $0x70] sm:$0xf] }
  0x58   : > { %v429_v37 = vshrl.u32 %v7047_v60, 16  ;;  %v417_v38 = vsel %vm6850_vm2, %v412_v27, %v416_v53  ;;  %v422_v40 = vrot.slane %v421_v29, 4  ;;  %v432_v41 = vshll.u32 %v7047_v60, 16 }
  0x59   : > { %6169 = vmatprep.mubr.msk.bf16.mxu0 %vm685_vm3, %v5361_v22  ;;  %v438_v42 = vshll.u32 %v7057_v21, 16  ;;  %v2260_v43 = vrot.slane %v2259_v33, 4  ;;  %v2269_v44 = vor.u32 %v2268_v35, %v2264_v31  ;;  %v2274_v45 = vrot.slane %v2272_v36, 5  ;;  %v226_v35 = vld [vmem:[%s6825_s26 + $0x74] sm:$0x1] }
  0x5a   : > { %v431_v46 = vrot.slane %v429_v37, 4  ;;  %v427_v49 = vsel %vm6850_vm2, %v422_v40, %v426_v7  ;;  %v434_v52 = vrot.slane %v432_v41, 5  ;;  %v442_v50 = vshrl.u32 %v7057_v21, 16  ;;  %v5390_v36 = vld [vmem:[%s6825_s26 + $0x18] sm:$0xe] }
  0x5b   : > { %v440_v54 = vrot.slane %v438_v42, 5  ;;  %v5118_v53 = vcombine.low %v417_v38, %v427_v49  ;;  %v2265_v63 = vsel %vm6850_vm2, %v2260_v43, %v2264_v31  ;;  %v2270_v1 = vrot.slane %v2269_v44, 4  ;;  %v7104_v42 = vld [vmem:[%s6825_s26 + $0x78] sm:$0xf] }
  0x5c   : > { %v448_v4 = vshll.u32 %v225_v32, 16  ;;  %v435_v6 = vor.u32 %v434_v52, %v431_v46  ;;  %v444_v7 = vrot.slane %v442_v50, 4  ;;  %v5405_v8 = vrot.slane %v5389_v48, 9  ;;  %v227_v50 = vld [vmem:[%s6825_s26 + $0x80] sm:$0x1] }
  0x5d   : > { %v2842_v9 = vrot.slane %v2840_v58, 4  ;;  %6026 = vmatmul.mubr.msk.bf16.gmra.mrb[12].mxu1 %vm685_vm3, %v5118_v53  ;;  %v2275_v14 = vsel %vm6850_vm2, %v2270_v1, %v2274_v45  ;;  %v453_v22 = vshrl.u32 %v7072_v62, 16  ;;  %v456_v27 = vshll.u32 %v7072_v62, 16 }
  0x5e   : > { %v450_v17 = vrot.slane %v448_v4, 5  ;;  %v5362_v29 = vcombine.low %v2265_v63, %v2275_v14  ;;  %v436_v31 = vrot.slane %v435_v6, 4  ;;  %v445_v32 = vor.u32 %v444_v7, %v440_v54  ;;  %v5391_v7 = vld [vmem:[%s6825_s26 + $0x24] sm:$0xe] }
  0x5f   : > { %v2841_v33 = vsel %vm7078_vm6, %v5405_v8, %v2840_v58  ;;  %v2844_v37 = vsel %vm7078_vm6, %v2842_v9, %v2843_v59  ;;  %v455_v38 = vrot.slane %v453_v22, 4  ;;  %v458_v40 = vrot.slane %v456_v27, 5  ;;  %v7135_v22 = vld [vmem:[%s6825_s26 + $0x84] sm:$0xf] }
  0x60   : > { %v462_v41 = vshll.u32 %v7085_v10, 16  ;;  %6170 = vmatmul.mubr.msk.bf16.gmra.mrb[12].mxu0 %vm685_vm3, %v5362_v29  ;;  %v441_v15 = vsel %vm6850_vm2, %v436_v31, %v440_v54  ;;  %v446_v58 = vrot.slane %v445_v32, 4  ;;  %v5425_v43 = vcombine.low %v2841_v33, %v2844_v37  ;;  %v7119_v54 = vld [vmem:[%s6825_s26 + $0x7c] sm:$0xf]  ;;  %v7142_v33 = vld [vmem:[%s6825_s26 + $0x88] sm:$0xf] }
  0x61   : > { %v466_v16 = vshrl.u32 %v7085_v10, 16  ;;  %v459_v44 = vor.u32 %v458_v40, %v455_v38  ;;  %v472_v45 = vshll.u32 %v226_v35, 16  ;;  %v5406_v46 = vrot.slane %v5390_v36, 9  ;;  %v228_v40 = vld [vmem:[%s6825_s26 + $0x8c] sm:$0x1] }
  0x62   : > { %v464_v59 = vrot.slane %v462_v41, 5  ;;  %v451_v48 = vsel %vm6850_vm2, %v446_v58, %v450_v17  ;;  %6193 = vmatprep.mubr.msk.bf16.mxu0 %vm685_vm3, %v5425_v43  ;;  %v2851_v52 = vsel %vm7078_vm6, %v6886_v25, %v2850_v23  ;;  %v477_v53 = vshrl.u32 %v7104_v42, 16 }
  0x63   : > { %v468_v49 = vrot.slane %v466_v16, 4  ;;  %v5119_v63 = vcombine.low %v441_v15, %v451_v48  ;;  %v460_v1 = vrot.slane %v459_v44, 4  ;;  %v474_v4 = vrot.slane %v472_v45, 5 }
  0x64   : > { %v2848_v6 = vsel %vm7078_vm6, %v5406_v46, %v2847_v18  ;;  %v479_v9 = vrot.slane %v477_v53, 4  ;;  %v480_v23 = vshll.u32 %v7104_v42, 16  ;;  %v486_v14 = vshll.u32 %v7119_v54, 16  ;;  %v6629_v18 = vld [vmem:[%s8557_s1 + $0x68] sm:$0xff]  }
  0x65   : > { %v469_v61 = vor.u32 %v468_v49, %v464_v59  ;;  %v5426_v8 = vcombine.low %v2848_v6, %v2851_v52  ;;  %6029 = vmatprep.mubr.msk.bf16.mxu1 %vm685_vm3, %v5119_v63  ;;  %v465_v25 = vsel %vm6850_vm2, %v460_v1, %v464_v59  ;;  %v490_v56 = vshrl.u32 %v7119_v54, 16  ;;  %v7160_v52 = vld [vmem:[%s6825_s26 + $0x90] sm:$0xf] }
  0x66   : > { %v496_v17 = vshll.u32 %v227_v50, 16  ;;  %v482_v29 = vrot.slane %v480_v23, 5  ;;  %v5407_v31 = vrot.slane %v5391_v7, 9  ;;  %v2854_v32 = vrot.slane %v6893_v39, 5  ;;  %v5392_v39 = vld [vmem:[%s6825_s26 + $0x30] sm:$0xe] }
  0x67   : > { %v470_v27 = vrot.slane %v469_v61, 4  ;;  %v488_v35 = vrot.slane %v486_v14, 5  ;;  %v492_v36 = vrot.slane %v490_v56, 4  ;;  %v2857_v38 = vrot.slane %v6902_v47, 5 }
  0x68   : > { %v498_v37 = vrot.slane %v496_v17, 5  ;;  %6194 = vmatmul.mubr.msk.bf16.vlgmr.msra.gmra.mrb[0].mxu0 %vm685_vm3, %v5426_v8  ;;  %v483_v15 = vor.u32 %v482_v29, %v479_v9  ;;  %v2855_v58 = vsel %vm7078_vm6, %v5407_v31, %v2854_v32  ;;  %v2856_v43 = vrot.slane %v2854_v32, 4  ;;  %v229_v9 = vld [vmem:[%s6825_s26 + $0x98] sm:$0x1]  ;;  %v5393_v32 = vld [vmem:[%s6825_s26 + $0x3c] sm:$0xe] }
  0x69   : > { %v475_v41 = vsel %vm6850_vm2, %v470_v27, %v474_v4  ;;  %6226 = vmatpush3.bf16.msra.mxu0 %v6932_v5  ;;  %v493_v44 = vor.u32 %v492_v36, %v488_v35  ;;  %v501_v47 = vshrl.u32 %v7135_v22, 16  ;;  %v504_v59 = vshll.u32 %v7135_v22, 16  ;;  %v7165_v5 = vld [vmem:[%s8557_s1 + $0x70] sm:$0xff]  }
  0x6a   : > { %v5120_v16 = vcombine.low %v465_v25, %v475_v41  ;;  %v484_v45 = vrot.slane %v483_v15, 4  ;;  %v2858_v46 = vsel %vm7078_vm6, %v2856_v43, %v2857_v38  ;;  %v510_v48 = vshll.u32 %v7142_v33, 16  ;;  %6227 = vmatprep.subr.bf16.mxu0 %v6629_v18  ;;  %v7169_v4 = vld [vmem:[%s6825_s26 + $0x94] sm:$0xf]  ;;  %v7192_v15 = vld [vmem:[%s6825_s26 + $0xa0] sm:$0xf] }
  0x6b   : > { %v514_v49 = vshrl.u32 %v7142_v33, 16  ;;  %v494_v50 = vrot.slane %v493_v44, 4  ;;  %v5427_v53 = vcombine.low %v2855_v58, %v2858_v46  ;;  %v503_v63 = vrot.slane %v501_v47, 4 }
  0x6c   : > { %6030 = vmatmul.mubr.msk.bf16.gmra.mrb[16].mxu1 %vm685_vm3, %v5120_v16  ;;  %v506_v1 = vrot.slane %v504_v59, 5  ;;  %v489_v6 = vsel %vm6850_vm2, %v484_v45, %v488_v35  ;;  %v512_v7 = vrot.slane %v510_v48, 5  ;;  %v520_v8 = vshll.u32 %v228_v40, 16  ;;  %v7185_v40 = vld [vmem:[%s6825_s26 + $0x9c] sm:$0xf] }
  0x6d   : > { %v516_v61 = vrot.slane %v514_v49, 4  ;;  %v499_v23 = vsel %vm6850_vm2, %v494_v50, %v498_v37  ;;  %6197 = vmatprep.mubr.msk.bf16.mxu0 %vm685_vm3, %v5427_v53  ;;  %v5408_v14 = vrot.slane %v5392_v39, 9  ;;  %v2861_v56 = vrot.slane %v6927_v26, 5  ;;  %6228 = vmatpush3.bf16.msra.mxu0 %v6629_v18  ;;  %v230_v53 = vld [vmem:[%s6825_s26 + $0xa4] sm:$0x1] }
  0x6e   : > { %v507_v25 = vor.u32 %v506_v1, %v503_v63  ;;  %v5121_v17 = vcombine.low %v489_v6, %v499_v23  ;;  %v522_v29 = vrot.slane %v520_v8, 5  ;;  %v2864_v31 = vrot.slane %v6938_v34, 5  ;;  %6261 = vmatprep.subr.bf16.mxu0 %v7165_v5  ;;  %v5394_v63 = vld [vmem:[%s6825_s26 + $0x48] sm:$0xe] }
  0x6f   : > { %v517_v27 = vor.u32 %v516_v61, %v512_v7  ;;  %v2862_v36 = vsel %vm7078_vm6, %v5408_v14, %v2861_v56  ;;  %v2863_v37 = vrot.slane %v2861_v56, 4  ;;  %v525_v38 = vshrl.u32 %v7160_v52, 16 }
  0x70   : > { %v508_v35 = vrot.slane %v507_v25, 4  ;;  %6033 = vmatprep.mubr.msk.bf16.mxu1 %vm685_vm3, %v5121_v17  ;;  %v528_v18 = vshll.u32 %v7160_v52, 16  ;;  %v534_v34 = vshll.u32 %v7169_v4, 16  ;;  %v538_v41 = vshrl.u32 %v7169_v4, 16 }
  0x71   : > { %v518_v26 = vrot.slane %v517_v27, 4  ;;  %v2865_v43 = vsel %vm7078_vm6, %v2863_v37, %v2864_v31  ;;  %v527_v39 = vrot.slane %v525_v38, 4  ;;  %v544_v16 = vshll.u32 %v229_v9, 16  ;;  %v7213_v27 = vld [vmem:[%s6825_s26 + $0xa8] sm:$0xf] }
  0x72   : > { %v513_v58 = vsel %vm6850_vm2, %v508_v35, %v512_v7  ;;  %v5428_v47 = vcombine.low %v2862_v36, %v2865_v43  ;;  %v530_v59 = vrot.slane %v528_v18, 5  ;;  %v536_v45 = vrot.slane %v534_v34, 5  ;;  %v7216_v35 = vld [vmem:[%s6825_s26 + $0xac] sm:$0xf] }
  0x73   : > { %v523_v44 = vsel %vm6850_vm2, %v518_v26, %v522_v29  ;;  %v540_v48 = vrot.slane %v538_v41, 4  ;;  %v546_v49 = vrot.slane %v544_v16, 5  ;;  %v5409_v50 = vrot.slane %v5393_v32, 9 }
  0x74   : > { %v5122_v46 = vcombine.low %v513_v58, %v523_v44  ;;  %6198 = vmatmul.mubr.msk.bf16.gmra.mrb[4].mxu0 %vm685_vm3, %v5428_v47  ;;  %v531_v1 = vor.u32 %v530_v59, %v527_v39  ;;  %v2868_v6 = vrot.slane %v6956_v12, 5  ;;  %v2871_v7 = vrot.slane %v6961_v20, 5  ;;  %v231_v47 = vld [vmem:[%s6825_s26 + $0xb0] sm:$0x1]  ;;  %v5395_v59 = vld [vmem:[%s6825_s26 + $0x54] sm:$0xe] }
  0x75   : > { %v549_v61 = vshrl.u32 %v7185_v40, 16  ;;  %v541_v8 = vor.u32 %v540_v48, %v536_v45  ;;  %v552_v9 = vshll.u32 %v7185_v40, 16  ;;  %v558_v23 = vshll.u32 %v7192_v15, 16 }
  0x76   : > { %6034 = vmatmul.mubr.msk.bf16.gmra.mrb[20].mxu1 %vm685_vm3, %v5122_v46  ;;  %v562_v25 = vshrl.u32 %v7192_v15, 16  ;;  %v532_v14 = vrot.slane %v531_v1, 4  ;;  %v2869_v56 = vsel %vm7078_vm6, %v5409_v50, %v2868_v6  ;;  %v2870_v17 = vrot.slane %v2868_v6, 4 }
  0x77   : > { %v551_v12 = vrot.slane %v549_v61, 4  ;;  %v542_v20 = vrot.slane %v541_v8, 4  ;;  %v554_v29 = vrot.slane %v552_v9, 5  ;;  %v560_v31 = vrot.slane %v558_v23, 5  ;;  %v7241_v61 = vld [vmem:[%s6825_s26 + $0xb4] sm:$0xf] }
  0x78   : > { %v564_v32 = vrot.slane %v562_v25, 4  ;;  %v537_v36 = vsel %vm6850_vm2, %v532_v14, %v536_v45  ;;  %v2872_v37 = vsel %vm7078_vm6, %v2870_v17, %v2871_v7  ;;  %v568_v38 = vshll.u32 %v230_v53, 16  ;;  %v7246_v14 = vld [vmem:[%s6825_s26 + $0xb8] sm:$0xf] }
  0x79   : > { %v5410_v26 = vrot.slane %v5394_v63, 9  ;;  %v547_v18 = vsel %vm6850_vm2, %v542_v20, %v546_v49  ;;  %v5429_v34 = vcombine.low %v2869_v56, %v2872_v37  ;;  %v555_v41 = vor.u32 %v554_v29, %v551_v12  ;;  %v232_v29 = vld [vmem:[%s6825_s26 + $0xbc] sm:$0x1] }
  0x7a   : > { %v565_v58 = vor.u32 %v564_v32, %v560_v31  ;;  %v5123_v43 = vcombine.low %v537_v36, %v547_v18  ;;  %v570_v39 = vrot.slane %v568_v38, 5  ;;  %v2875_v16 = vrot.slane %v6979_v0, 5  ;;  %v5396_v38 = vld [vmem:[%s6825_s26 + $0x60] sm:$0xe] }
  0x7b   : > { %v2878_v44 = vrot.slane %v6987_v13, 5  ;;  %6201 = vmatprep.mubr.msk.bf16.mxu0 %vm685_vm3, %v5429_v34  ;;  %v556_v45 = vrot.slane %v555_v41, 4  ;;  %v573_v48 = vshrl.u32 %v7213_v27, 16  ;;  %v576_v49 = vshll.u32 %v7213_v27, 16 }
  0x7c   : > { %v566_v46 = vrot.slane %v565_v58, 4  ;;  %6037 = vmatprep.mubr.msk.bf16.mxu1 %vm685_vm3, %v5123_v43  ;;  %v2876_v50 = vsel %vm7078_vm6, %v5410_v26, %v2875_v16  ;;  %v2877_v0 = vrot.slane %v2875_v16, 4  ;;  %v582_v13 = vshll.u32 %v7216_v35, 16  ;;  %v5328_v16 = vld [vmem:[%s6825_s26 + $0x70] sm:$0xf] }
  0x7d   : > { %v586_v53 = vshrl.u32 %v7216_v35, 16  ;;  %v561_v63 = vsel %vm6850_vm2, %v556_v45, %v560_v31  ;;  %v575_v6 = vrot.slane %v573_v48, 4  ;;  %v578_v7 = vrot.slane %v576_v49, 5 }
  0x7e   : > { %v571_v1 = vsel %vm6850_vm2, %v566_v46, %v570_v39  ;;  %v2879_v9 = vsel %vm7078_vm6, %v2877_v0, %v2878_v44  ;;  %v584_v23 = vrot.slane %v582_v13, 5  ;;  %v592_v12 = vshll.u32 %v231_v47, 16  ;;  %v5397_v46 = vld [vmem:[%s6825_s26 + $0x6c] sm:$0xe] }
  0x7f   : > { %v5124_v8 = vcombine.low %v561_v63, %v571_v1  ;;  %v588_v25 = vrot.slane %v586_v53, 4  ;;  %v5430_v56 = vcombine.low %v2876_v50, %v2879_v9  ;;  %v579_v17 = vor.u32 %v578_v7, %v575_v6 }
  0x80   : > { %v5411_v20 = vrot.slane %v5395_v59, 9  ;;  %v2882_v32 = vrot.slane %v7010_v55, 5  ;;  %v2885_v36 = vrot.slane %v7016_v3, 5  ;;  %v597_v37 = vshrl.u32 %v7241_v61, 16  ;;  %v5329_v3 = vld [vmem:[%s6825_s26 + $0x74] sm:$0x1] }
  0x81   : > { %6038 = vmatmul.mubr.msk.bf16.gmra.mrb[24].mxu1 %vm685_vm3, %v5124_v8  ;;  %v589_v31 = vor.u32 %v588_v25, %v584_v23  ;;  %6202 = vmatmul.mubr.msk.bf16.gmra.mrb[8].mxu0 %vm685_vm3, %v5430_v56  ;;  %v580_v26 = vrot.slane %v579_v17, 4  ;;  %v594_v18 = vrot.slane %v592_v12, 5  ;;  %v600_v34 = vshll.u32 %v7241_v61, 16  ;;  %v5398_v12 = vld [vmem:[%s6825_s26 + $0x78] sm:$0xe] }
  0x82   : > { %v606_v41 = vshll.u32 %v7246_v14, 16  ;;  %v2883_v43 = vsel %vm7078_vm6, %v5411_v20, %v2882_v32  ;;  %v2884_v39 = vrot.slane %v2882_v32, 4  ;;  %v599_v55 = vrot.slane %v597_v37, 4 }
  0x83   : > { %v590_v58 = vrot.slane %v589_v31, 4  ;;  %v585_v44 = vsel %vm6850_vm2, %v580_v26, %v584_v23  ;;  %v602_v47 = vrot.slane %v600_v34, 5  ;;  %v610_v45 = vshrl.u32 %v7246_v14, 16  ;;  %v7287_v26 = vld [vmem:[%s6825_s26 + $0x4] sm:$0xf] }
  0x84   : > { %v608_v59 = vrot.slane %v606_v41, 5  ;;  %v2886_v49 = vsel %vm7078_vm6, %v2884_v39, %v2885_v36  ;;  %v616_v50 = vshll.u32 %v232_v29, 16  ;;  %v5412_v0 = vrot.slane %v5396_v38, 9  ;;  %v7281_v36 = vld [vmem:[%s6825_s26 + $0x7c] sm:$0xf] }
  0x85   : > { %v595_v48 = vsel %vm6850_vm2, %v590_v58, %v594_v18  ;;  %v5431_v53 = vcombine.low %v2883_v43, %v2886_v49  ;;  %v603_v63 = vor.u32 %v602_v47, %v599_v55  ;;  %v612_v1 = vrot.slane %v610_v45, 4  ;;  %v6684_v38 = vld [vmem:[%s6825_s26] sm:$0xf]  ;;  %v5399_v41 = vld [vmem:[%s6825_s26 + $0x84] sm:$0xe] }
  0x86   : > { %v5125_v13 = vcombine.low %v585_v44, %v595_v48  ;;  %v618_v6 = vrot.slane %v616_v50, 5  ;;  %v2889_v7 = vrot.slane %v7040_v51, 5  ;;  %v2892_v8 = vrot.slane %v7044_v57, 5  ;;  %v7291_v34 = vld [vmem:[%s6825_s26 + $0x80] sm:$0x1] }
  0x87   : > { %v5413_v9 = vrot.slane %v5397_v46, 9  ;;  %6205 = vmatprep.mubr.msk.bf16.mxu0 %vm685_vm3, %v5431_v53  ;;  %v604_v23 = vrot.slane %v603_v63, 4  ;;  %v613_v25 = vor.u32 %v612_v1, %v608_v59  ;;  %v2896_v56 = vrot.slane %v5328_v16, 5  ;;  %v5334_v16 = vld [vmem:[%s6825_s26 + $0x88] sm:$0xf] }
  0x88   : > { %6041 = vmatprep.mubr.msk.bf16.mxu1 %vm685_vm3, %v5125_v13  ;;  %v2899_v17 = vrot.slane %v5329_v3, 5  ;;  %v2890_v51 = vsel %vm7078_vm6, %v5412_v0, %v2889_v7  ;;  %v2891_v20 = vrot.slane %v2889_v7, 4  ;;  %v5145_v18 = vcombine.low %v6684_v38, %v7287_v26  ;;  %v5335_v3 = vld [vmem:[%s6825_s26 + $0x8c] sm:$0x1]  ;;  %v5338_v0 = vld [vmem:[%s6825_s26 + $0x98] sm:$0x1] }
  0x89   : > { %v609_v57 = vsel %vm6850_vm2, %v604_v23, %v608_v59  ;;  %v614_v29 = vrot.slane %v613_v25, 4  ;;  %v2897_v31 = vsel %vm7078_vm6, %v5413_v9, %v2896_v56  ;;  %v2898_v32 = vrot.slane %v2896_v56, 4  ;;  %v5337_v59 = vld [vmem:[%s6825_s26 + $0x94] sm:$0xf]  ;;  %v5400_v13 = vld [vmem:[%s6825_s26 + $0x90] sm:$0xe] }
  0x8a   : > { %v2893_v37 = vsel %vm7078_vm6, %v2891_v20, %v2892_v8  ;;  %v5414_v55 = vrot.slane %v5398_v12, 9  ;;  %v2903_v45 = vrot.slane %v7281_v36, 5  ;;  %v2906_v46 = vrot.slane %v7291_v34, 5  ;;  %v5341_v9 = vld [vmem:[%s6825_s26 + $0xa4] sm:$0x1] }
  0x8b   : > { %v619_v58 = vsel %vm6850_vm2, %v614_v29, %v618_v6  ;;  %v5432_v43 = vcombine.low %v2890_v51, %v2893_v37  ;;  %v2900_v39 = vsel %vm7078_vm6, %v2898_v32, %v2899_v17  ;;  %v5415_v48 = vrot.slane %v5399_v41, 9  ;;  %v5340_v6 = vld [vmem:[%s6825_s26 + $0xa0] sm:$0xf]  ;;  %v5401_v23 = vld [vmem:[%s6825_s26 + $0x9c] sm:$0xe] }
  0x8c   : > { %v5126_v44 = vcombine.low %v609_v57, %v619_v58  ;;  %v5433_v47 = vcombine.low %v2897_v31, %v2900_v39  ;;  %v2910_v49 = vrot.slane %v5334_v16, 5  ;;  %v2913_v50 = vrot.slane %v5335_v3, 5  ;;  %v6686_v25 = vld [vmem:[%s6825_s26 + $0xc] sm:$0xf]  ;;  %v7318_v56 = vld [vmem:[%s6825_s26 + $0x10] sm:$0xf] }
  0x8d   : > { %6206 = vmatmul.mubr.msk.bf16.gmra.mrb[12].mxu0 %vm685_vm3, %v5432_v43  ;;  %v2904_v53 = vsel %vm7078_vm6, %v5414_v55, %v2903_v45  ;;  %v2905_v63 = vrot.slane %v2903_v45, 4  ;;  %v2917_v1 = vrot.slane %v5337_v59, 5  ;;  %v5146_v17 = vcombine.low %v6686_v25, %v7318_v56  ;;  %v6688_v37 = vld [vmem:[%s6825_s26 + $0x18] sm:$0xf]  ;;  %v7327_v38 = vld [vmem:[%s6825_s26 + $0x1c] sm:$0xf] }
  0x8e   : > { %6042 = vmatmul.mubr.msk.bf16.gmra.mrb[28].mxu1 %vm685_vm3, %v5126_v44  ;;  %6209 = vmatprep.mubr.msk.bf16.mxu0 %vm685_vm3, %v5433_v47  ;;  %v2911_v7 = vsel %vm7078_vm6, %v5415_v48, %v2910_v49  ;;  %v2912_v8 = vrot.slane %v2910_v49, 4  ;;  %v5416_v51 = vrot.slane %v5400_v13, 9  ;;  %v2920_v20 = vrot.slane %v5338_v0, 5  ;;  %v5343_v39 = vld [vmem:[%s6825_s26 + $0xac] sm:$0xf]  ;;  %v6690_v45 = vld [vmem:[%s8557_s1 + $0x20] sm:$0xff]  }
  0x8f   : > { %6049 = vmatprep.mubr.msk.bf16.mxu1 %vm685_vm3, %v5145_v18  ;;  %v2907_v12 = vsel %vm7078_vm6, %v2905_v63, %v2906_v46  ;;  %v2919_v31 = vrot.slane %v2917_v1, 4  ;;  %v2924_v32 = vrot.slane %v5340_v6, 5  ;;  %v5147_v18 = vcombine.low %v6688_v37, %v7327_v38  ;;  %v5346_v16 = vld [vmem:[%s6825_s26 + $0xb8] sm:$0xf]  ;;  %v6638_v3 = vld [vmem:[%s8557_s1 + $0x28] sm:$0xff]   ;;  %v7357_v63 = vld [vmem:[%s8557_s1 + $0x30] sm:$0xff]  }
  0x90   : > { %v5434_v57 = vcombine.low %v2904_v53, %v2907_v12  ;;  %v2914_v29 = vsel %vm7078_vm6, %v2912_v8, %v2913_v50  ;;  %v5417_v58 = vrot.slane %v5401_v23, 9  ;;  %v2927_v43 = vrot.slane %v5341_v9, 5  ;;  %v5344_v49 = vld [vmem:[%s6825_s26 + $0xb0] sm:$0x1]  ;;  %v5402_v50 = vld [vmem:[%s6825_s26 + $0xa8] sm:$0xe] }
  0x91   : > { %v5435_v41 = vcombine.low %v2911_v7, %v2914_v29  ;;  %v2926_v55 = vrot.slane %v2924_v32, 4  ;;  %v2918_v44 = vsel %vm7078_vm6, %v5416_v51, %v2917_v1  ;;  %v2921_v47 = vsel %vm7078_vm6, %v2919_v31, %v2920_v20  ;;  %v5347_v13 = vld [vmem:[%s6825_s26 + $0xbc] sm:$0x1]  ;;  %v5403_v53 = vld [vmem:[%s6825_s26 + $0xb4] sm:$0xe] }
  0x92   : > { %v2931_v59 = vrot.slane %v5343_v39, 5  ;;  %v2925_v46 = vsel %vm7078_vm6, %v5417_v58, %v2924_v32  ;;  %v2938_v0 = vrot.slane %v5346_v16, 5  ;;  %v6691_v1 = vld [vmem:[%s6825_s26 + $0x24] sm:$0xf]  ;;  %v7361_v6 = vld [vmem:[%s6825_s26 + $0x28] sm:$0xf]  ;;  %v5436_v8 = vcombine.low %v2918_v44, %v2921_v47 }
  0x93   : > { %v2928_v48 = vsel %vm7078_vm6, %v2926_v55, %v2927_v43  ;;  %v5148_v7 = vcombine.low %v6691_v1, %v7361_v6  ;;  %v5418_v23 = vrot.slane %v5402_v50, 9  ;;  %v6693_v12 = vld [vmem:[%s6825_s26 + $0x30] sm:$0xf]  ;;  %v7366_v51 = vld [vmem:[%s6825_s26 + $0x34] sm:$0xf]  ;;  %v2941_v31 = vrot.slane %v5347_v13, 5 }
  0x94   : > { %v5437_v9 = vcombine.low %v2925_v46, %v2928_v48  ;;  %v2933_v25 = vrot.slane %v2931_v59, 4  ;;  %v5149_v20 = vcombine.low %v6693_v12, %v7366_v51  ;;  %v2940_v29 = vrot.slane %v2938_v0, 4  ;;  %v5349_v32 = vld [vmem:[%s6825_s26 + $0xc4] sm:$0xf]  ;;  %v5350_v55 = vld [vmem:[%s6825_s26 + $0xc8] sm:$0x1] }
  0x95   : > { %6210 = vmatmul.mubr.msk.bf16.gmra.mrb[16].mxu0 %vm685_vm3, %v5434_v57  ;;  %v5419_v57 = vrot.slane %v5403_v53, 9  ;;  %v2932_v37 = vsel %vm7078_vm6, %v5418_v23, %v2931_v59  ;;  %v2945_v58 = vrot.slane %v5349_v32, 5  ;;  %v6695_v44 = vld [vmem:[%s6825_s26 + $0x3c] sm:$0xf]  ;;  %v7387_v47 = vld [vmem:[%s6825_s26 + $0x40] sm:$0xf]  ;;  %v5152_v53 = vcombine.low %v7020_v11, %v7026_v24 }
  0x96   : > { %6050 = vmatmul.mubr.msk.bf16.vlgmr.msra.gmra.mrb[0].mxu1 %vm685_vm3, %v5146_v17  ;;  %6213 = vmatprep.mubr.msk.bf16.mxu0 %vm685_vm3, %v5435_v41  ;;  %v2934_v17 = vrot.slane %v5344_v49, 5  ;;  %v5404_v41 = vld [vmem:[%s6825_s26 + $0xc0] sm:$0xe]  ;;  %v2942_v39 = vsel %vm7078_vm6, %v2940_v29, %v2941_v31  ;;  %v5150_v59 = vcombine.low %v6695_v44, %v7387_v47  ;;  %v2948_v48 = vrot.slane %v5350_v55, 5  ;;  %v6639_v1 = vld [vmem:[%s6825_s26 + $0x18] sm:$0xff]  }
  0x97   : > { %6082 = vmatpush3.bf16.msra.mxu1 %v6690_v45  ;;  %6053 = vmatprep.mubr.msk.bf16.mxu1 %vm685_vm3, %v5147_v18  ;;  %v2939_v43 = vsel %vm7078_vm6, %v5419_v57, %v2938_v0  ;;  %v2947_v46 = vrot.slane %v2945_v58, 4  ;;  %v5151_v49 = vcombine.low %v6991_v19, %v6994_v28  ;;  %v2310_v13 = vshll.u32 %v7281_v36, 16  ;;  %v1196_v11 = vld [vmem:[%s6825_s26] sm:$0xe]  ;;  %v1198_v24 = vld [vmem:[%s6825_s26 + $0x18] sm:$0xe] }
  0x98   : > { %6083 = vmatprep.subr.bf16.mxu1 %v6638_v3  ;;  %v2935_v18 = vsel %vm7078_vm6, %v2933_v25, %v2934_v17  ;;  %v5439_v45 = vcombine.low %v2939_v43, %v2942_v39  ;;  %v2314_v19 = vshrl.u32 %v7281_v36, 16  ;;  %v1197_v25 = vld [vmem:[%s6825_s26 + $0xc] sm:$0xe]  ;;  %v6697_v17 = vld [vmem:[%s6825_s26 + $0x14] sm:$0x1]  ;;  %v2320_v31 = vshll.u32 %v7291_v34, 16 }
  0x99   : > { %v5438_v16 = vcombine.low %v2932_v37, %v2935_v18  ;;  %v2949_v0 = vsel %vm7078_vm6, %v2947_v46, %v2948_v48  ;;  %v1259_v12 = vrot.slane %v6697_v17, 5  ;;  %v1270_v32 = vrot.slane %v7361_v6, 5  ;;  %v6642_v18 = vld [vmem:[%s6825_s26 + $0x24] sm:$0xff]   ;;  %v6644_v43 = vld [vmem:[%s6825_s26 + $0x30] sm:$0xff]   ;;  %v6699_v55 = vld [vmem:[%s6825_s26 + $0x20] sm:$0x1] }
  0x9a   : > { %v2316_v23 = vrot.slane %v2314_v19, 4  ;;  %v5154_v37 = vcombine.low %v7072_v62, %v7085_v10  ;;  %v5157_v34 = vcombine.low %v7160_v52, %v7169_v4  ;;  %v5179_v39 = vrot.slane %v1196_v11, 9  ;;  %v1200_v62 = vld [vmem:[%s6825_s26 + $0x30] sm:$0xe]  ;;  %v6657_v44 = vld [vmem:[%s8557_s1 + $0x78] sm:$0xff]  }
  0x9b   : > { %6084 = vmatpush3.bf16.msra.mxu1 %v6638_v3  ;;  %v5420_v3 = vrot.slane %v5404_v41, 9  ;;  %v1199_v41 = vld [vmem:[%s6825_s26 + $0x24] sm:$0xe]  ;;  %v5181_v6 = vrot.slane %v1198_v24, 9  ;;  %v6700_v46 = vld [vmem:[%s6825_s26 + $0x2c] sm:$0x1] }
  0x9c   : > { %6117 = vmatprep.subr.bf16.mxu1 %v7357_v63  ;;  %v1273_v48 = vrot.slane %v6700_v46, 5  ;;  %v5529_v24 = vld [vmem:[%s6825_s26 + $0x18] sm:$0xf] }
  0x9d   : > { %6214 = vmatmul.mubr.msk.bf16.gmra.mrb[20].mxu0 %vm685_vm3, %v5436_v8  ;;  %v2946_v50 = vsel %vm7078_vm6, %v5420_v3, %v2945_v58  ;;  %v5153_v8 = vcombine.low %v7047_v60, %v7057_v21  ;;  %v1249_v60 = vrot.slane %v7287_v26, 5  ;;  %v5180_v21 = vrot.slane %v1197_v25, 9  ;;  %v5537_v3 = vld [vmem:[%s6825_s26 + $0x38] sm:$0x1] }
  0x9e   : > { %6054 = vmatmul.mubr.msk.bf16.gmra.mrb[4].mxu1 %vm685_vm3, %v5148_v7  ;;  %6217 = vmatprep.mubr.msk.bf16.mxu0 %vm685_vm3, %v5437_v9  ;;  %v5440_v28 = vcombine.low %v2946_v50, %v2949_v0  ;;  %v1256_v7 = vrot.slane %v7318_v56, 5  ;;  %v7408_v9 = vrot.slane %v2310_v13, 5  ;;  %v1263_v56 = vrot.slane %v7327_v38, 5  ;;  %v6701_v13 = vld [vmem:[%s6825_s26 + $0x38] sm:$0x1] }
  0x9f   : > { %6057 = vmatprep.mubr.msk.bf16.mxu1 %vm685_vm3, %v5149_v20  ;;  %v6698_v20 = vld [vmem:[%s6825_s26 + $0x8] sm:$0x1]  ;;  %v5155_v26 = vcombine.low %v7104_v42, %v7119_v54  ;;  %v5156_v38 = vcombine.low %v7135_v22, %v7142_v33  ;;  %v1277_v58 = vrot.slane %v7366_v51, 5  ;;  %v1251_v10 = vrot.slane %v1249_v60, 4 }
  0xa0   : > { %8575 = vst [vmem:[#allocation2_spill] sm:$0xff] %v7408_v9  ;;  %v1258_v36 = vrot.slane %v1256_v7, 4  ;;  %v1252_v57 = vrot.slane %v6698_v20, 5  ;;  %v2317_v29 = vor.u32 %v2316_v23, %v7408_v9  ;;  %v7440_v42 = vsel %vm7078_vm6, %v5180_v21, %v1256_v7  ;;  %v7472_v23 = vld [vmem:[%s6825_s26 + $0x48] sm:$0xe] }
  0xa1   : > { %v1265_v51 = vrot.slane %v1263_v56, 4  ;;  %v5183_v50 = vrot.slane %v1200_v62, 9  ;;  %v1279_v0 = vrot.slane %v1277_v58, 4  ;;  %v1280_v19 = vrot.slane %v6701_v13, 5  ;;  %v6648_v21 = vld [vmem:[%s6825_s26 + $0x48] sm:$0xff]  }
  0xa2   : > { %v7444_v54 = vsel %vm7078_vm6, %v1258_v36, %v1259_v12  ;;  %v7467_v7 = vsel %vm7078_vm6, %v5179_v39, %v1249_v60  ;;  %v7474_v25 = vrot.slane %v2317_v29, 4  ;;  %v7481_v17 = vsel %vm7078_vm6, %v1251_v10, %v1252_v57  ;;  %v7495_v60 = vld [vmem:[%s8557_s1 + $0x80] sm:$0xff]   ;;  %v6702_v57 = vld [vmem:[%s6825_s26 + $0x4c] sm:$0xf]  ;;  %v5533_v13 = vld [vmem:[%s6825_s26 + $0x28] sm:$0xf] }
  0xa3   : > { %v7485_v12 = vsel %vm7078_vm6, %v5181_v6, %v1263_v56  ;;  %v1284_v20 = vrot.slane %v7387_v47, 5  ;;  %v1291_v29 = vrot.slane %v6702_v57, 5  ;;  %v7523_v39 = vld [vmem:[%s6825_s26 + $0x60] sm:$0xe]  ;;  %v5531_v47 = vld [vmem:[%s6825_s26 + $0x20] sm:$0x1] }
  0xa4   : > { %8577 = vst [vmem:[#allocation4_spill] sm:$0xff] %v7474_v25  ;;  %v5185_v10 = vrot.slane %v7472_v23, 9  ;;  %v5536_v62 = vld [vmem:[%s6825_s26 + $0x34] sm:$0xf] }
  0xa5   : > { %6218 = vmatmul.mubr.msk.bf16.gmra.mrb[24].mxu0 %vm685_vm3, %v5438_v16  ;;  %v1266_v16 = vrot.slane %v6699_v55, 5  ;;  %v3676_v55 = vshrl.u32 %v5529_v24, 16  ;;  %v1286_v46 = vrot.slane %v1284_v20, 4  ;;  %v3733_v6 = vshll.u32 %v5536_v62, 16  ;;  %v6710_v9 = vld [vmem:[%s6825_s26 + $0x74] sm:$0x1] }
  0xa6   : > { %6058 = vmatmul.mubr.msk.bf16.gmra.mrb[8].mxu1 %vm685_vm3, %v5150_v59  ;;  %6221 = vmatprep.mubr.msk.bf16.mxu0 %vm685_vm3, %v5439_v45  ;;  %v5182_v59 = vrot.slane %v1199_v41, 9  ;;  %v1272_v45 = vrot.slane %v1270_v32, 4  ;;  %v6703_v41 = vld [vmem:[%s6825_s26 + $0x44] sm:$0x1]  ;;  %v7566_v33 = vsel %vm7078_vm6, %v5185_v10, %v1291_v29  ;;  %v3709_v10 = vshll.u32 %v5533_v13, 16 }
  0xa7   : > { %6061 = vmatprep.mubr.msk.bf16.mxu1 %vm685_vm3, %v5151_v49  ;;  %v7489_v11 = vsel %vm7078_vm6, %v1265_v51, %v1266_v16  ;;  %v3679_v16 = vshll.u32 %v5529_v24, 16  ;;  %v7543_v24 = vld [vmem:[%s6825_s26 + $0x5c] sm:$0x1] }
  0xa8   : > { %v7500_v36 = vsel %vm7078_vm6, %v5182_v59, %v1270_v32  ;;  %v7504_v56 = vsel %vm7078_vm6, %v1272_v45, %v1273_v48  ;;  %v5532_v45 = vld [vmem:[%s6825_s26 + $0x24] sm:$0xf]  ;;  %v1293_v48 = vrot.slane %v1291_v29, 4  ;;  %v7589_v25 = vrot.slane %v3709_v10, 5 }
  0xa9   : > { %v3700_v4 = vshrl.u32 %v5532_v45, 16 }
  0xab   : > { %v3702_v49 = vrot.slane %v3700_v4, 4  ;;  %v6654_v4 = vld [vmem:[%s6825_s26 + $0x6c] sm:$0xff]  }
  0xad   : > { %6222 = vmatmul.mubr.msk.bf16.gmra.mrb[28].mxu0 %vm685_vm3, %v5440_v28  ;;  %v7457_v28 = vld [vmem:[%s6825_s26 + $0x3c] sm:$0xe] }
  0xae   : > { %6062 = vmatmul.mubr.msk.bf16.gmra.mrb[12].mxu1 %vm685_vm3, %v5152_v53  ;;  %6229 = vmatprep.mubr.msk.bf16.mxu0 %vm685_vm3, %v6639_v1  ;;  %v7459_v53 = vrot.slane %v2320_v31, 5  ;;  %v7509_v31 = vld [vmem:[%s6825_s26 + $0x54] sm:$0xe]  ;;  %v5184_v32 = vrot.slane %v7457_v28, 9  ;;  %v6705_v28 = vld [vmem:[%s6825_s26 + $0x58] sm:$0xf] }
  0xaf   : > { %6065 = vmatprep.mubr.msk.bf16.mxu1 %vm685_vm3, %v5153_v8  ;;  %v1298_v23 = vrot.slane %v6705_v28, 5  ;;  %v3681_v28 = vrot.slane %v3679_v16, 5  ;;  %v6708_v16 = vld [vmem:[%s6825_s26 + $0x70] sm:$0xf]  ;;  %v3737_v1 = vshrl.u32 %v5536_v62, 16 }
  0xb0   : > { %8576 = vst [vmem:[#allocation3_spill] sm:$0xff] %v7459_v53  ;;  %v7562_v22 = vsel %vm7078_vm6, %v5184_v32, %v1284_v20  ;;  %v1205_v32 = vld [vmem:[%s6825_s26 + $0x6c] sm:$0xe]  ;;  %v1312_v29 = vrot.slane %v6708_v16, 5 }
  0xb1   : > { %v1300_v20 = vrot.slane %v1298_v23, 4  ;;  %v5188_v57 = vrot.slane %v1205_v32, 9 }
  0xb5   : > { %6230 = vmatmul.mubr.msk.bf16.vlgmr.msra.gmra.mrb[0].mxu0 %vm685_vm3, %v6642_v18  ;;  %v7514_v18 = vsel %vm7078_vm6, %v5183_v50, %v1277_v58  ;;  %v6704_v50 = vld [vmem:[%s6825_s26 + $0x50] sm:$0x1] }
  0xb6   : > { %6066 = vmatmul.mubr.msk.bf16.gmra.mrb[16].mxu1 %vm685_vm3, %v5154_v37  ;;  %6262 = vmatpush3.bf16.msra.mxu0 %v7165_v5  ;;  %v6646_v5 = vld [vmem:[%s6825_s26 + $0x3c] sm:$0xff]  }
  0xb7   : > { %6069 = vmatprep.mubr.msk.bf16.mxu1 %vm685_vm3, %v5155_v26  ;;  %6233 = vmatprep.mubr.msk.bf16.mxu0 %vm685_vm3, %v6644_v43  ;;  %v5530_v37 = vld [vmem:[%s6825_s26 + $0x1c] sm:$0xf]  ;;  %v7518_v26 = vsel %vm7078_vm6, %v1279_v0, %v1280_v19  ;;  %v1287_v43 = vrot.slane %v6703_v41, 5  ;;  %v1294_v0 = vrot.slane %v6704_v50, 5  ;;  %v5186_v19 = vrot.slane %v7509_v31, 9 }
  0xb8   : > { %6263 = vmatprep.subr.bf16.mxu0 %v6657_v44  ;;  %v3685_v51 = vshll.u32 %v5530_v37, 16  ;;  %v3689_v59 = vshrl.u32 %v5530_v37, 16  ;;  %v5187_v37 = vrot.slane %v7523_v39, 9  ;;  %v5535_v41 = vld [vmem:[%s6825_s26 + $0x30] sm:$0xf]  ;;  %v3678_v50 = vrot.slane %v3676_v55, 4 }
  0xb9   : > { %v6650_v39 = vld [vmem:[%s6825_s26 + $0x54] sm:$0xff]   ;;  %v7573_v55 = vsel %vm7078_vm6, %v1286_v46, %v1287_v43  ;;  %v7577_v52 = vsel %vm7078_vm6, %v1293_v48, %v1294_v0  ;;  %v3724_v43 = vshrl.u32 %v5535_v41, 16  ;;  %v3727_v46 = vshll.u32 %v5535_v41, 16  ;;  %v5534_v0 = vld [vmem:[%s6825_s26 + $0x2c] sm:$0x1] }
  0xba   : > { %6264 = vmatpush3.bf16.msra.mxu0 %v6657_v44  ;;  %v3695_v44 = vshll.u32 %v5531_v47, 16  ;;  %v6652_v47 = vld [vmem:[%s6825_s26 + $0x60] sm:$0xff]   ;;  %v3682_v8 = vor.u32 %v3681_v28, %v3678_v50  ;;  %v8578_v50 = vcombine.low %v7185_v40, %v7192_v15  ;;  %v3719_v32 = vshll.u32 %v5534_v0, 16 }
  0xbb   : > { %6297 = vmatprep.subr.bf16.mxu0 %v7495_v60  ;;  %v3729_v28 = vrot.slane %v3727_v46, 5  ;;  %v6712_v46 = vld [vmem:[%s6825_s26 + $0x88] sm:$0xf] }
  0xbc   : > { %v3683_v40 = vrot.slane %v3682_v8, 4  ;;  %v1206_v8 = vld [vmem:[%s6825_s26 + $0x78] sm:$0xe]  ;;  %v3721_v0 = vrot.slane %v3719_v32, 5 }
  0xbd   : > { %6234 = vmatmul.mubr.msk.bf16.gmra.mrb[4].mxu0 %vm685_vm3, %v6646_v5  ;;  %v6707_v5 = vld [vmem:[%s6825_s26 + $0x64] sm:$0xf] }
  0xbe   : > { %6070 = vmatmul.mubr.msk.bf16.gmra.mrb[20].mxu1 %vm685_vm3, %v5156_v38  ;;  %6237 = vmatprep.mubr.msk.bf16.mxu0 %vm685_vm3, %v6648_v21  ;;  %v1305_v31 = vrot.slane %v6707_v5, 5  ;;  %v7568_v38 = vrot.slane %v3685_v51, 5  ;;  %v3691_v21 = vrot.slane %v3689_v59, 4  ;;  %v3713_v51 = vshrl.u32 %v5533_v13, 16  ;;  %v6709_v5 = vld [vmem:[%s6825_s26 + $0x68] sm:$0x1] }
  0xbf   : > { %6073 = vmatprep.mubr.msk.bf16.mxu1 %vm685_vm3, %v5157_v34  ;;  %v3703_v34 = vshll.u32 %v5532_v45, 16  ;;  %v1308_v58 = vrot.slane %v6709_v5, 5  ;;  %v7584_v45 = vrot.slane %v3695_v44, 5  ;;  %v1314_v13 = vrot.slane %v1312_v29, 4 }
  0xc0   : > { %v1307_v59 = vrot.slane %v1305_v31, 4  ;;  %v3692_v48 = vor.u32 %v3691_v21, %v7568_v38  ;;  %v1315_v5 = vrot.slane %v6710_v9, 5  ;;  %v3715_v41 = vrot.slane %v3713_v51, 4 }
  0xc1   : > { %v3705_v16 = vrot.slane %v3703_v34, 5  ;;  %v7600_v44 = vsel %vm7078_vm6, %v5186_v19, %v1298_v23  ;;  %v3726_v9 = vrot.slane %v3724_v43, 4  ;;  %v7606_v21 = vrot.slane %v3733_v6, 5  ;;  %v6711_v6 = vld [vmem:[%s6825_s26 + $0x7c] sm:$0xf] }
  0xc2   : > { %v3693_v15 = vrot.slane %v3692_v48, 4  ;;  %v7613_v23 = vsel %vm7078_vm6, %v5187_v37, %v1305_v31  ;;  %v1319_v10 = vrot.slane %v6711_v6, 5  ;;  %v3743_v51 = vshll.u32 %v5537_v3, 16  ;;  %v6656_v43 = vld [vmem:[%s6825_s26 + $0x78] sm:$0xff]  }
  0xc3   : > { %v3706_v34 = vor.u32 %v3705_v16, %v3702_v49  ;;  %v7627_v49 = vsel %vm7078_vm6, %v1307_v59, %v1308_v58  ;;  %v7635_v37 = vsel %vm7078_vm6, %v1314_v13, %v1315_v5  ;;  %v3730_v31 = vor.u32 %v3729_v28, %v3726_v9  ;;  %v6713_v13 = vld [vmem:[%s6825_s26 + $0x80] sm:$0x1]  ;;  %v1209_v6 = vld [vmem:[%s6825_s26 + $0x9c] sm:$0xe] }
  0xc4   : > { %v3688_v3 = vsel %vm6850_vm2, %v3683_v40, %v7568_v38  ;;  %v3698_v58 = vsel %vm6850_vm2, %v3693_v15, %v7584_v45  ;;  %v1326_v48 = vrot.slane %v6712_v46, 5  ;;  %v5189_v16 = vrot.slane %v1206_v8, 9  ;;  %v6714_v40 = vld [vmem:[%s6825_s26 + $0x8c] sm:$0x1] }
  0xc5   : > { %6238 = vmatmul.mubr.msk.bf16.gmra.mrb[8].mxu0 %vm685_vm3, %v6650_v39  ;;  %v8579_v39 = vcombine.low %v7213_v27, %v7216_v35  ;;  %v8580_v27 = vrot.slane %v7543_v24, 5  ;;  %v7631_v24 = vsel %vm7078_vm6, %v5188_v57, %v1312_v29  ;;  %v5538_v57 = vld [vmem:[%s6825_s26 + $0x3c] sm:$0xf]  ;;  %v3707_v29 = vrot.slane %v3706_v34, 4 }
  0xc6   : > { %6074 = vmatmul.mubr.msk.bf16.gmra.mrb[24].mxu1 %vm685_vm3, %v8578_v50  ;;  %6241 = vmatprep.mubr.msk.bf16.mxu0 %vm685_vm3, %v6652_v47  ;;  %v3739_v47 = vrot.slane %v3737_v1, 4  ;;  %v3716_v1 = vor.u32 %v3715_v41, %v7589_v25  ;;  %v1322_v5 = vrot.slane %v6713_v13, 5  ;;  %v7649_v41 = vld [vmem:[%s6825_s26 + $0x40] sm:$0xf]  ;;  %v1321_v50 = vrot.slane %v1319_v10, 4 }
  0xc7   : > { %6077 = vmatprep.mubr.msk.bf16.mxu1 %vm685_vm3, %v8579_v39  ;;  %v7619_v35 = vsel %vm7078_vm6, %v1300_v20, %v8580_v27  ;;  %v1207_v20 = vld [vmem:[%s6825_s26 + $0x84] sm:$0xe]  ;;  %8581 = vst [vmem:[#allocation5_spill] sm:$0xff] %v7649_v41  ;;  %v3745_v9 = vrot.slane %v3743_v51, 5  ;;  %v8582_v28 = vcombine.low %v7241_v61, %v7246_v14  ;;  %v3731_v39 = vrot.slane %v3730_v31, 4  ;;  %v6659_v51 = vld [vmem:[%s6825_s26 + $0x90] sm:$0xff]  }
  0xc8   : > { %v3740_v59 = vor.u32 %v3739_v47, %v7606_v21  ;;  %v3717_v38 = vrot.slane %v3716_v1, 4  ;;  %v5190_v45 = vrot.slane %v1207_v20, 9  ;;  %v1329_v15 = vrot.slane %v6714_v40, 5  ;;  %v6658_v1 = vld [vmem:[%s6825_s26 + $0x84] sm:$0xff]  }
  0xc9   : > { %v3748_v47 = vshrl.u32 %v5538_v57, 16  ;;  %v3751_v34 = vshll.u32 %v5538_v57, 16  ;;  %v1328_v27 = vrot.slane %v1326_v48, 4  ;;  %v3757_v61 = vshll.u32 %v7649_v41, 16 }
  0xca   : > { %v3741_v32 = vrot.slane %v3740_v59, 4  ;;  %v3761_v14 = vshrl.u32 %v7649_v41, 16  ;;  %v3722_v31 = vsel %vm6850_vm2, %v3717_v38, %v3721_v0  ;;  %v7681_v20 = vsel %vm7078_vm6, %v5189_v16, %v1319_v10  ;;  %v7689_v59 = vld [vmem:[%s6825_s26 + $0x4c] sm:$0xf]  ;;  %v5544_v10 = vld [vmem:[%s6825_s26 + $0x54] sm:$0xf] }
  0xcb   : > { %v3736_v46 = vsel %vm6850_vm2, %v3731_v39, %v7606_v21  ;;  %v3750_v57 = vrot.slane %v3748_v47, 4  ;;  %v7700_v0 = vld [vmem:[%s6825_s26 + $0x58] sm:$0xf]  ;;  %v7712_v21 = vld [vmem:[%s6825_s26 + $0x44] sm:$0x1]  ;;  %v3781_v39 = vshll.u32 %v7689_v59, 16 }
  0xcc   : > { %v6665_v16 = vld [vmem:[%s8557_s1 + $0x38] sm:$0xff]   ;;  %v3746_v13 = vsel %vm6850_vm2, %v3741_v32, %v3745_v9  ;;  %8584 = vst [vmem:[#allocation6_spill] sm:$0xff] %v7712_v21  ;;  %v3763_v38 = vrot.slane %v3761_v14, 4  ;;  %v3785_v40 = vshrl.u32 %v7689_v59, 16  ;;  %v3796_v9 = vshrl.u32 %v5544_v10, 16 }
  0xcd   : > { %6242 = vmatmul.mubr.msk.bf16.gmra.mrb[12].mxu0 %vm685_vm3, %v6654_v4  ;;  %v8583_v4 = vcombine.low %v7467_v7, %v7481_v17  ;;  %v7669_v7 = vcombine.low %v3688_v3, %v3698_v58  ;;  %v7685_v3 = vsel %vm7078_vm6, %v1321_v50, %v1322_v5  ;;  %v5541_v58 = vld [vmem:[%s6825_s26 + $0x48] sm:$0xf]  ;;  %v7709_v5 = vsel %vm7078_vm6, %v1328_v27, %v1329_v15  ;;  %v7717_v50 = vld [vmem:[%s6825_s26 + $0x90] sm:$0xe]  ;;  %v6715_v27 = vld [vmem:[%s6825_s26 + $0x94] sm:$0xf] }
  0xce   : > { %6078 = vmatmul.mubr.msk.bf16.gmra.mrb[28].mxu1 %vm685_vm3, %v8582_v28  ;;  %6245 = vmatprep.mubr.msk.bf16.mxu0 %vm685_vm3, %v6656_v43  ;;  %v3712_v43 = vsel %vm6850_vm2, %v3707_v29, %v7589_v25  ;;  %v7696_v25 = vsel %vm7078_vm6, %v5190_v45, %v1326_v48  ;;  %v3753_v29 = vrot.slane %v3751_v34, 5  ;;  %v7714_v48 = vrot.slane %v3757_v61, 5  ;;  %v6720_v41 = vld [vmem:[%s6825_s26 + $0xa4] sm:$0x1] }
  0xcf   : > { %6085 = vmatprep.mubr.msk.bf16.mxu1 %vm685_vm3, %v8583_v4  ;;  %v3772_v45 = vshrl.u32 %v5541_v58, 16  ;;  %v3775_v28 = vshll.u32 %v5541_v58, 16  ;;  %v3799_v47 = vshll.u32 %v5544_v10, 16  ;;  %v3805_v15 = vshll.u32 %v7700_v0, 16  ;;  %v5547_v58 = vld [vmem:[%s6825_s26 + $0x60] sm:$0xf] }
  0xd0   : > { %v3809_v34 = vshrl.u32 %v7700_v0, 16  ;;  %v8585_v4 = vcombine.low %v7440_v42, %v7444_v54  ;;  %v7729_v32 = vcombine.low %v3712_v43, %v3722_v31  ;;  %v7733_v61 = vcombine.low %v3736_v46, %v3746_v13  ;;  %v7746_v31 = vld [vmem:[%s6825_s26 + $0x50] sm:$0x1]  ;;  %v7752_v10 = vld [vmem:[%s6825_s26 + $0x64] sm:$0xf] }
  0xd1   : > { %v3767_v14 = vshll.u32 %v7712_v21, 16  ;;  %v8586_v42 = vcombine.low %v7485_v12, %v7489_v11  ;;  %v3777_v46 = vrot.slane %v3775_v28, 5  ;;  %v7749_v12 = vrot.slane %v3781_v39, 5  ;;  %v6716_v28 = vld [vmem:[%s6825_s26 + $0x98] sm:$0x1] }
  0xd2   : > { %v3787_v11 = vrot.slane %v3785_v40, 4  ;;  %v3798_v13 = vrot.slane %v3796_v9, 4  ;;  %v1336_v17 = vrot.slane %v6716_v28, 5  ;;  %v3791_v39 = vshll.u32 %v7746_v31, 16  ;;  %v7764_v40 = vld [vmem:[%s6825_s26 + $0x5c] sm:$0x1] }
  0xd3   : > { %v7758_v54 = vrot.slane %v3767_v14, 5  ;;  %v3820_v8 = vshrl.u32 %v5547_v58, 16  ;;  %v3823_v19 = vshll.u32 %v5547_v58, 16  ;;  %v3829_v9 = vshll.u32 %v7752_v10, 16  ;;  %v6717_v14 = vld [vmem:[%s6825_s26 + $0xa0] sm:$0xf] }
  0xd4   : > { %v1340_v28 = vrot.slane %v6717_v14, 5  ;;  %v3793_v14 = vrot.slane %v3791_v39, 5  ;;  %v5192_v43 = vrot.slane %v1209_v6, 9  ;;  %v1343_v6 = vrot.slane %v6720_v41, 5 }
  0xd5   : > { %6246 = vmatmul.mubr.msk.bf16.gmra.mrb[16].mxu0 %vm685_vm3, %v6658_v1  ;;  %v3754_v1 = vor.u32 %v3753_v29, %v3750_v57  ;;  %v6660_v57 = vld [vmem:[%s6825_s26 + $0x9c] sm:$0xff]   ;;  %v6661_v29 = vld [vmem:[%s6825_s26 + $0xa8] sm:$0xff]  }
  0xd6   : > { %6086 = vmatmul.mubr.msk.bf16.vlgmr.msra.gmra.mrb[0].mxu1 %vm685_vm3, %v8585_v4  ;;  %6249 = vmatprep.mubr.msk.bf16.mxu0 %vm685_vm3, %v6659_v51  ;;  %v3764_v51 = vor.u32 %v3763_v38, %v7714_v48  ;;  %v3801_v38 = vrot.slane %v3799_v47, 5  ;;  %v7756_v4 = vrot.slane %v3805_v15, 5  ;;  %v3833_v47 = vshrl.u32 %v7752_v10, 16 }
  0xd7   : > { %6118 = vmatpush3.bf16.msra.mxu1 %v7357_v63  ;;  %6089 = vmatprep.mubr.msk.bf16.mxu1 %vm685_vm3, %v8586_v42  ;;  %v3774_v63 = vrot.slane %v3772_v45, 4  ;;  %v3811_v42 = vrot.slane %v3809_v34, 4  ;;  %v1333_v45 = vrot.slane %v6715_v27, 5  ;;  %v7769_v15 = vrot.slane %v3754_v1, 4 }
  0xd8   : > { %6119 = vmatprep.subr.bf16.mxu1 %v6665_v16  ;;  %v3788_v27 = vor.u32 %v3787_v11, %v7749_v12  ;;  %v3765_v58 = vrot.slane %v3764_v51, 4  ;;  %v3802_v62 = vor.u32 %v3801_v38, %v3798_v13  ;;  %v6719_v51 = vld [vmem:[%s6825_s26 + $0xac] sm:$0xf]  ;;  %v8589_v38 = vcombine.low %v7514_v18, %v7518_v26 }
  0xd9   : > { %v3778_v34 = vor.u32 %v3777_v46, %v3774_v63  ;;  %v3812_v1 = vor.u32 %v3811_v42, %v7756_v4  ;;  %v3815_v63 = vshll.u32 %v7764_v40, 16  ;;  %v8588_v46 = vcombine.low %v7500_v36, %v7504_v56 }
  0xda   : > { %v1335_v11 = vrot.slane %v1333_v45, 4  ;;  %v1347_v13 = vrot.slane %v6719_v51, 5  ;;  %v3822_v36 = vrot.slane %v3820_v8, 4  ;;  %v3825_v56 = vrot.slane %v3823_v19, 5  ;;  %v6662_v51 = vld [vmem:[%s6825_s26 + $0xb4] sm:$0xff]   ;;  %v6663_v8 = vld [vmem:[%s6825_s26 + $0xc0] sm:$0xff]  }
  0xdb   : > { %6120 = vmatpush3.bf16.msra.mxu1 %v6665_v16  ;;  %v7776_v16 = vld [vmem:[%s8557_s1 + $0x40] sm:$0xff]   ;;  %v7793_v42 = vrot.slane %v3829_v9, 5  ;;  %v3789_v21 = vrot.slane %v3788_v27, 4  ;;  %v1342_v39 = vrot.slane %v1340_v28, 4  ;;  %v3803_v18 = vrot.slane %v3802_v62, 4 }
  0xdc   : > { %8587 = vst [vmem:[#allocation7_spill] sm:$0xff] %v7776_v16  ;;  %6333 = vmatprep.subr.bf16.mxu1 %v7776_v16  ;;  %v7797_v16 = vld [vmem:[%s6825_s26 + $0x68] sm:$0x1]  ;;  %v3813_v26 = vrot.slane %v3812_v1, 4  ;;  %v3760_v19 = vsel %vm6850_vm2, %v7769_v15, %v7714_v48  ;;  %v8591_v9 = vrot.slane %v7717_v50, 9  ;;  %v3770_v62 = vsel %vm6850_vm2, %v3765_v58, %v7758_v54 }
  0xdd   : > { %6250 = vmatmul.mubr.msk.bf16.gmra.mrb[20].mxu0 %vm685_vm3, %v6660_v57  ;;  %v1210_v57 = vld [vmem:[%s6825_s26 + $0xa8] sm:$0xe]  ;;  %8590 = vst [vmem:[#allocation8_spill] sm:$0xff] %v7797_v16  ;;  %v3826_v1 = vor.u32 %v3825_v56, %v3822_v36  ;;  %v1211_v48 = vld [vmem:[%s6825_s26 + $0xb4] sm:$0xe]  ;;  %v7821_v50 = vsel %vm7078_vm6, %v1335_v11, %v1336_v17  ;;  %v7828_v54 = vsel %vm7078_vm6, %v5192_v43, %v1340_v28 }
  0xde   : > { %6090 = vmatmul.mubr.msk.bf16.gmra.mrb[4].mxu1 %vm685_vm3, %v8588_v46  ;;  %6253 = vmatprep.mubr.msk.bf16.mxu0 %vm685_vm3, %v6661_v29  ;;  %v3835_v46 = vrot.slane %v3833_v47, 4  ;;  %v3779_v29 = vrot.slane %v3778_v34, 4  ;;  %v5193_v53 = vrot.slane %v1210_v57, 9  ;;  %v7809_v41 = vsel %vm7078_vm6, %v8591_v9, %v1333_v45  ;;  %v6721_v34 = vld [vmem:[%s6825_s26 + $0xb0] sm:$0x1] }
  0xdf   : > { %6093 = vmatprep.mubr.msk.bf16.mxu1 %vm685_vm3, %v8589_v38  ;;  %v3817_v38 = vrot.slane %v3815_v63, 5  ;;  %v1349_v47 = vrot.slane %v1347_v13, 4  ;;  %v1350_v27 = vrot.slane %v6721_v34, 5  ;;  %v3839_v57 = vshll.u32 %v7797_v16, 16  ;;  %v5550_v15 = vld [vmem:[%s6825_s26 + $0x6c] sm:$0xf] }
  0xe0   : > { %v3836_v63 = vor.u32 %v3835_v46, %v7793_v42  ;;  %v3784_v45 = vsel %vm6850_vm2, %v3779_v29, %v7749_v12  ;;  %v7832_v58 = vsel %vm7078_vm6, %v1342_v39, %v1343_v6  ;;  %v3794_v36 = vsel %vm6850_vm2, %v3789_v21, %v3793_v14  ;;  %v6722_v11 = vld [vmem:[%s6825_s26 + $0xb8] sm:$0xf] }
  0xe1   : > { %v3808_v17 = vsel %vm6850_vm2, %v3803_v18, %v7756_v4  ;;  %v3818_v12 = vsel %vm6850_vm2, %v3813_v26, %v3817_v38  ;;  %v7844_v43 = vsel %vm7078_vm6, %v5193_v53, %v1347_v13  ;;  %v8593_v28 = vcombine.low %v7562_v22, %v7573_v55  ;;  %v7857_v53 = vld [vmem:[%s6825_s26 + $0x70] sm:$0xf]  ;;  %v7881_v18 = vld [vmem:[%s6825_s26 + $0x7c] sm:$0xf]  ;;  %v5556_v26 = vld [vmem:[%s6825_s26 + $0x84] sm:$0xf] }
  0xe2   : > { %8592 = vst [vmem:[#allocation9_spill] sm:$0xff] %v7844_v43  ;;  %v7853_v21 = vsel %vm7078_vm6, %v1349_v47, %v1350_v27  ;;  %v5194_v4 = vrot.slane %v1211_v48, 9  ;;  %v1354_v14 = vrot.slane %v6722_v11, 5  ;;  %8595 = vst [vmem:[#allocation11_spill] sm:$0xff] %v7857_v53  ;;  %v3844_v13 = vshrl.u32 %v5550_v15, 16  ;;  %v6664_v38 = vld [vmem:[%s6825_s26 + $0xcc] sm:$0xff]  }
  0xe3   : > { %8594 = vst [vmem:[#allocation10_spill] sm:$0xff] %v7853_v21  ;;  %v8596_v22 = vcombine.low %v7566_v33, %v7577_v52  ;;  %v7863_v55 = vcombine.low %v3760_v19, %v3770_v62  ;;  %v7865_v56 = vrot.slane %v3826_v1, 4  ;;  %v7867_v46 = vrot.slane %v3836_v63, 4  ;;  %v5553_v52 = vld [vmem:[%s6825_s26 + $0x78] sm:$0xf]  ;;  %8597 = vst [vmem:[#allocation12_spill] sm:$0xff] %v7881_v18 }
  0xe4   : > { %v7869_v29 = vrot.slane %v3839_v57, 5  ;;  %v7873_v6 = vcombine.low %v3784_v45, %v3794_v36  ;;  %v7877_v33 = vcombine.low %v3808_v17, %v3818_v12  ;;  %v7888_v19 = vld [vmem:[%s6825_s26 + $0xbc] sm:$0x1]  ;;  %v3847_v47 = vshll.u32 %v5550_v15, 16  ;;  %v7893_v27 = vld [vmem:[%s6825_s26 + $0x88] sm:$0xf] }
  0xe5   : > { %6254 = vmatmul.mubr.msk.bf16.gmra.mrb[24].mxu0 %vm685_vm3, %v6662_v51  ;;  %v3853_v34 = vshll.u32 %v7857_v53, 16  ;;  %8598 = vst [vmem:[#allocation13_spill] sm:$0xff] %v7893_v27  ;;  %v7897_v62 = vsel %vm7078_vm6, %v5194_v4, %v1354_v14  ;;  %v7899_v1 = vrot.slane %v1354_v14, 4  ;;  %v7901_v63 = vrot.slane %v3844_v13, 4  ;;  %v5559_v48 = vld [vmem:[%s6825_s26 + $0x90] sm:$0xf] }
  0xe6   : > { %6094 = vmatmul.mubr.msk.bf16.gmra.mrb[8].mxu1 %vm685_vm3, %v8593_v28  ;;  %6257 = vmatprep.mubr.msk.bf16.mxu0 %vm685_vm3, %v6663_v8  ;;  %v3857_v57 = vshrl.u32 %v7857_v53, 16  ;;  %v3868_v36 = vshrl.u32 %v5553_v52, 16  ;;  %v3871_v17 = vshll.u32 %v5553_v52, 16  ;;  %v7914_v12 = vld [vmem:[%s6825_s26 + $0x94] sm:$0xf]  ;;  %v3877_v4 = vshll.u32 %v7881_v18, 16 }
  0xe7   : > { %6097 = vmatprep.mubr.msk.bf16.mxu1 %vm685_vm3, %v8596_v22  ;;  %8599 = vst [vmem:[#allocation14_spill] sm:$0xff] %v7914_v12  ;;  %v7917_v28 = vld [vmem:[%s6825_s26 + $0x74] sm:$0x1]  ;;  %v3881_v11 = vshrl.u32 %v7881_v18, 16  ;;  %v3892_v14 = vshrl.u32 %v5556_v26, 16  ;;  %v3895_v13 = vshll.u32 %v5556_v26, 16  ;;  %v8601_v15 = vcombine.low %v7600_v44, %v7619_v35 }
  0xe8   : > { %8600 = vst [vmem:[#allocation15_spill] sm:$0xff] %v7917_v28  ;;  %v3901_v22 = vshll.u32 %v7893_v27, 16  ;;  %v3905_v8 = vshrl.u32 %v7893_v27, 16  ;;  %v3916_v51 = vshrl.u32 %v5559_v48, 16  ;;  %v3919_v52 = vshll.u32 %v5559_v48, 16 }
  0xe9   : > { %v3849_v45 = vrot.slane %v3847_v47, 5  ;;  %v7930_v26 = vrot.slane %v3853_v34, 5  ;;  %v3925_v39 = vshll.u32 %v7914_v12, 16  ;;  %v3929_v9 = vshrl.u32 %v7914_v12, 16  ;;  %v5562_v34 = vld [vmem:[%s6825_s26 + $0x9c] sm:$0xf] }
  0xea   : > { %v8602_v48 = vcombine.low %v7613_v23, %v7627_v49  ;;  %v3859_v44 = vrot.slane %v3857_v57, 4  ;;  %v3863_v35 = vshll.u32 %v7917_v28, 16  ;;  %v3873_v47 = vrot.slane %v3871_v17, 5  ;;  %v7946_v18 = vld [vmem:[%s6825_s26 + $0x8c] sm:$0x1] }
  0xeb   : > { %v3883_v27 = vrot.slane %v3881_v11, 4  ;;  %v3894_v53 = vrot.slane %v3892_v14, 4  ;;  %v3897_v12 = vrot.slane %v3895_v13, 5  ;;  %v7948_v21 = vrot.slane %v3901_v22, 5  ;;  %v7954_v57 = vld [vmem:[%s6825_s26 + $0x98] sm:$0x1] }
  0xec   : > { %v3907_v23 = vrot.slane %v3905_v8, 4  ;;  %v3918_v49 = vrot.slane %v3916_v51, 4  ;;  %v3921_v43 = vrot.slane %v3919_v52, 5  ;;  %v7956_v28 = vrot.slane %v3925_v39, 5  ;;  %v6668_v51 = vld [vmem:[%s8557_s1 + $0x88] sm:$0xff]  }
  0xed   : > { %6258 = vmatmul.mubr.msk.bf16.gmra.mrb[28].mxu0 %vm685_vm3, %v6664_v38  ;;  %v7933_v38 = vld [vmem:[%s6825_s26 + $0x80] sm:$0x1]  ;;  %v3940_v17 = vshrl.u32 %v5562_v34, 16  ;;  %v3850_v11 = vor.u32 %v3849_v45, %v7901_v63  ;;  %v3860_v16 = vor.u32 %v3859_v44, %v7930_v26  ;;  %v3898_v22 = vor.u32 %v3897_v12, %v3894_v53 }
  0xee   : > { %6098 = vmatmul.mubr.msk.bf16.gmra.mrb[12].mxu1 %vm685_vm3, %v8601_v15  ;;  %6265 = vmatprep.mubr.msk.bf16.mxu0 %vm685_vm3, %v7669_v7  ;;  %v3870_v7 = vrot.slane %v3868_v36, 4  ;;  %v7943_v15 = vrot.slane %v3877_v4, 5  ;;  %v3931_v36 = vrot.slane %v3929_v9, 4  ;;  %v3943_v4 = vshll.u32 %v5562_v34, 16 }
  0xef   : > { %6101 = vmatprep.mubr.msk.bf16.mxu1 %vm685_vm3, %v8602_v48  ;;  %v7951_v48 = vld [vmem:[%s6825_s26 + $0xa0] sm:$0xf]  ;;  %v3887_v13 = vshll.u32 %v7933_v38, 16  ;;  %v3908_v63 = vor.u32 %v3907_v23, %v7948_v21  ;;  %v3911_v45 = vshll.u32 %v7946_v18, 16  ;;  %v3922_v52 = vor.u32 %v3921_v43, %v3918_v49 }
  0xf0   : > { %v3874_v14 = vor.u32 %v3873_v47, %v3870_v7  ;;  %v3884_v8 = vor.u32 %v3883_v27, %v7943_v15  ;;  %v3949_v39 = vshll.u32 %v7951_v48, 16  ;;  %v3953_v9 = vshrl.u32 %v7951_v48, 16 }
  0xf1   : > { %v3935_v27 = vshll.u32 %v7954_v57, 16  ;;  %v8603_v44 = vcombine.low %v7631_v24, %v7635_v37  ;;  %v3865_v53 = vrot.slane %v3863_v35, 5  ;;  %v3932_v12 = vor.u32 %v3931_v36, %v7956_v28 }
  0xf2   : > { %v3942_v7 = vrot.slane %v3940_v17, 4  ;;  %v8604_v47 = vcombine.low %v7681_v20, %v7685_v3  ;;  %v3851_v43 = vrot.slane %v3850_v11, 4  ;;  %v3861_v24 = vrot.slane %v3860_v16, 4  ;;  %v7991_v16 = vld [vmem:[%s6825_s26 + $0xac] sm:$0xf] }
  0xf3   : > { %v3875_v37 = vrot.slane %v3874_v14, 4  ;;  %v3889_v34 = vrot.slane %v3887_v13, 5  ;;  %v3885_v35 = vrot.slane %v3884_v8, 4  ;;  %v3899_v23 = vrot.slane %v3898_v22, 4 }
  0xf4   : > { %v7985_v49 = vrot.slane %v3949_v39, 5  ;;  %v3955_v36 = vrot.slane %v3953_v9, 4  ;;  %v3909_v17 = vrot.slane %v3908_v63, 4  ;;  %v3913_v20 = vrot.slane %v3911_v45, 5 }
  0xf5   : > { %6266 = vmatmul.mubr.msk.bf16.vlgmr.msra.gmra.mrb[0].mxu0 %vm685_vm3, %v7729_v32  ;;  %v3945_v32 = vrot.slane %v3943_v4, 5  ;;  %v3923_v3 = vrot.slane %v3922_v52, 4  ;;  %v3937_v4 = vrot.slane %v3935_v27, 5  ;;  %v8605_v8 = vrot.slane %v7888_v19, 5 }
  0xf6   : > { %6102 = vmatmul.mubr.msk.bf16.gmra.mrb[16].mxu1 %vm685_vm3, %v8603_v44  ;;  %6298 = vmatpush3.bf16.msra.mxu0 %v7495_v60  ;;  %v5565_v60 = vld [vmem:[%s6825_s26 + $0xa8] sm:$0xf]  ;;  %v7988_v44 = vld [vmem:[%s6825_s26 + $0xa4] sm:$0x1]  ;;  %v3856_v39 = vsel %vm6850_vm2, %v3851_v43, %v7930_v26  ;;  %v3880_v9 = vsel %vm6850_vm2, %v3875_v37, %v7943_v15  ;;  %v3890_v19 = vsel %vm6850_vm2, %v3885_v35, %v3889_v34  ;;  %v3973_v52 = vshll.u32 %v7991_v16, 16 }
  0xf7   : > { %6105 = vmatprep.mubr.msk.bf16.mxu1 %vm685_vm3, %v8604_v47  ;;  %6269 = vmatprep.mubr.msk.bf16.mxu0 %vm685_vm3, %v7733_v61  ;;  %v3933_v61 = vrot.slane %v3932_v12, 4  ;;  %v3946_v11 = vor.u32 %v3945_v32, %v3942_v7  ;;  %v3964_v14 = vshrl.u32 %v5565_v60, 16  ;;  %v3967_v13 = vshll.u32 %v5565_v60, 16 }
  0xf8   : > { %6299 = vmatprep.subr.bf16.mxu0 %v6668_v51  ;;  %v7998_v22 = vsel %vm7078_vm6, %v7899_v1, %v8605_v8  ;;  %v3904_v1 = vsel %vm6850_vm2, %v3899_v23, %v7948_v21  ;;  %v3956_v63 = vor.u32 %v3955_v36, %v7985_v49  ;;  %v3959_v45 = vshll.u32 %v7988_v44, 16  ;;  %v5619_v21 = vld [vmem:[%s6825_s26 + $0x48] sm:$0xe]  ;;  %v5622_v8 = vld [vmem:[%s6825_s26 + $0x6c] sm:$0xe] }
  0xf9   : > { %v3914_v26 = vsel %vm6850_vm2, %v3909_v17, %v3913_v20  ;;  %v3928_v15 = vsel %vm6850_vm2, %v3923_v3, %v7956_v28  ;;  %v3977_v27 = vshrl.u32 %v7991_v16, 16  ;;  %v3947_v12 = vrot.slane %v3946_v11, 4  ;;  %v8034_v28 = vld [vmem:[%s6825_s26 + $0xb0] sm:$0x1] }
  0xfa   : > { %6300 = vmatpush3.bf16.msra.mxu0 %v6668_v51  ;;  %v3866_v51 = vsel %vm6850_vm2, %v3861_v24, %v3865_v53  ;;  %v8606_v53 = vcombine.low %v7696_v25, %v7709_v5  ;;  %v3966_v7 = vrot.slane %v3964_v14, 4  ;;  %v3969_v32 = vrot.slane %v3967_v13, 5 }
  0xfb   : > { %v8607_v47 = vcombine.low %v7809_v41, %v7821_v50  ;;  %v8608_v25 = vsel %vm6850_vm2, %v7867_v46, %v7869_v29  ;;  %v8609_v5 = vsel %vm6850_vm2, %v7865_v56, %v7793_v42  ;;  %v5214_v43 = vcombine.low %v7897_v62, %v7998_v22  ;;  %v5568_v50 = vld [vmem:[%s6825_s26 + $0xb4] sm:$0xf] }
  0xfc   : > { %v8052_v24 = vcombine.low %v3856_v39, %v3866_v51  ;;  %v8054_v41 = vcombine.low %v3880_v9, %v3890_v19  ;;  %v8057_v37 = vcombine.low %v3904_v1, %v3914_v26  ;;  %v3957_v34 = vrot.slane %v3956_v63, 4  ;;  %v5620_v29 = vld [vmem:[%s6825_s26 + $0x54] sm:$0xe] }
  0xfd   : > { %6270 = vmatmul.mubr.msk.bf16.gmra.mrb[4].mxu0 %vm685_vm3, %v7863_v55  ;;  %v3938_v55 = vsel %vm6850_vm2, %v3933_v61, %v3937_v4  ;;  %v3961_v60 = vrot.slane %v3959_v45, 5  ;;  %v5635_v46 = vrot.slane %v5619_v21, 9  ;;  %v8062_v42 = vrot.slane %v3973_v52, 5  ;;  %v5621_v4 = vld [vmem:[%s6825_s26 + $0x60] sm:$0xe]  ;;  %v8611_v45 = vld [vmem:[#allocation8_spill] sm:$0xff] }
  0xfe   : > { %6106 = vmatmul.mubr.msk.bf16.gmra.mrb[20].mxu1 %vm685_vm3, %v8606_v53  ;;  %6273 = vmatprep.mubr.msk.bf16.mxu0 %vm685_vm3, %v7873_v6  ;;  %v5587_v6 = vcombine.low %v8609_v5, %v8608_v25  ;;  %v8060_v35 = vcombine.low %v3928_v15, %v3938_v55  ;;  %v3979_v56 = vrot.slane %v3977_v27, 4  ;;  %v3983_v23 = vshll.u32 %v8034_v28, 16  ;;  %v8612_v52 = vld [vmem:[#allocation9_spill] sm:$0xff]  ;;  %v8613_v27 = vld [vmem:[#allocation10_spill] sm:$0xff]  ;;  %v8615_v53 = vld [vmem:[#allocation11_spill] sm:$0xff] }
  0xff   : > { %6109 = vmatprep.mubr.msk.bf16.mxu1 %vm685_vm3, %v8607_v47  ;;  %v3952_v36 = vsel %vm6850_vm2, %v3947_v12, %v7985_v49  ;;  %v3970_v17 = vor.u32 %v3969_v32, %v3966_v7  ;;  %v4459_v20 = vrot.slane %v7689_v59, 5  ;;  %v4462_v3 = vrot.slane %v7746_v31, 5  ;;  %v8084_v31 = vld [vmem:[%s6825_s26 + $0xb8] sm:$0xf]  ;;  %v8616_v12 = vld [vmem:[#allocation15_spill] sm:$0xff] }
 0x100   : > { %v3988_v61 = vshrl.u32 %v5568_v50, 16  ;;  %v5636_v11 = vrot.slane %v5620_v29, 9  ;;  %v4466_v14 = vrot.slane %v7700_v0, 5  ;;  %v4469_v13 = vrot.slane %v7764_v40, 5  ;;  %v5571_v32 = vld [vmem:[%s6825_s26 + $0xc0] sm:$0xf] }
 0x101   : > { %v3962_v39 = vsel %vm6850_vm2, %v3957_v34, %v3961_v60  ;;  %v3991_v51 = vshll.u32 %v5568_v50, 16  ;;  %v8078_v49 = vsel %vm7078_vm6, %v5635_v46, %v4459_v20  ;;  %v4461_v9 = vrot.slane %v4459_v20, 4  ;;  %v5623_v46 = vld [vmem:[%s6825_s26 + $0x78] sm:$0xe] }
 0x102   : > { %v3980_v59 = vor.u32 %v3979_v56, %v8062_v42  ;;  %v8088_v0 = vsel %vm7078_vm6, %v5636_v11, %v4466_v14  ;;  %v4468_v40 = vrot.slane %v4466_v14, 4  ;;  %v5637_v19 = vrot.slane %v5621_v4, 9  ;;  %v6667_v4 = vld [vmem:[%s6825_s26 + $0xc] sm:$0xff]  }
 0x103   : > { %v8610_v1 = vcombine.low %v7828_v54, %v7832_v58  ;;  %v4473_v63 = vrot.slane %v7752_v10, 5  ;;  %v4476_v26 = vrot.slane %v8611_v45, 5  ;;  %v5638_v15 = vrot.slane %v5622_v8, 9 }
 0x104   : > { %v8614_v21 = vcombine.low %v8612_v52, %v8613_v27  ;;  %v8109_v58 = vsel %vm7078_vm6, %v4468_v40, %v4469_v13  ;;  %v4480_v55 = vrot.slane %v8615_v53, 5  ;;  %v4483_v10 = vrot.slane %v8616_v12, 5  ;;  %v8146_v13 = vld [vmem:[%s6825_s26 + $0xc4] sm:$0xf]  ;;  %v8618_v52 = vld [vmem:[#allocation3_spill] sm:$0xff]  ;;  %v8619_v27 = vld [vmem:[#allocation4_spill] sm:$0xff] }
 0x105   : > { %6274 = vmatmul.mubr.msk.bf16.gmra.mrb[8].mxu0 %vm685_vm3, %v7877_v33  ;;  %v8097_v33 = vsel %vm7078_vm6, %v4461_v9, %v4462_v3  ;;  %v3997_v7 = vshll.u32 %v8084_v31, 16  ;;  %v5656_v47 = vcombine.low %v8088_v0, %v8109_v58  ;;  %v8119_v25 = vsel %vm7078_vm6, %v5637_v19, %v4473_v63  ;;  %v5330_v3 = vld [vmem:[%s6825_s26 + $0x78] sm:$0xf]  ;;  %v8617_v19 = vld [vmem:[#allocation12_spill] sm:$0xff]  ;;  %v6735_v58 = vld [vmem:[%s6825_s26 + $0xa0] sm:$0xf] }
 0x106   : > { %6110 = vmatmul.mubr.msk.bf16.gmra.mrb[24].mxu1 %vm685_vm3, %v8610_v1  ;;  %6277 = vmatprep.mubr.msk.bf16.mxu0 %vm685_vm3, %v5587_v6  ;;  %v5655_v54 = vcombine.low %v8078_v49, %v8097_v33  ;;  %v4475_v5 = vrot.slane %v4473_v63, 4  ;;  %v8121_v6 = vrot.slane %v3983_v23, 5  ;;  %v4001_v50 = vshrl.u32 %v8084_v31, 16  ;;  %v8620_v12 = vld [vmem:[#allocation13_spill] sm:$0xff] }
 0x107   : > { %6113 = vmatprep.mubr.msk.bf16.mxu1 %vm685_vm3, %v8614_v21  ;;  %v8126_v34 = vsel %vm7078_vm6, %v5638_v15, %v4480_v55  ;;  %v4482_v60 = vrot.slane %v4480_v55, 4  ;;  %v8129_v29 = vcombine.low %v3952_v36, %v3962_v39  ;;  %v8131_v56 = vrot.slane %v3970_v17, 4 }
 0x108   : > { %v8133_v20 = vrot.slane %v3988_v61, 4  ;;  %v8137_v23 = vsel %vm7078_vm6, %v4475_v5, %v4476_v26  ;;  %v8141_v11 = vrot.slane %v3980_v59, 4  ;;  %v8143_v14 = vrot.slane %v3991_v51, 5  ;;  %v5624_v59 = vld [vmem:[%s6825_s26 + $0x84] sm:$0xe] }
 0x109   : > { %v5657_v36 = vcombine.low %v8119_v25, %v8137_v23  ;;  %v8152_v17 = vsel %vm7078_vm6, %v4482_v60, %v4483_v10  ;;  %v8154_v61 = vrot.slane %v3997_v7, 5  ;;  %v4012_v8 = vshrl.u32 %v5571_v32, 16  ;;  %v8162_v51 = vld [vmem:[%s6825_s26 + $0xbc] sm:$0x1]  ;;  %v5574_v5 = vld [vmem:[%s6825_s26 + $0xcc] sm:$0xf] }
 0x10a   : > { %v5658_v39 = vcombine.low %v8126_v34, %v8152_v17  ;;  %v5639_v9 = vrot.slane %v5623_v46, 9  ;;  %v4015_v40 = vshll.u32 %v5571_v32, 16  ;;  %v4487_v1 = vrot.slane %v8617_v19, 5  ;;  %v6669_v46 = vld [vmem:[%s6825_s26 + $0x18] sm:$0xff]   ;;  %v5625_v19 = vld [vmem:[%s6825_s26 + $0x90] sm:$0xe] }
 0x10b   : > { %v4490_v63 = vrot.slane %v7933_v38, 5  ;;  %v2301_v45 = vshrl.u32 %v5330_v3, 16  ;;  %v4021_v26 = vshll.u32 %v8146_v13, 16  ;;  %v2304_v15 = vshll.u32 %v5330_v3, 16  ;;  %v6739_v17 = vld [vmem:[%s6825_s26 + $0xac] sm:$0xf] }
 0x10c   : > { %v2323_v38 = vsel %vm6850_vm2, %v8619_v27, %v8618_v52  ;;  %v8181_v62 = vsel %vm7078_vm6, %v5639_v9, %v4487_v1  ;;  %v4489_v22 = vrot.slane %v4487_v1, 4  ;;  %v4003_v21 = vrot.slane %v4001_v50, 4  ;;  %v8621_v27 = vld [vmem:[#allocation14_spill] sm:$0xff] }
 0x10d   : > { %6278 = vmatmul.mubr.msk.bf16.gmra.mrb[12].mxu0 %vm685_vm3, %v8052_v24  ;;  %v4025_v24 = vshrl.u32 %v8146_v13, 16  ;;  %v4007_v53 = vshll.u32 %v8162_v51, 16  ;;  %v2306_v55 = vrot.slane %v2304_v15, 5  ;;  %v4494_v10 = vrot.slane %v8620_v12, 5 }
 0x10e   : > { %6114 = vmatmul.mubr.msk.bf16.gmra.mrb[28].mxu1 %vm685_vm3, %v5214_v43  ;;  %6281 = vmatprep.mubr.msk.bf16.mxu0 %vm685_vm3, %v8054_v41  ;;  %v2303_v43 = vrot.slane %v2301_v45, 4  ;;  %v5640_v41 = vrot.slane %v5624_v59, 9  ;;  %v3976_v7 = vsel %vm6850_vm2, %v8131_v56, %v8062_v42  ;;  %v3994_v32 = vor.u32 %v8143_v14, %v8133_v20  ;;  %v6670_v42 = vld [vmem:[%s6825_s26 + $0x24] sm:$0xff]   ;;  %v8205_v14 = vld [vmem:[%s6825_s26 + $0xd0] sm:$0xf] }
 0x10f   : > { %6121 = vmatprep.mubr.msk.bf16.mxu1 %vm685_vm3, %v6667_v4  ;;  %v8194_v60 = vsel %vm7078_vm6, %v4489_v22, %v4490_v63  ;;  %v4497_v50 = vrot.slane %v7946_v18, 5  ;;  %v4014_v3 = vrot.slane %v4012_v8, 4  ;;  %v4017_v4 = vrot.slane %v4015_v40, 5  ;;  %v8217_v40 = vld [vmem:[%s6825_s26 + $0xc8] sm:$0x1] }
 0x110   : > { %v5659_v9 = vcombine.low %v8181_v62, %v8194_v60  ;;  %v2307_v59 = vor.u32 %v2306_v55, %v2303_v43  ;;  %v8202_v56 = vrot.slane %v4021_v26, 5  ;;  %v4027_v20 = vrot.slane %v4025_v24, 4  ;;  %v8622_v43 = vld [vmem:[#allocation2_spill] sm:$0xff] }
 0x111   : > { %v8209_v1 = vsel %vm7078_vm6, %v5640_v41, %v4494_v10  ;;  %v4496_v63 = vrot.slane %v4494_v10, 4  ;;  %v3986_v18 = vsel %vm6850_vm2, %v8141_v11, %v8121_v6  ;;  %v4004_v8 = vor.u32 %v4003_v21, %v8154_v61  ;;  %v8623_v21 = vld [vmem:[#allocation7_spill] sm:$0xff] }
 0x112   : > { %v4036_v45 = vshrl.u32 %v5574_v5, 16  ;;  %v2308_v26 = vrot.slane %v2307_v59, 4  ;;  %v4039_v24 = vshll.u32 %v5574_v5, 16  ;;  %v5641_v52 = vrot.slane %v5625_v19, 9 }
 0x113   : > { %v8223_v15 = vsel %vm7078_vm6, %v4496_v63, %v4497_v50  ;;  %v4501_v22 = vrot.slane %v8621_v27, 5  ;;  %v4045_v6 = vshll.u32 %v8205_v14, 16  ;;  %v4049_v11 = vshrl.u32 %v8205_v14, 16  ;;  %v6724_v50 = vld [vmem:[%s8557_s1 + $0x48] sm:$0xff]   ;;  %v6671_v63 = vld [vmem:[%s6825_s26 + $0x30] sm:$0xff]  }
 0x114   : > { %v5660_v41 = vcombine.low %v8209_v1, %v8223_v15  ;;  %v4018_v55 = vor.u32 %v4017_v4, %v4014_v3  ;;  %v4031_v12 = vshll.u32 %v8217_v40, 16  ;;  %v4009_v5 = vrot.slane %v4007_v53, 5  ;;  %v8253_v53 = vld [vmem:[%s6825_s26 + $0xd4] sm:$0x1] }
 0x115   : > { %6282 = vmatmul.mubr.msk.bf16.gmra.mrb[16].mxu0 %vm685_vm3, %v8057_v37  ;;  %v2313_v37 = vsel %vm6850_vm2, %v2308_v26, %v8622_v43  ;;  %v4503_v59 = vrot.slane %v4501_v22, 4  ;;  %v4504_v3 = vrot.slane %v7954_v57, 5  ;;  %v5593_v4 = vcombine.low %v3976_v7, %v3986_v18 }
 0x116   : > { %6122 = vmatmul.mubr.msk.bf16.vlgmr.msra.gmra.mrb[0].mxu1 %vm685_vm3, %v6669_v46  ;;  %6285 = vmatprep.mubr.msk.bf16.mxu0 %vm685_vm3, %v8060_v35  ;;  %v4028_v35 = vor.u32 %v4027_v20, %v8202_v56  ;;  %v8240_v10 = vcombine.low %v2313_v37, %v2323_v38  ;;  %v8247_v46 = vsel %vm7078_vm6, %v5641_v52, %v4501_v22  ;;  %v3995_v19 = vrot.slane %v3994_v32, 4  ;;  %v5626_v38 = vld [vmem:[%s6825_s26 + $0x9c] sm:$0xe] }
 0x117   : > { %6335 = vmatpush3.bf16.msra.mxu1 %v8623_v21  ;;  %6125 = vmatprep.mubr.msk.bf16.mxu1 %vm685_vm3, %v6670_v42  ;;  %v4005_v42 = vrot.slane %v4004_v8, 4  ;;  %v4038_v20 = vrot.slane %v4036_v45, 4  ;;  %v4041_v26 = vrot.slane %v4039_v24, 5  ;;  %v8255_v27 = vrot.slane %v4045_v6, 5  ;;  %v6672_v52 = vld [vmem:[%s6825_s26 + $0x3c] sm:$0xff]  }
 0x118   : > { %6334 = vmatprep.subr.bf16.mxu1 %v6724_v50  ;;  %v4051_v43 = vrot.slane %v4049_v11, 4  ;;  %v8259_v37 = vsel %vm7078_vm6, %v4503_v59, %v4504_v3  ;;  %v4019_v22 = vrot.slane %v4018_v55, 4  ;;  %v4029_v57 = vrot.slane %v4028_v35, 4  ;;  %v5615_v21 = vld [vmem:[%s6825_s26 + $0x18] sm:$0xe] }
 0x119   : > { %v4033_v7 = vrot.slane %v4031_v12, 5  ;;  %v5661_v32 = vcombine.low %v8247_v46, %v8259_v37  ;;  %v5642_v18 = vrot.slane %v5626_v38, 9  ;;  %v4508_v8 = vrot.slane %v7951_v48, 5  ;;  %v6725_v12 = vld [vmem:[%s6825_s26 + $0x1c] sm:$0xf] }
 0x11a   : > { %v4000_v45 = vsel %vm6850_vm2, %v3995_v19, %v8154_v61  ;;  %v4010_v24 = vsel %vm6850_vm2, %v4005_v42, %v4009_v5  ;;  %v4055_v6 = vshll.u32 %v8253_v53, 16  ;;  %v4511_v11 = vrot.slane %v7988_v44, 5  ;;  %v5627_v59 = vld [vmem:[%s6825_s26 + $0xa8] sm:$0xe] }
 0x11b   : > { %6336 = vmatpush3.bf16.msra.mxu1 %v6724_v50  ;;  %v4042_v48 = vor.u32 %v4041_v26, %v4038_v20  ;;  %v8280_v61 = vsel %vm7078_vm6, %v5642_v18, %v4508_v8  ;;  %v4510_v55 = vrot.slane %v4508_v8, 4  ;;  %v4024_v44 = vsel %vm6850_vm2, %v4019_v22, %v8202_v56  ;;  %v6673_v20 = vld [vmem:[%s6825_s26 + $0x48] sm:$0xff]   ;;  %v6726_v26 = vld [vmem:[%s6825_s26 + $0x20] sm:$0x1]  ;;  %v5628_v8 = vld [vmem:[%s6825_s26 + $0xb4] sm:$0xe] }
 0x11c   : > { %v4034_v35 = vsel %vm6850_vm2, %v4029_v57, %v4033_v7  ;;  %v4431_v5 = vrot.slane %v6725_v12, 5  ;;  %v5594_v3 = vcombine.low %v4000_v45, %v4010_v24  ;;  %v5631_v19 = vrot.slane %v5615_v21, 9  ;;  %v5617_v12 = vld [vmem:[%s6825_s26 + $0x30] sm:$0xe] }
 0x11d   : > { %6286 = vmatmul.mubr.msk.bf16.gmra.mrb[20].mxu0 %vm685_vm3, %v8129_v29  ;;  %v4052_v29 = vor.u32 %v4051_v43, %v8255_v27  ;;  %v8291_v50 = vsel %vm7078_vm6, %v4510_v55, %v4511_v11  ;;  %v5595_v56 = vcombine.low %v4024_v44, %v4034_v35  ;;  %v4043_v38 = vrot.slane %v4042_v48, 4  ;;  %v5616_v11 = vld [vmem:[%s6825_s26 + $0x24] sm:$0xe]  ;;  %v6727_v48 = vld [vmem:[%s6825_s26 + $0x28] sm:$0xf] }
 0x11e   : > { %6126 = vmatmul.mubr.msk.bf16.gmra.mrb[4].mxu1 %vm685_vm3, %v6671_v63  ;;  %6289 = vmatprep.mubr.msk.bf16.mxu0 %vm685_vm3, %v5593_v4  ;;  %v4057_v4 = vrot.slane %v4055_v6, 5  ;;  %v5662_v42 = vcombine.low %v8280_v61, %v8291_v50  ;;  %v4434_v43 = vrot.slane %v6726_v26, 5  ;;  %v4433_v22 = vrot.slane %v4431_v5, 4  ;;  %v6728_v55 = vld [vmem:[%s6825_s26 + $0x34] sm:$0xf] }
 0x11f   : > { %6129 = vmatprep.mubr.msk.bf16.mxu1 %vm685_vm3, %v6672_v52  ;;  %v4053_v63 = vrot.slane %v4052_v29, 4  ;;  %v6674_v52 = vld [vmem:[%s6825_s26 + $0x54] sm:$0xff]   ;;  %v5643_v57 = vrot.slane %v5627_v59, 9  ;;  %v4515_v7 = vrot.slane %v7991_v16, 5  ;;  %v4518_v18 = vrot.slane %v8034_v28, 5 }
 0x120   : > { %v4048_v16 = vsel %vm6850_vm2, %v4043_v38, %v8255_v27  ;;  %v4432_v6 = vsel %vm7078_vm6, %v5631_v19, %v4431_v5  ;;  %v4438_v29 = vrot.slane %v6727_v48, 5  ;;  %v4435_v21 = vsel %vm7078_vm6, %v4433_v22, %v4434_v43  ;;  %v6729_v19 = vld [vmem:[%s6825_s26 + $0x2c] sm:$0x1]  ;;  %v6675_v38 = vld [vmem:[%s6825_s26 + $0x60] sm:$0xff]   ;;  %v6744_v61 = vld [vmem:[%s6825_s26 + $0xc8] sm:$0x1] }
 0x121   : > { %v8305_v45 = vsel %vm7078_vm6, %v5643_v57, %v4515_v7  ;;  %v4517_v24 = vrot.slane %v4515_v7, 4  ;;  %v4058_v28 = vsel %vm6850_vm2, %v4053_v63, %v4057_v4  ;;  %v4445_v44 = vrot.slane %v6728_v55, 5  ;;  %v6676_v22 = vld [vmem:[%s6825_s26 + $0x6c] sm:$0xff]  }
 0x122   : > { %v5644_v35 = vrot.slane %v5628_v8, 9  ;;  %v4522_v59 = vrot.slane %v8084_v31, 5  ;;  %v5632_v4 = vrot.slane %v5616_v11, 9  ;;  %v5651_v63 = vcombine.low %v4432_v6, %v4435_v21  ;;  %v6730_v31 = vld [vmem:[%s6825_s26 + $0x38] sm:$0x1] }
 0x123   : > { %v8324_v27 = vsel %vm7078_vm6, %v4517_v24, %v4518_v18  ;;  %v4440_v26 = vrot.slane %v4438_v29, 4  ;;  %v5633_v57 = vrot.slane %v5617_v12, 9  ;;  %v4447_v7 = vrot.slane %v4445_v44, 4  ;;  %v5629_v8 = vld [vmem:[%s6825_s26 + $0xc0] sm:$0xe]  ;;  %v8624_v6 = vld [vmem:[#allocation5_spill] sm:$0xff] }
 0x124   : > { %v5663_v5 = vcombine.low %v8305_v45, %v8324_v27  ;;  %v8335_v43 = vsel %vm7078_vm6, %v5644_v35, %v4522_v59  ;;  %v4448_v18 = vrot.slane %v6730_v31, 5  ;;  %v4452_v11 = vrot.slane %v8624_v6, 5  ;;  %v5618_v35 = vld [vmem:[%s6825_s26 + $0x3c] sm:$0xe]  ;;  %v6731_v6 = vld [vmem:[%s6825_s26 + $0x70] sm:$0xf] }
 0x125   : > { %6290 = vmatmul.mubr.msk.bf16.gmra.mrb[24].mxu0 %vm685_vm3, %v5594_v3  ;;  %v5596_v3 = vcombine.low %v4048_v16, %v4058_v28  ;;  %v4439_v16 = vsel %vm7078_vm6, %v5632_v4, %v4438_v29  ;;  %v5645_v48 = vrot.slane %v5629_v8, 9  ;;  %v4446_v21 = vsel %vm7078_vm6, %v5633_v57, %v4445_v44  ;;  %v5327_v4 = vld [vmem:[%s6825_s26 + $0x6c] sm:$0xf] }
 0x126   : > { %6130 = vmatmul.mubr.msk.bf16.gmra.mrb[8].mxu1 %vm685_vm3, %v6673_v20  ;;  %6293 = vmatprep.mubr.msk.bf16.mxu0 %vm685_vm3, %v5595_v56  ;;  %v4441_v20 = vrot.slane %v6729_v19, 5  ;;  %v4525_v56 = vrot.slane %v8162_v51, 5  ;;  %v4449_v55 = vsel %vm7078_vm6, %v4447_v7, %v4448_v18  ;;  %v4529_v12 = vrot.slane %v8146_v13, 5 }
 0x127   : > { %6133 = vmatprep.mubr.msk.bf16.mxu1 %vm685_vm3, %v6674_v52  ;;  %v4524_v52 = vrot.slane %v4522_v59, 4  ;;  %v4532_v29 = vrot.slane %v8217_v40, 5  ;;  %v5630_v59 = vld [vmem:[%s6825_s26 + $0xcc] sm:$0xe]  ;;  %v4454_v44 = vrot.slane %v4452_v11, 4  ;;  %v2277_v57 = vshrl.u32 %v5327_v4, 16 }
 0x128   : > { %v4442_v28 = vsel %vm7078_vm6, %v4440_v26, %v4441_v20  ;;  %v8366_v19 = vsel %vm7078_vm6, %v5645_v48, %v4529_v12  ;;  %v4531_v20 = vrot.slane %v4529_v12, 4  ;;  %v8625_v26 = vld [vmem:[#allocation6_spill] sm:$0xff]  ;;  %v5646_v40 = vrot.slane %v5630_v59, 9 }
 0x129   : > { %v8342_v24 = vsel %vm7078_vm6, %v4524_v52, %v4525_v56  ;;  %v6677_v56 = vld [vmem:[%s6825_s26 + $0x78] sm:$0xff]   ;;  %v4455_v52 = vrot.slane %v8625_v26, 5  ;;  %v2280_v7 = vshll.u32 %v5327_v4, 16  ;;  %v4536_v18 = vrot.slane %v8205_v14, 5 }
 0x12a   : > { %v5664_v51 = vcombine.low %v8335_v43, %v8342_v24  ;;  %v8373_v13 = vsel %vm7078_vm6, %v4531_v20, %v4532_v29  ;;  %v4539_v8 = vrot.slane %v8253_v53, 5  ;;  %v2286_v48 = vshll.u32 %v6731_v6, 16  ;;  %v6679_v29 = vld [vmem:[%s6825_s26 + $0x90] sm:$0xff]   ;;  %v6680_v20 = vld [vmem:[%s6825_s26 + $0x9c] sm:$0xff]  }
 0x12b   : > { %v5665_v31 = vcombine.low %v8366_v19, %v8373_v13  ;;  %v8390_v14 = vsel %vm7078_vm6, %v5646_v40, %v4536_v18  ;;  %v4538_v53 = vrot.slane %v4536_v18, 4  ;;  %v5336_v18 = vld [vmem:[%s6825_s26 + $0x90] sm:$0xf]  ;;  %v2464_v50 = vshll.u32 %v6744_v61, 16 }
 0x12c   : > { %v2288_v59 = vrot.slane %v2286_v48, 5 }
 0x12d   : > { %6294 = vmatmul.mubr.msk.bf16.gmra.mrb[28].mxu0 %vm685_vm3, %v5596_v3  ;;  %v5652_v3 = vcombine.low %v4439_v16, %v4442_v28  ;;  %v4456_v28 = vsel %vm7078_vm6, %v4454_v44, %v4455_v52 }
 0x12e   : > { %6134 = vmatmul.mubr.msk.bf16.gmra.mrb[12].mxu1 %vm685_vm3, %v6675_v38  ;;  %6301 = vmatprep.mubr.msk.bf16.mxu0 %vm685_vm3, %v5651_v63  ;;  %v5653_v38 = vcombine.low %v4446_v21, %v4449_v55  ;;  %v5634_v63 = vrot.slane %v5618_v35, 9  ;;  %v2290_v21 = vshrl.u32 %v6731_v6, 16  ;;  %v2279_v55 = vrot.slane %v2277_v57, 4  ;;  %v6682_v6 = vld [vmem:[%s6825_s26 + $0xb4] sm:$0xff]  }
 0x12f   : > { %6137 = vmatprep.mubr.msk.bf16.mxu1 %vm685_vm3, %v6676_v22  ;;  %v6678_v22 = vld [vmem:[%s6825_s26 + $0x84] sm:$0xff]   ;;  %v2282_v35 = vrot.slane %v2280_v7, 5 }
 0x130   : > { %v4453_v16 = vsel %vm7078_vm6, %v5634_v63, %v4452_v11  ;;  %v8394_v11 = vsel %vm7078_vm6, %v4538_v53, %v4539_v8  ;;  %v6732_v63 = vld [vmem:[%s6825_s26 + $0x74] sm:$0x1]  ;;  %v6681_v8 = vld [vmem:[%s6825_s26 + $0xa8] sm:$0xff]   ;;  %v2349_v53 = vshrl.u32 %v5336_v18, 16 }
 0x131   : > { %v5654_v12 = vcombine.low %v4453_v16, %v4456_v28  ;;  %v5666_v4 = vcombine.low %v8390_v14, %v8394_v11  ;;  %v2296_v44 = vshll.u32 %v6732_v63, 16  ;;  %v5339_v28 = vld [vmem:[%s6825_s26 + $0x9c] sm:$0xf]  ;;  %v6736_v63 = vld [vmem:[%s6825_s26 + $0x8c] sm:$0x1] }
 0x133   : > { %v2298_v49 = vrot.slane %v2296_v44, 5  ;;  %v2344_v44 = vshll.u32 %v6736_v63, 16 }
 0x135   : > { %6302 = vmatmul.mubr.msk.bf16.vlgmr.msra.gmra.mrb[0].mxu0 %vm685_vm3, %v5652_v3  ;;  %v2292_v3 = vrot.slane %v2290_v21, 4 }
 0x136   : > { %6138 = vmatmul.mubr.msk.bf16.gmra.mrb[16].mxu1 %vm685_vm3, %v6677_v56  ;;  %6305 = vmatprep.mubr.msk.bf16.mxu0 %vm685_vm3, %v5653_v38  ;;  %v5333_v56 = vld [vmem:[%s6825_s26 + $0x84] sm:$0xf]  ;;  %v2283_v38 = vor.u32 %v2282_v35, %v2279_v55  ;;  %v2352_v55 = vshll.u32 %v5336_v18, 16 }
 0x137   : > { %6141 = vmatprep.mubr.msk.bf16.mxu1 %vm685_vm3, %v6678_v22  ;;  %v2293_v2 = vor.u32 %v2292_v3, %v2288_v59  ;;  %v2325_v26 = vshrl.u32 %v5333_v56, 16  ;;  %v2328_v52 = vshll.u32 %v5333_v56, 16  ;;  %v6733_v22 = vld [vmem:[%s6825_s26 + $0x88] sm:$0xf]  ;;  %v2376_v56 = vshll.u32 %v5339_v28, 16 }
 0x138   : > { %v2334_v40 = vshll.u32 %v6733_v22, 16  ;;  %v2338_v57 = vshrl.u32 %v6733_v22, 16  ;;  %v2284_v7 = vrot.slane %v2283_v38, 4  ;;  %v2382_v38 = vshll.u32 %v6735_v58, 16 }
 0x139   : > { %v2294_v16 = vrot.slane %v2293_v2, 4  ;;  %v2327_v33 = vrot.slane %v2325_v26, 4  ;;  %v2351_v26 = vrot.slane %v2349_v53, 4  ;;  %v2354_v25 = vrot.slane %v2352_v55, 5  ;;  %v6738_v55 = vld [vmem:[%s6825_s26 + $0xa4] sm:$0x1] }
 0x13a   : > { %v8414_v48 = vrot.slane %v2334_v40, 5  ;;  %v2340_v21 = vrot.slane %v2338_v57, 4  ;;  %v2289_v35 = vsel %vm6850_vm2, %v2284_v7, %v2288_v59  ;;  %v2378_v22 = vrot.slane %v2376_v56, 5  ;;  %v6683_v40 = vld [vmem:[%s6825_s26 + $0xc0] sm:$0xff]  }
 0x13b   : > { %v2299_v59 = vsel %vm6850_vm2, %v2294_v16, %v2298_v49  ;;  %v8437_v18 = vrot.slane %v2382_v38, 5  ;;  %v5342_v16 = vld [vmem:[%s6825_s26 + $0xa8] sm:$0xf] }
 0x13c   : > { %v2341_v2 = vor.u32 %v2340_v21, %v8414_v48  ;;  %v5363_v57 = vcombine.low %v2289_v35, %v2299_v59  ;;  %v2392_v35 = vshll.u32 %v6738_v55, 16  ;;  %v2400_v34 = vshll.u32 %v5342_v16, 16 }
 0x13d   : > { %6306 = vmatmul.mubr.msk.bf16.gmra.mrb[4].mxu0 %vm685_vm3, %v5654_v12  ;;  %v6734_v12 = vld [vmem:[%s6825_s26 + $0x94] sm:$0xf] }
 0x13e   : > { %6142 = vmatmul.mubr.msk.bf16.gmra.mrb[20].mxu1 %vm685_vm3, %v6679_v29  ;;  %6309 = vmatprep.mubr.msk.bf16.mxu0 %vm685_vm3, %v5655_v54  ;;  %v2330_v54 = vrot.slane %v2328_v52, 5  ;;  %v2358_v29 = vshll.u32 %v6734_v12, 16  ;;  %v2362_v3 = vshrl.u32 %v6734_v12, 16  ;;  %v2342_v49 = vrot.slane %v2341_v2, 4 }
 0x13f   : > { %6145 = vmatprep.mubr.msk.bf16.mxu1 %vm685_vm3, %v6680_v20  ;;  %v2373_v20 = vshrl.u32 %v5339_v28, 16  ;;  %v6737_v28 = vld [vmem:[%s6825_s26 + $0x98] sm:$0x1]  ;;  %v2397_v12 = vshrl.u32 %v5342_v16, 16  ;;  %v5348_v16 = vld [vmem:[%s6825_s26 + $0xc0] sm:$0xf] }
 0x140   : > { %v2331_v0 = vor.u32 %v2330_v54, %v2327_v33  ;;  %v8434_v23 = vrot.slane %v2358_v29, 5  ;;  %v2346_v33 = vrot.slane %v2344_v44, 5  ;;  %v2355_v54 = vor.u32 %v2354_v25, %v2351_v26  ;;  %v5345_v29 = vld [vmem:[%s6825_s26 + $0xb4] sm:$0xf] }
 0x141   : > { %v2375_v52 = vrot.slane %v2373_v20, 4  ;;  %v2410_v20 = vshrl.u32 %v6739_v17, 16  ;;  %v2421_v62 = vshrl.u32 %v5345_v29, 16  ;;  %v2424_v60 = vshll.u32 %v5345_v29, 16 }
 0x142   : > { %v2332_v7 = vrot.slane %v2331_v0, 4  ;;  %v2347_v59 = vsel %vm6850_vm2, %v2342_v49, %v2346_v33  ;;  %v2356_v0 = vrot.slane %v2355_v54, 4  ;;  %v2394_v44 = vrot.slane %v2392_v35, 5 }
 0x143   : > { %v2379_v53 = vor.u32 %v2378_v22, %v2375_v52  ;;  %v2399_v26 = vrot.slane %v2397_v12, 4  ;;  %v2412_v22 = vrot.slane %v2410_v20, 4  ;;  %v6743_v12 = vld [vmem:[%s6825_s26 + $0xbc] sm:$0x1] }
 0x144   : > { %v2337_v56 = vsel %vm6850_vm2, %v2332_v7, %v8414_v48  ;;  %v2361_v49 = vsel %vm6850_vm2, %v2356_v0, %v8434_v23  ;;  %v2440_v46 = vshll.u32 %v6743_v12, 16 }
 0x145   : > { %6310 = vmatmul.mubr.msk.bf16.gmra.mrb[8].mxu0 %vm685_vm3, %v5656_v47  ;;  %v2386_v47 = vshrl.u32 %v6735_v58, 16  ;;  %v2380_v63 = vrot.slane %v2379_v53, 4  ;;  %v5365_v48 = vcombine.low %v2337_v56, %v2347_v59 }
 0x146   : > { %6146 = vmatmul.mubr.msk.bf16.gmra.mrb[24].mxu1 %vm685_vm3, %v6681_v8  ;;  %6313 = vmatprep.mubr.msk.bf16.mxu0 %vm685_vm3, %v5657_v36  ;;  %v2364_v36 = vrot.slane %v2362_v3, 4 }
 0x147   : > { %6149 = vmatprep.mubr.msk.bf16.mxu1 %vm685_vm3, %v6682_v6  ;;  %v2388_v8 = vrot.slane %v2386_v47, 4  ;;  %v2368_v6 = vshll.u32 %v6737_v28, 16  ;;  %v2385_v54 = vsel %vm6850_vm2, %v2380_v63, %v8437_v18  ;;  %v2466_v63 = vrot.slane %v2464_v50, 5 }
 0x148   : > { %v2365_v21 = vor.u32 %v2364_v36, %v8434_v23  ;;  %v2402_v36 = vrot.slane %v2400_v34, 5  ;;  %v6741_v23 = vld [vmem:[%s6825_s26 + $0xb0] sm:$0x1] }
 0x149   : > { %v2389_v3 = vor.u32 %v2388_v8, %v8437_v18  ;;  %v2370_v58 = vrot.slane %v2368_v6, 5  ;;  %v2416_v28 = vshll.u32 %v6741_v23, 16  ;;  %v2445_v6 = vshrl.u32 %v5348_v16, 16 }
 0x14a   : > { %v2366_v2 = vrot.slane %v2365_v21, 4  ;;  %v2403_v15 = vor.u32 %v2402_v36, %v2399_v26  ;;  %v2448_v18 = vshll.u32 %v5348_v16, 16  ;;  %v6742_v21 = vld [vmem:[%s6825_s26 + $0xc4] sm:$0xf] }
 0x14b   : > { %v2390_v25 = vrot.slane %v2389_v3, 4  ;;  %v2454_v53 = vshll.u32 %v6742_v21, 16  ;;  %v2458_v55 = vshrl.u32 %v6742_v21, 16  ;;  %v2418_v34 = vrot.slane %v2416_v28, 5 }
 0x14c   : > { %v2371_v33 = vsel %vm6850_vm2, %v2366_v2, %v2370_v58  ;;  %v2404_v29 = vrot.slane %v2403_v15, 4  ;;  %v2442_v58 = vrot.slane %v2440_v46, 5 }
 0x14d   : > { %6314 = vmatmul.mubr.msk.bf16.gmra.mrb[12].mxu0 %vm685_vm3, %v5658_v39  ;;  %v2406_v39 = vshll.u32 %v6739_v17, 16  ;;  %v2395_v1 = vsel %vm6850_vm2, %v2390_v25, %v2394_v44  ;;  %v5366_v37 = vcombine.low %v2361_v49, %v2371_v33  ;;  %v2447_v17 = vrot.slane %v2445_v6, 4 }
 0x14e   : > { %6150 = vmatmul.mubr.msk.bf16.gmra.mrb[28].mxu1 %vm685_vm3, %v6683_v40  ;;  %6317 = vmatprep.mubr.msk.bf16.mxu0 %vm685_vm3, %v5659_v9  ;;  %v6740_v9 = vld [vmem:[%s6825_s26 + $0xb8] sm:$0xf]  ;;  %v2423_v40 = vrot.slane %v2421_v62, 4  ;;  %v2456_v20 = vrot.slane %v2454_v53, 5  ;;  %v2460_v56 = vrot.slane %v2458_v55, 4  ;;  %s5719_s26 = sshll.u32 %s8631_s9, 7 }
 0x14f   : > { %6173 = vmatprep.mubr.msk.bf16.mxu1 %vm685_vm3, %v5363_v57  ;;  %v2430_v38 = vshll.u32 %v6740_v9, 16  ;;  %v2434_v47 = vshrl.u32 %v6740_v9, 16  ;;  %v2408_v52 = vrot.slane %v2406_v39, 5  ;;  %v2426_v57 = vrot.slane %v2424_v60, 5  ;;  %s8529_s14 = scalar_lea.vmem %s8558_s2, %s5719_s26 }
 0x150   : > { %v2450_v39 = vrot.slane %v2448_v18, 5 }
 0x151   : > { %v2432_v7 = vrot.slane %v2430_v38, 5  ;;  %v2436_v8 = vrot.slane %v2434_v47, 4  ;;  %v2409_v62 = vsel %vm6850_vm2, %v2404_v29, %v2408_v52  ;;  %v2461_v38 = vor.u32 %v2460_v56, %v2456_v20 }
 0x152   : > { %v2451_v9 = vor.u32 %v2450_v39, %v2447_v17 }
 0x153   : > { %v2437_v35 = vor.u32 %v2436_v8, %v2432_v7  ;;  %v2462_v2 = vrot.slane %v2461_v38, 4 }
 0x154   : > { %v2452_v47 = vrot.slane %v2451_v9, 4 }
 0x155   : > { %6318 = vmatmul.mubr.msk.bf16.gmra.mrb[16].mxu0 %vm685_vm3, %v5660_v41  ;;  %v2413_v41 = vor.u32 %v2412_v22, %v2408_v52  ;;  %v2438_v0 = vrot.slane %v2437_v35, 4  ;;  %v2467_v26 = vsel %vm6850_vm2, %v2462_v2, %v2466_v63 }
 0x156   : > { %6174 = vmatmul.mubr.msk.bf16.vlgmr.msra.gmra.mrb[16].mxu1 %vm685_vm3, %v8240_v10  ;;  %6321 = vmatprep.mubr.msk.bf16.mxu0 %vm685_vm3, %v5661_v32  ;;  %v2427_v10 = vor.u32 %v2426_v57, %v2423_v40  ;;  %v5367_v32 = vcombine.low %v2385_v54, %v2395_v1  ;;  %v2457_v44 = vsel %vm6850_vm2, %v2452_v47, %v2456_v20 }
 0x157   : > { %6177 = vmatprep.mubr.msk.bf16.mxu1 %vm685_vm3, %v5365_v48  ;;  %v2414_v3 = vrot.slane %v2413_v41, 4  ;;  %v2443_v45 = vsel %vm6850_vm2, %v2438_v0, %v2442_v58  ;;  %v5370_v25 = vcombine.low %v2457_v44, %v2467_v26 }
 0x158   : > { %v2428_v59 = vrot.slane %v2427_v10, 4 }
 0x159   : > { %v2419_v60 = vsel %vm6850_vm2, %v2414_v3, %v2418_v34 }
 0x15a   : > { %v5368_v27 = vcombine.low %v2409_v62, %v2419_v60 }
 0x15d   : > { %6322 = vmatmul.mubr.msk.bf16.gmra.mrb[20].mxu0 %vm685_vm3, %v5662_v42  ;;  %v2433_v42 = vsel %vm6850_vm2, %v2428_v59, %v2432_v7 }
 0x15e   : > { %6178 = vmatmul.mubr.msk.bf16.gmra.mrb[20].mxu1 %vm685_vm3, %v5366_v37  ;;  %6325 = vmatprep.mubr.msk.bf16.mxu0 %vm685_vm3, %v5663_v5  ;;  %v5369_v5 = vcombine.low %v2433_v42, %v2443_v45 }
 0x15f   : > { %6181 = vmatprep.mubr.msk.bf16.mxu1 %vm685_vm3, %v5367_v32 }
 0x165   : > { %6326 = vmatmul.mubr.msk.bf16.gmra.mrb[24].mxu0 %vm685_vm3, %v5664_v51 }
 0x166   : > { %6182 = vmatmul.mubr.msk.bf16.gmra.mrb[24].mxu1 %vm685_vm3, %v5368_v27  ;;  %6329 = vmatprep.mubr.msk.bf16.mxu0 %vm685_vm3, %v5665_v31 }
 0x167   : > { %6185 = vmatprep.mubr.msk.bf16.mxu1 %vm685_vm3, %v5369_v5 }
 0x16d   : > { %6330 = vmatmul.mubr.msk.bf16.gmra.mrb[28].mxu0 %vm685_vm3, %v5666_v4 }
 0x16e   : > { %6186 = vmatmul.mubr.msk.bf16.gmra.mrb[28].mxu1 %vm685_vm3, %v5370_v25 }
 0x1e9   : > { %v6123_v43 = vpop.f32.mrb[0].mxu1 }
 0x1ea   : > { %v1877_v24 = vpop.f32.mrb[1].mxu1 }
 0x1eb   : > { %v6124_v51 = vpop.f32.mrb[2].mxu1 }
 0x1ec   : > { %v1880_v19 = vpop.f32.mrb[3].mxu1 }
 0x1f1   : > { %v6127_v13 = vpop.f32.mrb[4].mxu1 }
 0x1f2   : > { %v1893_v31 = vpop.f32.mrb[5].mxu1 }
 0x1f3   : > { %v6128_v36 = vpop.f32.mrb[6].mxu1 }
 0x1f4   : > { %v1896_v52 = vpop.f32.mrb[7].mxu1 }
 0x1f9   : > { %v6131_v22 = vpop.f32.mrb[8].mxu1 }
 0x1fa   : > { %v1909_v30 = vpop.f32.mrb[9].mxu1 }
 0x1fb   : > { %v6132_v48 = vpop.f32.mrb[10].mxu1 }
 0x1fc   : > { %v1912_v40 = vpop.f32.mrb[11].mxu1 }
 0x201   : > { %v6135_v57 = vpop.f32.mrb[12].mxu1 }
 0x202   : > { %v1925_v7 = vpop.f32.mrb[13].mxu1 }
 0x203   : > { %v6136_v14 = vpop.f32.mrb[14].mxu1 }
 0x204   : > { %v1928_v11 = vpop.f32.mrb[15].mxu1 }
 0x208   : > { %v6303_v4 = vpop.f32.mrb[0].mxu0 }
 0x209   : > { %v6337_v8 = vadd.f32 %v6303_v4, %v6123_v43  ;;  %v4688_v16 = vpop.f32.mrb[1].mxu0 }
 0x20a   : > { %v6338_v49 = vadd.f32 %v4688_v16, %v1877_v24  ;;  %v6304_v33 = vpop.f32.mrb[2].mxu0 }
 0x20b   : > { %v6339_v54 = vadd.f32 %v6304_v33, %v6124_v51  ;;  %v4691_v1 = vpop.f32.mrb[3].mxu0 }
 0x20c   : > { %v6340_v15 = vadd.f32 %v4691_v1, %v1880_v19 }
 0x20d   : > { %v5760_v41 = vpack.c.bf16 %v6339_v54, %v6337_v8 }
 0x20e   : > { %v5755_v23 = vpack.c.bf16 %v6340_v15, %v6338_v49 }
 0x20f   : > { %5832 = vst [vmem:[%s8529_s14 + $0x8] sm:$0xff] %v5760_v41  }
 0x210   : > { %5756 = vst [vmem:[%s8529_s14] sm:$0xff] %v5755_v23   ;;  %v6307_v28 = vpop.f32.mrb[4].mxu0 }
 0x211   : > { %v6341_v6 = vadd.f32 %v6307_v28, %v6127_v13  ;;  %v4704_v18 = vpop.f32.mrb[5].mxu0 }
 0x212   : > { %v6342_v21 = vadd.f32 %v4704_v18, %v1893_v31  ;;  %v6308_v53 = vpop.f32.mrb[6].mxu0 }
 0x213   : > { %v6343_v55 = vadd.f32 %v6308_v53, %v6128_v36  ;;  %v4707_v10 = vpop.f32.mrb[7].mxu0 }
 0x214   : > { %v6344_v35 = vadd.f32 %v4707_v10, %v1896_v52 }
 0x215   : > { %v5770_v12 = vpack.c.bf16 %v6343_v55, %v6341_v6 }
 0x216   : > { %v5765_v46 = vpack.c.bf16 %v6344_v35, %v6342_v21 }
 0x217   : > { %5834 = vst [vmem:[%s8529_s14 + $0x18] sm:$0xff] %v5770_v12  }
 0x218   : > { %5833 = vst [vmem:[%s8529_s14 + $0x10] sm:$0xff] %v5765_v46   ;;  %v6311_v37 = vpop.f32.mrb[8].mxu0 }
 0x219   : > { %v6345_v32 = vadd.f32 %v6311_v37, %v6131_v22  ;;  %v4720_v29 = vpop.f32.mrb[9].mxu0 }
 0x21a   : > { %v6346_v3 = vadd.f32 %v4720_v29, %v1909_v30  ;;  %v6312_v34 = vpop.f32.mrb[10].mxu0 }
 0x21b   : > { %v6347_v17 = vadd.f32 %v6312_v34, %v6132_v48  ;;  %v4723_v39 = vpop.f32.mrb[11].mxu0 }
 0x21c   : > { %v6348_v20 = vadd.f32 %v4723_v39, %v1912_v40 }
 0x21d   : > { %v5780_v56 = vpack.c.bf16 %v6347_v17, %v6345_v32 }
 0x21e   : > { %v5775_v59 = vpack.c.bf16 %v6348_v20, %v6346_v3 }
 0x21f   : > { %5836 = vst [vmem:[%s8529_s14 + $0x28] sm:$0xff] %v5780_v56  }
 0x220   : > { %5835 = vst [vmem:[%s8529_s14 + $0x20] sm:$0xff] %v5775_v59   ;;  %v6315_v0 = vpop.f32.mrb[12].mxu0 }
 0x221   : > { %v6349_v58 = vadd.f32 %v6315_v0, %v6135_v57  ;;  %v4736_v62 = vpop.f32.mrb[13].mxu0 }
 0x222   : > { %v6350_v60 = vadd.f32 %v4736_v62, %v1925_v7  ;;  %v6316_v9 = vpop.f32.mrb[14].mxu0 }
 0x223   : > { %v6351_v38 = vadd.f32 %v6316_v9, %v6136_v14  ;;  %v4739_v61 = vpop.f32.mrb[15].mxu0 }
 0x224   : > { %v6352_v50 = vadd.f32 %v4739_v61, %v1928_v11 }
 0x225   : > { %v5790_v42 = vpack.c.bf16 %v6351_v38, %v6349_v58 }
 0x226   : > { %v5785_v45 = vpack.c.bf16 %v6352_v50, %v6350_v60 }
 0x227   : > { %5838 = vst [vmem:[%s8529_s14 + $0x38] sm:$0xff] %v5790_v42  }
 0x228   : > { %5837 = vst [vmem:[%s8529_s14 + $0x30] sm:$0xff] %v5785_v45   ;;  %v6319_v27 = vpop.f32.mrb[16].mxu0 }
 0x229   : > { %v6175_v5 = vpop.f32.mrb[16].mxu1  ;;  %v4752_v47 = vpop.f32.mrb[17].mxu0 }
 0x22a   : > { %v6353_v2 = vadd.f32 %v6319_v27, %v6175_v5  ;;  %v2679_v63 = vpop.f32.mrb[17].mxu1  ;;  %v6320_v44 = vpop.f32.mrb[18].mxu0 }
 0x22b   : > { %v6354_v26 = vadd.f32 %v4752_v47, %v2679_v63  ;;  %v6176_v25 = vpop.f32.mrb[18].mxu1  ;;  %v4755_v43 = vpop.f32.mrb[19].mxu0 }
 0x22c   : > { %v6355_v24 = vadd.f32 %v6320_v44, %v6176_v25  ;;  %v2682_v51 = vpop.f32.mrb[19].mxu1 }
 0x22d   : > { %v6356_v19 = vadd.f32 %v4755_v43, %v2682_v51 }
 0x22e   : > { %v5800_v13 = vpack.c.bf16 %v6355_v24, %v6353_v2 }
 0x22f   : > { %v5795_v31 = vpack.c.bf16 %v6356_v19, %v6354_v26 }
 0x230   : > { %5840 = vst [vmem:[%s8529_s14 + $0x48] sm:$0xff] %v5800_v13   ;;  %v6323_v36 = vpop.f32.mrb[20].mxu0 }
 0x231   : > { %5839 = vst [vmem:[%s8529_s14 + $0x40] sm:$0xff] %v5795_v31   ;;  %v6179_v52 = vpop.f32.mrb[20].mxu1  ;;  %v4768_v22 = vpop.f32.mrb[21].mxu0 }
 0x232   : > { %v6357_v30 = vadd.f32 %v6323_v36, %v6179_v52  ;;  %v2695_v48 = vpop.f32.mrb[21].mxu1  ;;  %v6324_v40 = vpop.f32.mrb[22].mxu0 }
 0x233   : > { %v6358_v57 = vadd.f32 %v4768_v22, %v2695_v48  ;;  %v6180_v7 = vpop.f32.mrb[22].mxu1  ;;  %v4771_v14 = vpop.f32.mrb[23].mxu0 }
 0x234   : > { %v6359_v11 = vadd.f32 %v6324_v40, %v6180_v7  ;;  %v2698_v4 = vpop.f32.mrb[23].mxu1 }
 0x235   : > { %v6360_v8 = vadd.f32 %v4771_v14, %v2698_v4 }
 0x236   : > { %v5810_v16 = vpack.c.bf16 %v6359_v11, %v6357_v30 }
 0x237   : > { %v5805_v49 = vpack.c.bf16 %v6360_v8, %v6358_v57 }
 0x238   : > { %5842 = vst [vmem:[%s8529_s14 + $0x58] sm:$0xff] %v5810_v16   ;;  %v6327_v33 = vpop.f32.mrb[24].mxu0 }
 0x239   : > { %5841 = vst [vmem:[%s8529_s14 + $0x50] sm:$0xff] %v5805_v49   ;;  %v6183_v54 = vpop.f32.mrb[24].mxu1  ;;  %v4784_v1 = vpop.f32.mrb[25].mxu0 }
 0x23a   : > { %v6361_v15 = vadd.f32 %v6327_v33, %v6183_v54  ;;  %v2711_v41 = vpop.f32.mrb[25].mxu1  ;;  %v6328_v23 = vpop.f32.mrb[26].mxu0 }
 0x23b   : > { %v6362_v28 = vadd.f32 %v4784_v1, %v2711_v41  ;;  %v6184_v6 = vpop.f32.mrb[26].mxu1  ;;  %v4787_v18 = vpop.f32.mrb[27].mxu0 }
 0x23c   : > { %v6363_v21 = vadd.f32 %v6328_v23, %v6184_v6  ;;  %v2714_v53 = vpop.f32.mrb[27].mxu1 }
 0x23d   : > { %v6364_v55 = vadd.f32 %v4787_v18, %v2714_v53 }
 0x23e   : > { %v5820_v10 = vpack.c.bf16 %v6363_v21, %v6361_v15 }
 0x23f   : > { %v5815_v35 = vpack.c.bf16 %v6364_v55, %v6362_v28 }
 0x240   : > { %5844 = vst [vmem:[%s8529_s14 + $0x68] sm:$0xff] %v5820_v10   ;;  %v6331_v12 = vpop.f32.mrb[28].mxu0 }
 0x241   : > { %5843 = vst [vmem:[%s8529_s14 + $0x60] sm:$0xff] %v5815_v35   ;;  %v6187_v46 = vpop.f32.mrb[28].mxu1  ;;  %v4800_v37 = vpop.f32.mrb[29].mxu0 }
 0x242   : > { %v6365_v32 = vadd.f32 %v6331_v12, %v6187_v46  ;;  %v2727_v29 = vpop.f32.mrb[29].mxu1  ;;  %v6332_v3 = vpop.f32.mrb[30].mxu0 }
 0x243   : > { %v6366_v34 = vadd.f32 %v4800_v37, %v2727_v29  ;;  %v6188_v17 = vpop.f32.mrb[30].mxu1  ;;  %v4803_v39 = vpop.f32.mrb[31].mxu0 }
 0x244   : > { %v6367_v20 = vadd.f32 %v6332_v3, %v6188_v17  ;;  %v2730_v56 = vpop.f32.mrb[31].mxu1 }
 0x245   : > { %v6368_v59 = vadd.f32 %v4803_v39, %v2730_v56 }
 0x246   : > { %v5830_v0 = vpack.c.bf16 %v6367_v20, %v6365_v32 }
 0x247   : > { %v5825_v58 = vpack.c.bf16 %v6368_v59, %v6366_v34 }
 0x248   : > { %5846 = vst [vmem:[%s8529_s14 + $0x78] sm:$0xff] %v5830_v0  }
 0x249   : > { %5845 = vst [vmem:[%s8529_s14 + $0x70] sm:$0xff] %v5825_v58  }
 0x24a PF: > { %s12_s11 = sadd.s32 1, %s6767_s11   ;;  %s8626_s9 = smov %s6763_s10 }
 0x24b   : > { %p9_p5 = scmp.ge.s32.totalorder %s12_s11, 4   ;;  %s8627_s10 = smov %s8629_s12 }
 0x24d   :  { %11 = sbr.rel (!%p9_p5) target bundleno = 2 (0x2), region = 68 }

</bundles_post_ra>
